<compile_context>
chip_gen: v6e
topology: v6e:2x2x1
jax: 0.10.0
libtpu: 0.0.40
codegen_flags: <defaults>
</compile_context>

<pallas_src>
import functools

import jax
import jax.numpy as jnp
from jax.experimental import pallas as pl
from jax.experimental.pallas import tpu as pltpu


def _deformnet_kernel(target_ref, part_ref,
                      wq_ref, wk_ref, wv_ref, wo_ref,
                      w1g_ref, w1p_ref, b1_ref, w2_ref, b2_ref,
                      out_ref, nodes_ref,
                      *, num_stages, num_heads, graph_dim,
                      b_tile, n_parts, n_pad):
    """One grid step == B_TILE batch elements."""
    head_dim = graph_dim // num_heads
    scale = 1.0 / (head_dim ** 0.5)
    n_real = n_parts + 2

    part = part_ref[...]                                          # (B, P, C)

    # ---- build padded node set in a sublane-aligned VMEM scratch ----
    # node order: [part_0 .. part_{P-1}, global_src, target, zero padding]
    nodes_ref[:, 0:n_parts, :] = part
    nodes_ref[:, n_parts:n_parts + 1, :] = jnp.mean(part, axis=1, keepdims=True)
    nodes_ref[:, n_parts + 1:n_parts + 2, :] = target_ref[...]
    if n_pad > n_real:
        nodes_ref[:, n_real:, :] = jnp.zeros(
            (b_tile, n_pad - n_real, graph_dim), jnp.float32)

    nodes2d = nodes_ref[...].reshape(b_tile * n_pad, graph_dim)   # (B*Np, C)

    if n_pad > n_real:
        col = jax.lax.broadcasted_iota(jnp.int32, (1, 1, n_pad), 2)
        key_mask = col < n_real                                   # mask padded key cols
    else:
        key_mask = None

    # ---- GraphAttentionNet: num_stages of multi-head self-attention + residual ----
    for s in range(num_stages):
        upd = None
        for h in range(num_heads):
            idx = s * num_heads + h
            q = jnp.dot(nodes2d, wq_ref[idx], preferred_element_type=jnp.float32)
            k = jnp.dot(nodes2d, wk_ref[idx], preferred_element_type=jnp.float32)
            v = jnp.dot(nodes2d, wv_ref[idx], preferred_element_type=jnp.float32)
            q3 = q.reshape(b_tile, n_pad, head_dim)
            k3 = k.reshape(b_tile, n_pad, head_dim)
            v3 = v.reshape(b_tile, n_pad, head_dim)
            scores = jnp.einsum('bqd,bkd->bqk', q3, k3,
                                preferred_element_type=jnp.float32) * scale
            if key_mask is not None:
                scores = jnp.where(key_mask, scores, -1e30)
            m = jnp.max(scores, axis=-1, keepdims=True)
            e = jnp.exp(scores - m)
            denom = jnp.sum(e, axis=-1, keepdims=True)
            attn = e * pl.reciprocal(denom, approx=True)
            ctx = jnp.einsum('bqk,bkd->bqd', attn, v3,
                             preferred_element_type=jnp.float32)  # (B, Np, hd)
            contrib = jnp.dot(ctx.reshape(b_tile * n_pad, head_dim), wo_ref[idx],
                              preferred_element_type=jnp.float32)  # (B*Np, C)
            upd = contrib if upd is None else upd + contrib
        nodes2d = nodes2d + upd

    nodes3 = nodes2d.reshape(b_tile, n_pad, graph_dim)
    parts_a = nodes3[:, 0:n_parts, :]                                        # (B, P, C)
    g0 = nodes3[:, n_parts:n_parts + 1, :].reshape(b_tile, graph_dim)        # attended global_src
    g1 = nodes3[:, n_parts + 1:n_parts + 2, :].reshape(b_tile, graph_dim)    # attended target

    # ---- param_decoder on full_r = [g0 ; g1 ; part] without materialising full_r ----
    bias_h = (jnp.dot(g0, w1g_ref[0], preferred_element_type=jnp.float32)
              + jnp.dot(g1, w1g_ref[1], preferred_element_type=jnp.float32)
              + b1_ref[...])                                                 # (B, hidden)
    hidden = bias_h.shape[-1]
    h1 = jnp.dot(parts_a.reshape(b_tile * n_parts, graph_dim), w1p_ref[...],
                 preferred_element_type=jnp.float32)
    h1 = h1.reshape(b_tile, n_parts, hidden) + bias_h[:, None, :]
    h1 = jnp.maximum(h1, 0.0)
    out = jnp.dot(h1.reshape(b_tile * n_parts, hidden), w2_ref[...],
                  preferred_element_type=jnp.float32)
    out = out.reshape(b_tile, n_parts, -1) + b2_ref[...]
    out_ref[...] = out                                   # (B, P, OUT_PAD) lane-dense store


def deformnet_matchingnet_forward(target_f, src_part_f, per_point_f, weights, *,
                                  num_stages, num_heads, graph_dim, output_dim,
                                  b_tile=8):
    """target_f: (bs, C); src_part_f: (bs, P, C); per_point_f unused by forward."""
    del per_point_f
    bs, n_parts, C = src_part_f.shape
    assert C == graph_dim and target_f.shape == (bs, C)
    assert graph_dim % num_heads == 0
    wq, wk, wv, wo, w1, b1, w2, b2 = weights
    hidden = w1.shape[1]
    head_dim = graph_dim // num_heads

    n_real = n_parts + 2
    n_pad = ((n_real + 7) // 8) * 8                      # sublane-aligned node count
    out_pad = ((output_dim + 127) // 128) * 128          # lane-dense output width

    b_tile = max(1, min(b_tile, bs))
    bs_pad = ((bs + b_tile - 1) // b_tile) * b_tile

    target3 = target_f.reshape(bs, 1, C)
    part3 = src_part_f
    if bs_pad != bs:
        pad = bs_pad - bs
        target3 = jnp.concatenate(
            [target3, jnp.zeros((pad, 1, C), target3.dtype)], axis=0)
        part3 = jnp.concatenate(
            [part3, jnp.zeros((pad, n_parts, C), part3.dtype)], axis=0)

    # Pre-split per-head weights in plain JAX (free, outside the kernel) so the
    # kernel has no lane-axis head slices / concats.
    S, H, hd = num_stages, num_heads, head_dim
    wq_f = wq.reshape(S, C, H, hd).transpose(0, 2, 1, 3).reshape(S * H, C, hd)
    wk_f = wk.reshape(S, C, H, hd).transpose(0, 2, 1, 3).reshape(S * H, C, hd)
    wv_f = wv.reshape(S, C, H, hd).transpose(0, 2, 1, 3).reshape(S * H, C, hd)
    wo_f = wo.reshape(S, H, hd, C).reshape(S * H, hd, C)

    # Decoder W1 split into [global_src | target | part] row blocks.
    w1g = jnp.stack([w1[0:C], w1[C:2 * C]], axis=0)              # (2, C, hidden)
    w1p = w1[2 * C:3 * C]                                        # (C, hidden)
    # Lane-dense output: pad W2 / b2 columns, slice back in the wrapper.
    w2p = jnp.pad(w2, ((0, 0), (0, out_pad - output_dim)))
    b2p = jnp.pad(b2, ((0, 0), (0, out_pad - output_dim)))

    kernel = functools.partial(
        _deformnet_kernel,
        num_stages=num_stages, num_heads=num_heads, graph_dim=graph_dim,
        b_tile=b_tile, n_parts=n_parts, n_pad=n_pad)

    n_tok = bs_pad * n_pad
    flops = int(
        num_stages * num_heads * (4 * 2 * n_tok * graph_dim * head_dim
                                  + 2 * 2 * bs_pad * n_pad * n_pad * head_dim)
        + 2 * bs_pad * n_parts * graph_dim * hidden
        + 2 * bs_pad * 2 * graph_dim * hidden
        + 2 * bs_pad * n_parts * hidden * out_pad)
    transcendentals = int(bs_pad * num_stages * num_heads * n_pad * n_pad)
    weight_elems = int(wq_f.size + wk_f.size + wv_f.size + wo_f.size
                       + w1g.size + w1p.size + b1.size + w2p.size + b2p.size)
    bytes_accessed = int(4 * (target3.size + part3.size + weight_elems
                              + bs_pad * n_parts * out_pad))

    full3 = lambda b: (0, 0, 0)
    full2 = lambda b: (0, 0)

    out = pl.pallas_call(
        kernel,
        out_shape=jax.ShapeDtypeStruct((bs_pad, n_parts, out_pad), jnp.float32),
        grid_spec=pltpu.PrefetchScalarGridSpec(
            num_scalar_prefetch=0,
            grid=(bs_pad // b_tile,),
            in_specs=[
                pl.BlockSpec((b_tile, 1, C), lambda b: (b, 0, 0)),        # target_f
                pl.BlockSpec((b_tile, n_parts, C), lambda b: (b, 0, 0)),  # src_part_f
                pl.BlockSpec((S * H, C, hd), full3),                      # wq per head
                pl.BlockSpec((S * H, C, hd), full3),                      # wk per head
                pl.BlockSpec((S * H, C, hd), full3),                      # wv per head
                pl.BlockSpec((S * H, hd, C), full3),                      # wo per head
                pl.BlockSpec((2, C, hidden), full3),                      # W1 global rows
                pl.BlockSpec((C, hidden), full2),                         # W1 part rows
                pl.BlockSpec((1, hidden), full2),                         # b1
                pl.BlockSpec((hidden, out_pad), full2),                   # W2 (lane padded)
                pl.BlockSpec((1, out_pad), full2),                        # b2 (lane padded)
            ],
            out_specs=pl.BlockSpec((b_tile, n_parts, out_pad),
                                   lambda b: (b, 0, 0)),
            scratch_shapes=[pltpu.VMEM((b_tile, n_pad, C), jnp.float32)],
        ),
        compiler_params=pltpu.CompilerParams(
            dimension_semantics=("parallel",)),
        cost_estimate=pl.CostEstimate(flops=flops,
                                      transcendentals=transcendentals,
                                      bytes_accessed=bytes_accessed),
    )(target3, part3, wq_f, wk_f, wv_f, wo_f, w1g, w1p, b1, w2p, b2p)

    return out[:bs, :, :output_dim]


# ----------------------------- pure-JAX reference -----------------------------
def _reference(target_f, src_part_f, weights, *, num_stages, num_heads, graph_dim):
    wq, wk, wv, wo, w1, b1, w2, b2 = weights
    head_dim = graph_dim // num_heads
    scale = 1.0 / (head_dim ** 0.5)

    def one(tf, pf):                       # tf: (C,), pf: (P, C)
        nodes = jnp.concatenate([jnp.mean(pf, axis=0, keepdims=True),
                                 tf[None, :], pf], axis=0)
        for s in range(num_stages):
            q = nodes @ wq[s]
            k = nodes @ wk[s]
            v = nodes @ wv[s]
            outs = []
            for h in range(num_heads):
                sl = slice(h * head_dim, (h + 1) * head_dim)
                sc = (q[:, sl] @ k[:, sl].T) * scale
                a = jax.nn.softmax(sc, axis=-1)
                outs.append(a @ v[:, sl])
            nodes = nodes + jnp.concatenate(outs, axis=-1) @ wo[s]
        P = pf.shape[0]
        gr = jnp.broadcast_to(jnp.concatenate([nodes[0], nodes[1]])[None, :],
                              (P, 2 * graph_dim))
        full_r = jnp.concatenate([gr, nodes[2:]], axis=-1)
        h1 = jnp.maximum(full_r @ w1 + b1[0], 0.0)
        return h1 @ w2 + b2[0]

    return jax.vmap(one)(target_f, src_part_f)


if __name__ == "__main__":
    # small shapes consistent with the module's forward
    bs = 2
    graph_dim = 32          # module default 128, scaled down
    num_heads = 4
    num_stages = 2
    max_num_parts = 8
    output_dim = 6
    hidden = 64             # param_decoder hidden (module default 256, scaled down)
    input_dim = 3 * graph_dim

    key = jax.random.PRNGKey(0)
    ks = jax.random.split(key, 12)

    target_f = jax.random.normal(ks[0], (bs, graph_dim), jnp.float32)
    src_part_f = jax.random.normal(ks[1], (bs, max_num_parts, graph_dim), jnp.float32)
    per_point_f = jax.random.normal(ks[2], (bs, 16, 32), jnp.float32)   # unused by forward

    s = 0.1
    wq = s * jax.random.normal(ks[3], (num_stages, graph_dim, graph_dim), jnp.float32)
    wk = s * jax.random.normal(ks[4], (num_stages, graph_dim, graph_dim), jnp.float32)
    wv = s * jax.random.normal(ks[5], (num_stages, graph_dim, graph_dim), jnp.float32)
    wo = s * jax.random.normal(ks[6], (num_stages, graph_dim, graph_dim), jnp.float32)
    w1 = s * jax.random.normal(ks[7], (input_dim, hidden), jnp.float32)
    b1 = s * jax.random.normal(ks[8], (1, hidden), jnp.float32)
    w2 = s * jax.random.normal(ks[9], (hidden, output_dim), jnp.float32)
    b2 = s * jax.random.normal(ks[10], (1, output_dim), jnp.float32)
    weights = (wq, wk, wv, wo, w1, b1, w2, b2)

    out = deformnet_matchingnet_forward(
        target_f, src_part_f, per_point_f, weights,
        num_stages=num_stages, num_heads=num_heads,
        graph_dim=graph_dim, output_dim=output_dim, b_tile=8)
    out = jax.block_until_ready(out)

    ref = _reference(target_f, src_part_f, weights,
                     num_stages=num_stages, num_heads=num_heads, graph_dim=graph_dim)
    assert out.shape == (bs, max_num_parts, output_dim)
    # tolerance accounts for pl.reciprocal(approx=True) in the softmax
    assert jnp.allclose(out, ref, atol=5e-3, rtol=5e-3)

    print("KERNEL_OK")
</pallas_src>

<mosaic_0001>
module attributes {stable_mosaic.version = 11 : i64} {
  func.func @_deformnet_kernel(%arg0: i32, %arg1: memref<2x1x32xf32, #tpu.memory_space<vmem>>, %arg2: memref<2x8x32xf32, #tpu.memory_space<vmem>>, %arg3: memref<8x32x8xf32, #tpu.memory_space<vmem>>, %arg4: memref<8x32x8xf32, #tpu.memory_space<vmem>>, %arg5: memref<8x32x8xf32, #tpu.memory_space<vmem>>, %arg6: memref<8x8x32xf32, #tpu.memory_space<vmem>>, %arg7: memref<2x32x64xf32, #tpu.memory_space<vmem>>, %arg8: memref<32x64xf32, #tpu.memory_space<vmem>>, %arg9: memref<1x64xf32, #tpu.memory_space<vmem>>, %arg10: memref<64x128xf32, #tpu.memory_space<vmem>>, %arg11: memref<1x128xf32, #tpu.memory_space<vmem>>, %arg12: memref<2x8x128xf32, #tpu.memory_space<vmem>>, %arg13: memref<2x16x32xf32, #tpu.memory_space<vmem>>) attributes {dimension_semantics = [#tpu.dimension_semantics<parallel>], iteration_bounds = array<i64: 1>, scalar_prefetch = 0 : i64, scratch_operands = 1 : i64, tpu.core_type = #tpu.core_type<tc>, window_params = [{transform_indices = @transform_0, window_bounds = array<i64: 2, 1, 32>}, {transform_indices = @transform_1, window_bounds = array<i64: 2, 8, 32>}, {pipeline_mode = #tpu.pipeline_mode<synchronous>, transform_indices = @transform_2, window_bounds = array<i64: 8, 32, 8>}, {pipeline_mode = #tpu.pipeline_mode<synchronous>, transform_indices = @transform_3, window_bounds = array<i64: 8, 32, 8>}, {pipeline_mode = #tpu.pipeline_mode<synchronous>, transform_indices = @transform_4, window_bounds = array<i64: 8, 32, 8>}, {pipeline_mode = #tpu.pipeline_mode<synchronous>, transform_indices = @transform_5, window_bounds = array<i64: 8, 8, 32>}, {pipeline_mode = #tpu.pipeline_mode<synchronous>, transform_indices = @transform_6, window_bounds = array<i64: 2, 32, 64>}, {pipeline_mode = #tpu.pipeline_mode<synchronous>, transform_indices = @transform_7, window_bounds = array<i64: 32, 64>}, {pipeline_mode = #tpu.pipeline_mode<synchronous>, transform_indices = @transform_8, window_bounds = array<i64: 1, 64>}, {pipeline_mode = #tpu.pipeline_mode<synchronous>, transform_indices = @transform_9, window_bounds = array<i64: 64, 128>}, {pipeline_mode = #tpu.pipeline_mode<synchronous>, transform_indices = @transform_10, window_bounds = array<i64: 1, 128>}, {transform_indices = @transform_11, window_bounds = array<i64: 2, 8, 128>}]} {
    %c0 = arith.constant 0 : index
    %c0_0 = arith.constant 0 : index
    %c0_1 = arith.constant 0 : index
    %0 = vector.load %arg2[%c0, %c0_0, %c0_1] : memref<2x8x32xf32, #tpu.memory_space<vmem>>, vector<2x8x32xf32>
    %c0_2 = arith.constant 0 : index
    %c0_3 = arith.constant 0 : index
    %c0_4 = arith.constant 0 : index
    %1 = vector.load %arg13[%c0_2, %c0_3, %c0_4] : memref<2x16x32xf32, #tpu.memory_space<vmem>>, vector<2x8x32xf32>
    tpu.vector_store %arg13[%c0_2, %c0_3, %c0_4], %0 {strides = array<i32>} : memref<2x16x32xf32, #tpu.memory_space<vmem>>, vector<2x8x32xf32>,
    %cst = arith.constant dense<0.000000e+00> : vector<2x32xf32>
    %2 = vector.multi_reduction <add>, %0, %cst [1] : vector<2x8x32xf32> to vector<2x32xf32>
    %3 = vector.shape_cast %2 : vector<2x32xf32> to vector<2x1x32xf32>
    %cst_5 = arith.constant 8.000000e+00 : f32
    %4 = vector.broadcast %cst_5 : f32 to vector<2x1x32xf32>
    %5 = arith.divf %3, %4 : vector<2x1x32xf32>
    %c0_6 = arith.constant 0 : index
    %c8 = arith.constant 8 : index
    %c0_7 = arith.constant 0 : index
    %6 = vector.load %arg13[%c0_6, %c8, %c0_7] : memref<2x16x32xf32, #tpu.memory_space<vmem>>, vector<2x1x32xf32>
    tpu.vector_store %arg13[%c0_6, %c8, %c0_7], %5 {strides = array<i32>} : memref<2x16x32xf32, #tpu.memory_space<vmem>>, vector<2x1x32xf32>,
    %c0_8 = arith.constant 0 : index
    %c0_9 = arith.constant 0 : index
    %c0_10 = arith.constant 0 : index
    %7 = vector.load %arg1[%c0_8, %c0_9, %c0_10] : memref<2x1x32xf32, #tpu.memory_space<vmem>>, vector<2x1x32xf32>
    %c0_11 = arith.constant 0 : index
    %c9 = arith.constant 9 : index
    %c0_12 = arith.constant 0 : index
    %8 = vector.load %arg13[%c0_11, %c9, %c0_12] : memref<2x16x32xf32, #tpu.memory_space<vmem>>, vector<2x1x32xf32>
    tpu.vector_store %arg13[%c0_11, %c9, %c0_12], %7 {strides = array<i32>} : memref<2x16x32xf32, #tpu.memory_space<vmem>>, vector<2x1x32xf32>,
    %cst_13 = arith.constant 0.000000e+00 : f32
    %9 = vector.broadcast %cst_13 : f32 to vector<2x6x32xf32>
    %c0_14 = arith.constant 0 : index
    %c10 = arith.constant 10 : index
    %c0_15 = arith.constant 0 : index
    %10 = vector.load %arg13[%c0_14, %c10, %c0_15] : memref<2x16x32xf32, #tpu.memory_space<vmem>>, vector<2x6x32xf32>
    tpu.vector_store %arg13[%c0_14, %c10, %c0_15], %9 {strides = array<i32>} : memref<2x16x32xf32, #tpu.memory_space<vmem>>, vector<2x6x32xf32>,
    %c0_16 = arith.constant 0 : index
    %c0_17 = arith.constant 0 : index
    %c0_18 = arith.constant 0 : index
    %11 = vector.load %arg13[%c0_16, %c0_17, %c0_18] : memref<2x16x32xf32, #tpu.memory_space<vmem>>, vector<2x16x32xf32>
    %12 = vector.shape_cast %11 : vector<2x16x32xf32> to vector<32x32xf32>
    %13 = tpu.iota {dimensions = array<i32: 2>} : vector<1x1x16xi32>
    %c10_i32 = arith.constant 10 : i32
    %14 = vector.broadcast %c10_i32 : i32 to vector<1x1x16xi32>
    %15 = arith.cmpi slt, %13, %14 : vector<1x1x16xi32>
    %c0_19 = arith.constant 0 : index
    %c0_20 = arith.constant 0 : index
    %c0_21 = arith.constant 0 : index
    %16 = vector.load %arg3[%c0_19, %c0_20, %c0_21] : memref<8x32x8xf32, #tpu.memory_space<vmem>>, vector<1x32x8xf32>
    %17 = vector.shape_cast %16 : vector<1x32x8xf32> to vector<32x8xf32>
    %cst_22 = arith.constant dense<0.000000e+00> : vector<32x8xf32>
    %18 = tpu.matmul %12, %17, %cst_22 {dimension_numbers = #tpu.dot_dimension_numbers<[1], [0], [0], [1], [0, 0, 1, 1], [], []>} : vector<32x32xf32>, vector<32x8xf32>, vector<32x8xf32> -> vector<32x8xf32>
    %c0_23 = arith.constant 0 : index
    %c0_24 = arith.constant 0 : index
    %c0_25 = arith.constant 0 : index
    %19 = vector.load %arg4[%c0_23, %c0_24, %c0_25] : memref<8x32x8xf32, #tpu.memory_space<vmem>>, vector<1x32x8xf32>
    %20 = vector.shape_cast %19 : vector<1x32x8xf32> to vector<32x8xf32>
    %cst_26 = arith.constant dense<0.000000e+00> : vector<32x8xf32>
    %21 = tpu.matmul %12, %20, %cst_26 {dimension_numbers = #tpu.dot_dimension_numbers<[1], [0], [0], [1], [0, 0, 1, 1], [], []>} : vector<32x32xf32>, vector<32x8xf32>, vector<32x8xf32> -> vector<32x8xf32>
    %c0_27 = arith.constant 0 : index
    %c0_28 = arith.constant 0 : index
    %c0_29 = arith.constant 0 : index
    %22 = vector.load %arg5[%c0_27, %c0_28, %c0_29] : memref<8x32x8xf32, #tpu.memory_space<vmem>>, vector<1x32x8xf32>
    %23 = vector.shape_cast %22 : vector<1x32x8xf32> to vector<32x8xf32>
    %cst_30 = arith.constant dense<0.000000e+00> : vector<32x8xf32>
    %24 = tpu.matmul %12, %23, %cst_30 {dimension_numbers = #tpu.dot_dimension_numbers<[1], [0], [0], [1], [0, 0, 1, 1], [], []>} : vector<32x32xf32>, vector<32x8xf32>, vector<32x8xf32> -> vector<32x8xf32>
    %25 = vector.shape_cast %18 : vector<32x8xf32> to vector<2x16x8xf32>
    %26 = vector.shape_cast %21 : vector<32x8xf32> to vector<2x16x8xf32>
    %27 = vector.shape_cast %24 : vector<32x8xf32> to vector<2x16x8xf32>
    "tpu.trace_start"() <{level = 10 : i32, message = "bqd,bkd->bqk"}> : () -> ()
    %cst_31 = arith.constant dense<0.000000e+00> : vector<2x16x16xf32>
    %28 = tpu.matmul %25, %26, %cst_31 {dimension_numbers = #tpu.dot_dimension_numbers<[2], [2], [1], [1], [0, 0, 0, 1, 1, 1], [0], [0]>} : vector<2x16x8xf32>, vector<2x16x8xf32>, vector<2x16x16xf32> -> vector<2x16x16xf32>
    "tpu.trace_stop"() : () -> ()
    %cst_32 = arith.constant 0.353553385 : f32
    %29 = vector.broadcast %cst_32 : f32 to vector<2x16x16xf32>
    %30 = arith.mulf %28, %29 : vector<2x16x16xf32>
    %cst_33 = arith.constant -1.000000e+30 : f32
    %31 = vector.shape_cast %15 : vector<1x1x16xi1> to vector<1x1x16xi1>
    %32 = vector.broadcast %31 : vector<1x1x16xi1> to vector<2x16x16xi1>
    %33 = vector.broadcast %cst_33 : f32 to vector<2x16x16xf32>
    %34 = arith.select %32, %30, %33 : vector<2x16x16xi1>, vector<2x16x16xf32>
    %cst_34 = arith.constant dense<0xFF800000> : vector<2x16xf32>
    %35 = vector.multi_reduction <maximumf>, %34, %cst_34 [2] : vector<2x16x16xf32> to vector<2x16xf32>
    %36 = vector.shape_cast %35 : vector<2x16xf32> to vector<2x16x1xf32>
    %37 = vector.broadcast %36 : vector<2x16x1xf32> to vector<2x16x16xf32>
    %38 = arith.subf %34, %37 : vector<2x16x16xf32>
    %39 = math.exp %38 : vector<2x16x16xf32>
    %cst_35 = arith.constant dense<0.000000e+00> : vector<2x16xf32>
    %40 = vector.multi_reduction <add>, %39, %cst_35 [2] : vector<2x16x16xf32> to vector<2x16xf32>
    %41 = vector.shape_cast %40 : vector<2x16xf32> to vector<2x16x1xf32>
    %42 = tpu.reciprocal %41 {approx = true} : vector<2x16x1xf32> -> vector<2x16x1xf32>
    %43 = vector.broadcast %42 : vector<2x16x1xf32> to vector<2x16x16xf32>
    %44 = arith.mulf %39, %43 : vector<2x16x16xf32>
    "tpu.trace_start"() <{level = 10 : i32, message = "bqk,bkd->bqd"}> : () -> ()
    %cst_36 = arith.constant dense<0.000000e+00> : vector<2x16x8xf32>
    %45 = tpu.matmul %44, %27, %cst_36 {dimension_numbers = #tpu.dot_dimension_numbers<[2], [1], [1], [2], [0, 0, 0, 1, 1, 2], [0], [0]>} : vector<2x16x16xf32>, vector<2x16x8xf32>, vector<2x16x8xf32> -> vector<2x16x8xf32>
    "tpu.trace_stop"() : () -> ()
    %46 = vector.shape_cast %45 : vector<2x16x8xf32> to vector<32x8xf32>
    %c0_37 = arith.constant 0 : index
    %c0_38 = arith.constant 0 : index
    %c0_39 = arith.constant 0 : index
    %47 = vector.load %arg6[%c0_37, %c0_38, %c0_39] : memref<8x8x32xf32, #tpu.memory_space<vmem>>, vector<1x8x32xf32>
    %48 = vector.shape_cast %47 : vector<1x8x32xf32> to vector<8x32xf32>
    %cst_40 = arith.constant dense<0.000000e+00> : vector<32x32xf32>
    %49 = tpu.matmul %46, %48, %cst_40 {dimension_numbers = #tpu.dot_dimension_numbers<[1], [0], [0], [1], [0, 0, 1, 1], [], []>} : vector<32x8xf32>, vector<8x32xf32>, vector<32x32xf32> -> vector<32x32xf32>
    %c1 = arith.constant 1 : index
    %c0_41 = arith.constant 0 : index
    %c0_42 = arith.constant 0 : index
    %50 = vector.load %arg3[%c1, %c0_41, %c0_42] : memref<8x32x8xf32, #tpu.memory_space<vmem>>, vector<1x32x8xf32>
    %51 = vector.shape_cast %50 : vector<1x32x8xf32> to vector<32x8xf32>
    %cst_43 = arith.constant dense<0.000000e+00> : vector<32x8xf32>
    %52 = tpu.matmul %12, %51, %cst_43 {dimension_numbers = #tpu.dot_dimension_numbers<[1], [0], [0], [1], [0, 0, 1, 1], [], []>} : vector<32x32xf32>, vector<32x8xf32>, vector<32x8xf32> -> vector<32x8xf32>
    %c1_44 = arith.constant 1 : index
    %c0_45 = arith.constant 0 : index
    %c0_46 = arith.constant 0 : index
    %53 = vector.load %arg4[%c1_44, %c0_45, %c0_46] : memref<8x32x8xf32, #tpu.memory_space<vmem>>, vector<1x32x8xf32>
    %54 = vector.shape_cast %53 : vector<1x32x8xf32> to vector<32x8xf32>
    %cst_47 = arith.constant dense<0.000000e+00> : vector<32x8xf32>
    %55 = tpu.matmul %12, %54, %cst_47 {dimension_numbers = #tpu.dot_dimension_numbers<[1], [0], [0], [1], [0, 0, 1, 1], [], []>} : vector<32x32xf32>, vector<32x8xf32>, vector<32x8xf32> -> vector<32x8xf32>
    %c1_48 = arith.constant 1 : index
    %c0_49 = arith.constant 0 : index
    %c0_50 = arith.constant 0 : index
    %56 = vector.load %arg5[%c1_48, %c0_49, %c0_50] : memref<8x32x8xf32, #tpu.memory_space<vmem>>, vector<1x32x8xf32>
    %57 = vector.shape_cast %56 : vector<1x32x8xf32> to vector<32x8xf32>
    %cst_51 = arith.constant dense<0.000000e+00> : vector<32x8xf32>
    %58 = tpu.matmul %12, %57, %cst_51 {dimension_numbers = #tpu.dot_dimension_numbers<[1], [0], [0], [1], [0, 0, 1, 1], [], []>} : vector<32x32xf32>, vector<32x8xf32>, vector<32x8xf32> -> vector<32x8xf32>
    %59 = vector.shape_cast %52 : vector<32x8xf32> to vector<2x16x8xf32>
    %60 = vector.shape_cast %55 : vector<32x8xf32> to vector<2x16x8xf32>
    %61 = vector.shape_cast %58 : vector<32x8xf32> to vector<2x16x8xf32>
    "tpu.trace_start"() <{level = 10 : i32, message = "bqd,bkd->bqk"}> : () -> ()
    %cst_52 = arith.constant dense<0.000000e+00> : vector<2x16x16xf32>
    %62 = tpu.matmul %59, %60, %cst_52 {dimension_numbers = #tpu.dot_dimension_numbers<[2], [2], [1], [1], [0, 0, 0, 1, 1, 1], [0], [0]>} : vector<2x16x8xf32>, vector<2x16x8xf32>, vector<2x16x16xf32> -> vector<2x16x16xf32>
    "tpu.trace_stop"() : () -> ()
    %cst_53 = arith.constant 0.353553385 : f32
    %63 = vector.broadcast %cst_53 : f32 to vector<2x16x16xf32>
    %64 = arith.mulf %62, %63 : vector<2x16x16xf32>
    %cst_54 = arith.constant -1.000000e+30 : f32
    %65 = vector.shape_cast %15 : vector<1x1x16xi1> to vector<1x1x16xi1>
    %66 = vector.broadcast %65 : vector<1x1x16xi1> to vector<2x16x16xi1>
    %67 = vector.broadcast %cst_54 : f32 to vector<2x16x16xf32>
    %68 = arith.select %66, %64, %67 : vector<2x16x16xi1>, vector<2x16x16xf32>
    %cst_55 = arith.constant dense<0xFF800000> : vector<2x16xf32>
    %69 = vector.multi_reduction <maximumf>, %68, %cst_55 [2] : vector<2x16x16xf32> to vector<2x16xf32>
    %70 = vector.shape_cast %69 : vector<2x16xf32> to vector<2x16x1xf32>
    %71 = vector.broadcast %70 : vector<2x16x1xf32> to vector<2x16x16xf32>
    %72 = arith.subf %68, %71 : vector<2x16x16xf32>
    %73 = math.exp %72 : vector<2x16x16xf32>
    %cst_56 = arith.constant dense<0.000000e+00> : vector<2x16xf32>
    %74 = vector.multi_reduction <add>, %73, %cst_56 [2] : vector<2x16x16xf32> to vector<2x16xf32>
    %75 = vector.shape_cast %74 : vector<2x16xf32> to vector<2x16x1xf32>
    %76 = tpu.reciprocal %75 {approx = true} : vector<2x16x1xf32> -> vector<2x16x1xf32>
    %77 = vector.broadcast %76 : vector<2x16x1xf32> to vector<2x16x16xf32>
    %78 = arith.mulf %73, %77 : vector<2x16x16xf32>
    "tpu.trace_start"() <{level = 10 : i32, message = "bqk,bkd->bqd"}> : () -> ()
    %cst_57 = arith.constant dense<0.000000e+00> : vector<2x16x8xf32>
    %79 = tpu.matmul %78, %61, %cst_57 {dimension_numbers = #tpu.dot_dimension_numbers<[2], [1], [1], [2], [0, 0, 0, 1, 1, 2], [0], [0]>} : vector<2x16x16xf32>, vector<2x16x8xf32>, vector<2x16x8xf32> -> vector<2x16x8xf32>
    "tpu.trace_stop"() : () -> ()
    %80 = vector.shape_cast %79 : vector<2x16x8xf32> to vector<32x8xf32>
    %c1_58 = arith.constant 1 : index
    %c0_59 = arith.constant 0 : index
    %c0_60 = arith.constant 0 : index
    %81 = vector.load %arg6[%c1_58, %c0_59, %c0_60] : memref<8x8x32xf32, #tpu.memory_space<vmem>>, vector<1x8x32xf32>
    %82 = vector.shape_cast %81 : vector<1x8x32xf32> to vector<8x32xf32>
    %cst_61 = arith.constant dense<0.000000e+00> : vector<32x32xf32>
    %83 = tpu.matmul %80, %82, %cst_61 {dimension_numbers = #tpu.dot_dimension_numbers<[1], [0], [0], [1], [0, 0, 1, 1], [], []>} : vector<32x8xf32>, vector<8x32xf32>, vector<32x32xf32> -> vector<32x32xf32>
    %84 = arith.addf %49, %83 : vector<32x32xf32>
    %c2 = arith.constant 2 : index
    %c0_62 = arith.constant 0 : index
    %c0_63 = arith.constant 0 : index
    %85 = vector.load %arg3[%c2, %c0_62, %c0_63] : memref<8x32x8xf32, #tpu.memory_space<vmem>>, vector<1x32x8xf32>
    %86 = vector.shape_cast %85 : vector<1x32x8xf32> to vector<32x8xf32>
    %cst_64 = arith.constant dense<0.000000e+00> : vector<32x8xf32>
    %87 = tpu.matmul %12, %86, %cst_64 {dimension_numbers = #tpu.dot_dimension_numbers<[1], [0], [0], [1], [0, 0, 1, 1], [], []>} : vector<32x32xf32>, vector<32x8xf32>, vector<32x8xf32> -> vector<32x8xf32>
    %c2_65 = arith.constant 2 : index
    %c0_66 = arith.constant 0 : index
    %c0_67 = arith.constant 0 : index
    %88 = vector.load %arg4[%c2_65, %c0_66, %c0_67] : memref<8x32x8xf32, #tpu.memory_space<vmem>>, vector<1x32x8xf32>
    %89 = vector.shape_cast %88 : vector<1x32x8xf32> to vector<32x8xf32>
    %cst_68 = arith.constant dense<0.000000e+00> : vector<32x8xf32>
    %90 = tpu.matmul %12, %89, %cst_68 {dimension_numbers = #tpu.dot_dimension_numbers<[1], [0], [0], [1], [0, 0, 1, 1], [], []>} : vector<32x32xf32>, vector<32x8xf32>, vector<32x8xf32> -> vector<32x8xf32>
    %c2_69 = arith.constant 2 : index
    %c0_70 = arith.constant 0 : index
    %c0_71 = arith.constant 0 : index
    %91 = vector.load %arg5[%c2_69, %c0_70, %c0_71] : memref<8x32x8xf32, #tpu.memory_space<vmem>>, vector<1x32x8xf32>
    %92 = vector.shape_cast %91 : vector<1x32x8xf32> to vector<32x8xf32>
    %cst_72 = arith.constant dense<0.000000e+00> : vector<32x8xf32>
    %93 = tpu.matmul %12, %92, %cst_72 {dimension_numbers = #tpu.dot_dimension_numbers<[1], [0], [0], [1], [0, 0, 1, 1], [], []>} : vector<32x32xf32>, vector<32x8xf32>, vector<32x8xf32> -> vector<32x8xf32>
    %94 = vector.shape_cast %87 : vector<32x8xf32> to vector<2x16x8xf32>
    %95 = vector.shape_cast %90 : vector<32x8xf32> to vector<2x16x8xf32>
    %96 = vector.shape_cast %93 : vector<32x8xf32> to vector<2x16x8xf32>
    "tpu.trace_start"() <{level = 10 : i32, message = "bqd,bkd->bqk"}> : () -> ()
    %cst_73 = arith.constant dense<0.000000e+00> : vector<2x16x16xf32>
    %97 = tpu.matmul %94, %95, %cst_73 {dimension_numbers = #tpu.dot_dimension_numbers<[2], [2], [1], [1], [0, 0, 0, 1, 1, 1], [0], [0]>} : vector<2x16x8xf32>, vector<2x16x8xf32>, vector<2x16x16xf32> -> vector<2x16x16xf32>
    "tpu.trace_stop"() : () -> ()
    %cst_74 = arith.constant 0.353553385 : f32
    %98 = vector.broadcast %cst_74 : f32 to vector<2x16x16xf32>
    %99 = arith.mulf %97, %98 : vector<2x16x16xf32>
    %cst_75 = arith.constant -1.000000e+30 : f32
    %100 = vector.shape_cast %15 : vector<1x1x16xi1> to vector<1x1x16xi1>
    %101 = vector.broadcast %100 : vector<1x1x16xi1> to vector<2x16x16xi1>
    %102 = vector.broadcast %cst_75 : f32 to vector<2x16x16xf32>
    %103 = arith.select %101, %99, %102 : vector<2x16x16xi1>, vector<2x16x16xf32>
    %cst_76 = arith.constant dense<0xFF800000> : vector<2x16xf32>
    %104 = vector.multi_reduction <maximumf>, %103, %cst_76 [2] : vector<2x16x16xf32> to vector<2x16xf32>
    %105 = vector.shape_cast %104 : vector<2x16xf32> to vector<2x16x1xf32>
    %106 = vector.broadcast %105 : vector<2x16x1xf32> to vector<2x16x16xf32>
    %107 = arith.subf %103, %106 : vector<2x16x16xf32>
    %108 = math.exp %107 : vector<2x16x16xf32>
    %cst_77 = arith.constant dense<0.000000e+00> : vector<2x16xf32>
    %109 = vector.multi_reduction <add>, %108, %cst_77 [2] : vector<2x16x16xf32> to vector<2x16xf32>
    %110 = vector.shape_cast %109 : vector<2x16xf32> to vector<2x16x1xf32>
    %111 = tpu.reciprocal %110 {approx = true} : vector<2x16x1xf32> -> vector<2x16x1xf32>
    %112 = vector.broadcast %111 : vector<2x16x1xf32> to vector<2x16x16xf32>
    %113 = arith.mulf %108, %112 : vector<2x16x16xf32>
    "tpu.trace_start"() <{level = 10 : i32, message = "bqk,bkd->bqd"}> : () -> ()
    %cst_78 = arith.constant dense<0.000000e+00> : vector<2x16x8xf32>
    %114 = tpu.matmul %113, %96, %cst_78 {dimension_numbers = #tpu.dot_dimension_numbers<[2], [1], [1], [2], [0, 0, 0, 1, 1, 2], [0], [0]>} : vector<2x16x16xf32>, vector<2x16x8xf32>, vector<2x16x8xf32> -> vector<2x16x8xf32>
    "tpu.trace_stop"() : () -> ()
    %115 = vector.shape_cast %114 : vector<2x16x8xf32> to vector<32x8xf32>
    %c2_79 = arith.constant 2 : index
    %c0_80 = arith.constant 0 : index
    %c0_81 = arith.constant 0 : index
    %116 = vector.load %arg6[%c2_79, %c0_80, %c0_81] : memref<8x8x32xf32, #tpu.memory_space<vmem>>, vector<1x8x32xf32>
    %117 = vector.shape_cast %116 : vector<1x8x32xf32> to vector<8x32xf32>
    %cst_82 = arith.constant dense<0.000000e+00> : vector<32x32xf32>
    %118 = tpu.matmul %115, %117, %cst_82 {dimension_numbers = #tpu.dot_dimension_numbers<[1], [0], [0], [1], [0, 0, 1, 1], [], []>} : vector<32x8xf32>, vector<8x32xf32>, vector<32x32xf32> -> vector<32x32xf32>
    %119 = arith.addf %84, %118 : vector<32x32xf32>
    %c3 = arith.constant 3 : index
    %c0_83 = arith.constant 0 : index
    %c0_84 = arith.constant 0 : index
    %120 = vector.load %arg3[%c3, %c0_83, %c0_84] : memref<8x32x8xf32, #tpu.memory_space<vmem>>, vector<1x32x8xf32>
    %121 = vector.shape_cast %120 : vector<1x32x8xf32> to vector<32x8xf32>
    %cst_85 = arith.constant dense<0.000000e+00> : vector<32x8xf32>
    %122 = tpu.matmul %12, %121, %cst_85 {dimension_numbers = #tpu.dot_dimension_numbers<[1], [0], [0], [1], [0, 0, 1, 1], [], []>} : vector<32x32xf32>, vector<32x8xf32>, vector<32x8xf32> -> vector<32x8xf32>
    %c3_86 = arith.constant 3 : index
    %c0_87 = arith.constant 0 : index
    %c0_88 = arith.constant 0 : index
    %123 = vector.load %arg4[%c3_86, %c0_87, %c0_88] : memref<8x32x8xf32, #tpu.memory_space<vmem>>, vector<1x32x8xf32>
    %124 = vector.shape_cast %123 : vector<1x32x8xf32> to vector<32x8xf32>
    %cst_89 = arith.constant dense<0.000000e+00> : vector<32x8xf32>
    %125 = tpu.matmul %12, %124, %cst_89 {dimension_numbers = #tpu.dot_dimension_numbers<[1], [0], [0], [1], [0, 0, 1, 1], [], []>} : vector<32x32xf32>, vector<32x8xf32>, vector<32x8xf32> -> vector<32x8xf32>
    %c3_90 = arith.constant 3 : index
    %c0_91 = arith.constant 0 : index
    %c0_92 = arith.constant 0 : index
    %126 = vector.load %arg5[%c3_90, %c0_91, %c0_92] : memref<8x32x8xf32, #tpu.memory_space<vmem>>, vector<1x32x8xf32>
    %127 = vector.shape_cast %126 : vector<1x32x8xf32> to vector<32x8xf32>
    %cst_93 = arith.constant dense<0.000000e+00> : vector<32x8xf32>
    %128 = tpu.matmul %12, %127, %cst_93 {dimension_numbers = #tpu.dot_dimension_numbers<[1], [0], [0], [1], [0, 0, 1, 1], [], []>} : vector<32x32xf32>, vector<32x8xf32>, vector<32x8xf32> -> vector<32x8xf32>
    %129 = vector.shape_cast %122 : vector<32x8xf32> to vector<2x16x8xf32>
    %130 = vector.shape_cast %125 : vector<32x8xf32> to vector<2x16x8xf32>
    %131 = vector.shape_cast %128 : vector<32x8xf32> to vector<2x16x8xf32>
    "tpu.trace_start"() <{level = 10 : i32, message = "bqd,bkd->bqk"}> : () -> ()
    %cst_94 = arith.constant dense<0.000000e+00> : vector<2x16x16xf32>
    %132 = tpu.matmul %129, %130, %cst_94 {dimension_numbers = #tpu.dot_dimension_numbers<[2], [2], [1], [1], [0, 0, 0, 1, 1, 1], [0], [0]>} : vector<2x16x8xf32>, vector<2x16x8xf32>, vector<2x16x16xf32> -> vector<2x16x16xf32>
    "tpu.trace_stop"() : () -> ()
    %cst_95 = arith.constant 0.353553385 : f32
    %133 = vector.broadcast %cst_95 : f32 to vector<2x16x16xf32>
    %134 = arith.mulf %132, %133 : vector<2x16x16xf32>
    %cst_96 = arith.constant -1.000000e+30 : f32
    %135 = vector.shape_cast %15 : vector<1x1x16xi1> to vector<1x1x16xi1>
    %136 = vector.broadcast %135 : vector<1x1x16xi1> to vector<2x16x16xi1>
    %137 = vector.broadcast %cst_96 : f32 to vector<2x16x16xf32>
    %138 = arith.select %136, %134, %137 : vector<2x16x16xi1>, vector<2x16x16xf32>
    %cst_97 = arith.constant dense<0xFF800000> : vector<2x16xf32>
    %139 = vector.multi_reduction <maximumf>, %138, %cst_97 [2] : vector<2x16x16xf32> to vector<2x16xf32>
    %140 = vector.shape_cast %139 : vector<2x16xf32> to vector<2x16x1xf32>
    %141 = vector.broadcast %140 : vector<2x16x1xf32> to vector<2x16x16xf32>
    %142 = arith.subf %138, %141 : vector<2x16x16xf32>
    %143 = math.exp %142 : vector<2x16x16xf32>
    %cst_98 = arith.constant dense<0.000000e+00> : vector<2x16xf32>
    %144 = vector.multi_reduction <add>, %143, %cst_98 [2] : vector<2x16x16xf32> to vector<2x16xf32>
    %145 = vector.shape_cast %144 : vector<2x16xf32> to vector<2x16x1xf32>
    %146 = tpu.reciprocal %145 {approx = true} : vector<2x16x1xf32> -> vector<2x16x1xf32>
    %147 = vector.broadcast %146 : vector<2x16x1xf32> to vector<2x16x16xf32>
    %148 = arith.mulf %143, %147 : vector<2x16x16xf32>
    "tpu.trace_start"() <{level = 10 : i32, message = "bqk,bkd->bqd"}> : () -> ()
    %cst_99 = arith.constant dense<0.000000e+00> : vector<2x16x8xf32>
    %149 = tpu.matmul %148, %131, %cst_99 {dimension_numbers = #tpu.dot_dimension_numbers<[2], [1], [1], [2], [0, 0, 0, 1, 1, 2], [0], [0]>} : vector<2x16x16xf32>, vector<2x16x8xf32>, vector<2x16x8xf32> -> vector<2x16x8xf32>
    "tpu.trace_stop"() : () -> ()
    %150 = vector.shape_cast %149 : vector<2x16x8xf32> to vector<32x8xf32>
    %c3_100 = arith.constant 3 : index
    %c0_101 = arith.constant 0 : index
    %c0_102 = arith.constant 0 : index
    %151 = vector.load %arg6[%c3_100, %c0_101, %c0_102] : memref<8x8x32xf32, #tpu.memory_space<vmem>>, vector<1x8x32xf32>
    %152 = vector.shape_cast %151 : vector<1x8x32xf32> to vector<8x32xf32>
    %cst_103 = arith.constant dense<0.000000e+00> : vector<32x32xf32>
    %153 = tpu.matmul %150, %152, %cst_103 {dimension_numbers = #tpu.dot_dimension_numbers<[1], [0], [0], [1], [0, 0, 1, 1], [], []>} : vector<32x8xf32>, vector<8x32xf32>, vector<32x32xf32> -> vector<32x32xf32>
    %154 = arith.addf %119, %153 : vector<32x32xf32>
    %155 = arith.addf %12, %154 : vector<32x32xf32>
    %c4 = arith.constant 4 : index
    %c0_104 = arith.constant 0 : index
    %c0_105 = arith.constant 0 : index
    %156 = vector.load %arg3[%c4, %c0_104, %c0_105] : memref<8x32x8xf32, #tpu.memory_space<vmem>>, vector<1x32x8xf32>
    %157 = vector.shape_cast %156 : vector<1x32x8xf32> to vector<32x8xf32>
    %cst_106 = arith.constant dense<0.000000e+00> : vector<32x8xf32>
    %158 = tpu.matmul %155, %157, %cst_106 {dimension_numbers = #tpu.dot_dimension_numbers<[1], [0], [0], [1], [0, 0, 1, 1], [], []>} : vector<32x32xf32>, vector<32x8xf32>, vector<32x8xf32> -> vector<32x8xf32>
    %c4_107 = arith.constant 4 : index
    %c0_108 = arith.constant 0 : index
    %c0_109 = arith.constant 0 : index
    %159 = vector.load %arg4[%c4_107, %c0_108, %c0_109] : memref<8x32x8xf32, #tpu.memory_space<vmem>>, vector<1x32x8xf32>
    %160 = vector.shape_cast %159 : vector<1x32x8xf32> to vector<32x8xf32>
    %cst_110 = arith.constant dense<0.000000e+00> : vector<32x8xf32>
    %161 = tpu.matmul %155, %160, %cst_110 {dimension_numbers = #tpu.dot_dimension_numbers<[1], [0], [0], [1], [0, 0, 1, 1], [], []>} : vector<32x32xf32>, vector<32x8xf32>, vector<32x8xf32> -> vector<32x8xf32>
    %c4_111 = arith.constant 4 : index
    %c0_112 = arith.constant 0 : index
    %c0_113 = arith.constant 0 : index
    %162 = vector.load %arg5[%c4_111, %c0_112, %c0_113] : memref<8x32x8xf32, #tpu.memory_space<vmem>>, vector<1x32x8xf32>
    %163 = vector.shape_cast %162 : vector<1x32x8xf32> to vector<32x8xf32>
    %cst_114 = arith.constant dense<0.000000e+00> : vector<32x8xf32>
    %164 = tpu.matmul %155, %163, %cst_114 {dimension_numbers = #tpu.dot_dimension_numbers<[1], [0], [0], [1], [0, 0, 1, 1], [], []>} : vector<32x32xf32>, vector<32x8xf32>, vector<32x8xf32> -> vector<32x8xf32>
    %165 = vector.shape_cast %158 : vector<32x8xf32> to vector<2x16x8xf32>
    %166 = vector.shape_cast %161 : vector<32x8xf32> to vector<2x16x8xf32>
    %167 = vector.shape_cast %164 : vector<32x8xf32> to vector<2x16x8xf32>
    "tpu.trace_start"() <{level = 10 : i32, message = "bqd,bkd->bqk"}> : () -> ()
    %cst_115 = arith.constant dense<0.000000e+00> : vector<2x16x16xf32>
    %168 = tpu.matmul %165, %166, %cst_115 {dimension_numbers = #tpu.dot_dimension_numbers<[2], [2], [1], [1], [0, 0, 0, 1, 1, 1], [0], [0]>} : vector<2x16x8xf32>, vector<2x16x8xf32>, vector<2x16x16xf32> -> vector<2x16x16xf32>
    "tpu.trace_stop"() : () -> ()
    %cst_116 = arith.constant 0.353553385 : f32
    %169 = vector.broadcast %cst_116 : f32 to vector<2x16x16xf32>
    %170 = arith.mulf %168, %169 : vector<2x16x16xf32>
    %cst_117 = arith.constant -1.000000e+30 : f32
    %171 = vector.shape_cast %15 : vector<1x1x16xi1> to vector<1x1x16xi1>
    %172 = vector.broadcast %171 : vector<1x1x16xi1> to vector<2x16x16xi1>
    %173 = vector.broadcast %cst_117 : f32 to vector<2x16x16xf32>
    %174 = arith.select %172, %170, %173 : vector<2x16x16xi1>, vector<2x16x16xf32>
    %cst_118 = arith.constant dense<0xFF800000> : vector<2x16xf32>
    %175 = vector.multi_reduction <maximumf>, %174, %cst_118 [2] : vector<2x16x16xf32> to vector<2x16xf32>
    %176 = vector.shape_cast %175 : vector<2x16xf32> to vector<2x16x1xf32>
    %177 = vector.broadcast %176 : vector<2x16x1xf32> to vector<2x16x16xf32>
    %178 = arith.subf %174, %177 : vector<2x16x16xf32>
    %179 = math.exp %178 : vector<2x16x16xf32>
    %cst_119 = arith.constant dense<0.000000e+00> : vector<2x16xf32>
    %180 = vector.multi_reduction <add>, %179, %cst_119 [2] : vector<2x16x16xf32> to vector<2x16xf32>
    %181 = vector.shape_cast %180 : vector<2x16xf32> to vector<2x16x1xf32>
    %182 = tpu.reciprocal %181 {approx = true} : vector<2x16x1xf32> -> vector<2x16x1xf32>
    %183 = vector.broadcast %182 : vector<2x16x1xf32> to vector<2x16x16xf32>
    %184 = arith.mulf %179, %183 : vector<2x16x16xf32>
    "tpu.trace_start"() <{level = 10 : i32, message = "bqk,bkd->bqd"}> : () -> ()
    %cst_120 = arith.constant dense<0.000000e+00> : vector<2x16x8xf32>
    %185 = tpu.matmul %184, %167, %cst_120 {dimension_numbers = #tpu.dot_dimension_numbers<[2], [1], [1], [2], [0, 0, 0, 1, 1, 2], [0], [0]>} : vector<2x16x16xf32>, vector<2x16x8xf32>, vector<2x16x8xf32> -> vector<2x16x8xf32>
    "tpu.trace_stop"() : () -> ()
    %186 = vector.shape_cast %185 : vector<2x16x8xf32> to vector<32x8xf32>
    %c4_121 = arith.constant 4 : index
    %c0_122 = arith.constant 0 : index
    %c0_123 = arith.constant 0 : index
    %187 = vector.load %arg6[%c4_121, %c0_122, %c0_123] : memref<8x8x32xf32, #tpu.memory_space<vmem>>, vector<1x8x32xf32>
    %188 = vector.shape_cast %187 : vector<1x8x32xf32> to vector<8x32xf32>
    %cst_124 = arith.constant dense<0.000000e+00> : vector<32x32xf32>
    %189 = tpu.matmul %186, %188, %cst_124 {dimension_numbers = #tpu.dot_dimension_numbers<[1], [0], [0], [1], [0, 0, 1, 1], [], []>} : vector<32x8xf32>, vector<8x32xf32>, vector<32x32xf32> -> vector<32x32xf32>
    %c5 = arith.constant 5 : index
    %c0_125 = arith.constant 0 : index
    %c0_126 = arith.constant 0 : index
    %190 = vector.load %arg3[%c5, %c0_125, %c0_126] : memref<8x32x8xf32, #tpu.memory_space<vmem>>, vector<1x32x8xf32>
    %191 = vector.shape_cast %190 : vector<1x32x8xf32> to vector<32x8xf32>
    %cst_127 = arith.constant dense<0.000000e+00> : vector<32x8xf32>
    %192 = tpu.matmul %155, %191, %cst_127 {dimension_numbers = #tpu.dot_dimension_numbers<[1], [0], [0], [1], [0, 0, 1, 1], [], []>} : vector<32x32xf32>, vector<32x8xf32>, vector<32x8xf32> -> vector<32x8xf32>
    %c5_128 = arith.constant 5 : index
    %c0_129 = arith.constant 0 : index
    %c0_130 = arith.constant 0 : index
    %193 = vector.load %arg4[%c5_128, %c0_129, %c0_130] : memref<8x32x8xf32, #tpu.memory_space<vmem>>, vector<1x32x8xf32>
    %194 = vector.shape_cast %193 : vector<1x32x8xf32> to vector<32x8xf32>
    %cst_131 = arith.constant dense<0.000000e+00> : vector<32x8xf32>
    %195 = tpu.matmul %155, %194, %cst_131 {dimension_numbers = #tpu.dot_dimension_numbers<[1], [0], [0], [1], [0, 0, 1, 1], [], []>} : vector<32x32xf32>, vector<32x8xf32>, vector<32x8xf32> -> vector<32x8xf32>
    %c5_132 = arith.constant 5 : index
    %c0_133 = arith.constant 0 : index
    %c0_134 = arith.constant 0 : index
    %196 = vector.load %arg5[%c5_132, %c0_133, %c0_134] : memref<8x32x8xf32, #tpu.memory_space<vmem>>, vector<1x32x8xf32>
    %197 = vector.shape_cast %196 : vector<1x32x8xf32> to vector<32x8xf32>
    %cst_135 = arith.constant dense<0.000000e+00> : vector<32x8xf32>
    %198 = tpu.matmul %155, %197, %cst_135 {dimension_numbers = #tpu.dot_dimension_numbers<[1], [0], [0], [1], [0, 0, 1, 1], [], []>} : vector<32x32xf32>, vector<32x8xf32>, vector<32x8xf32> -> vector<32x8xf32>
    %199 = vector.shape_cast %192 : vector<32x8xf32> to vector<2x16x8xf32>
    %200 = vector.shape_cast %195 : vector<32x8xf32> to vector<2x16x8xf32>
    %201 = vector.shape_cast %198 : vector<32x8xf32> to vector<2x16x8xf32>
    "tpu.trace_start"() <{level = 10 : i32, message = "bqd,bkd->bqk"}> : () -> ()
    %cst_136 = arith.constant dense<0.000000e+00> : vector<2x16x16xf32>
    %202 = tpu.matmul %199, %200, %cst_136 {dimension_numbers = #tpu.dot_dimension_numbers<[2], [2], [1], [1], [0, 0, 0, 1, 1, 1], [0], [0]>} : vector<2x16x8xf32>, vector<2x16x8xf32>, vector<2x16x16xf32> -> vector<2x16x16xf32>
    "tpu.trace_stop"() : () -> ()
    %cst_137 = arith.constant 0.353553385 : f32
    %203 = vector.broadcast %cst_137 : f32 to vector<2x16x16xf32>
    %204 = arith.mulf %202, %203 : vector<2x16x16xf32>
    %cst_138 = arith.constant -1.000000e+30 : f32
    %205 = vector.shape_cast %15 : vector<1x1x16xi1> to vector<1x1x16xi1>
    %206 = vector.broadcast %205 : vector<1x1x16xi1> to vector<2x16x16xi1>
    %207 = vector.broadcast %cst_138 : f32 to vector<2x16x16xf32>
    %208 = arith.select %206, %204, %207 : vector<2x16x16xi1>, vector<2x16x16xf32>
    %cst_139 = arith.constant dense<0xFF800000> : vector<2x16xf32>
    %209 = vector.multi_reduction <maximumf>, %208, %cst_139 [2] : vector<2x16x16xf32> to vector<2x16xf32>
    %210 = vector.shape_cast %209 : vector<2x16xf32> to vector<2x16x1xf32>
    %211 = vector.broadcast %210 : vector<2x16x1xf32> to vector<2x16x16xf32>
    %212 = arith.subf %208, %211 : vector<2x16x16xf32>
    %213 = math.exp %212 : vector<2x16x16xf32>
    %cst_140 = arith.constant dense<0.000000e+00> : vector<2x16xf32>
    %214 = vector.multi_reduction <add>, %213, %cst_140 [2] : vector<2x16x16xf32> to vector<2x16xf32>
    %215 = vector.shape_cast %214 : vector<2x16xf32> to vector<2x16x1xf32>
    %216 = tpu.reciprocal %215 {approx = true} : vector<2x16x1xf32> -> vector<2x16x1xf32>
    %217 = vector.broadcast %216 : vector<2x16x1xf32> to vector<2x16x16xf32>
    %218 = arith.mulf %213, %217 : vector<2x16x16xf32>
    "tpu.trace_start"() <{level = 10 : i32, message = "bqk,bkd->bqd"}> : () -> ()
    %cst_141 = arith.constant dense<0.000000e+00> : vector<2x16x8xf32>
    %219 = tpu.matmul %218, %201, %cst_141 {dimension_numbers = #tpu.dot_dimension_numbers<[2], [1], [1], [2], [0, 0, 0, 1, 1, 2], [0], [0]>} : vector<2x16x16xf32>, vector<2x16x8xf32>, vector<2x16x8xf32> -> vector<2x16x8xf32>
    "tpu.trace_stop"() : () -> ()
    %220 = vector.shape_cast %219 : vector<2x16x8xf32> to vector<32x8xf32>
    %c5_142 = arith.constant 5 : index
    %c0_143 = arith.constant 0 : index
    %c0_144 = arith.constant 0 : index
    %221 = vector.load %arg6[%c5_142, %c0_143, %c0_144] : memref<8x8x32xf32, #tpu.memory_space<vmem>>, vector<1x8x32xf32>
    %222 = vector.shape_cast %221 : vector<1x8x32xf32> to vector<8x32xf32>
    %cst_145 = arith.constant dense<0.000000e+00> : vector<32x32xf32>
    %223 = tpu.matmul %220, %222, %cst_145 {dimension_numbers = #tpu.dot_dimension_numbers<[1], [0], [0], [1], [0, 0, 1, 1], [], []>} : vector<32x8xf32>, vector<8x32xf32>, vector<32x32xf32> -> vector<32x32xf32>
    %224 = arith.addf %189, %223 : vector<32x32xf32>
    %c6 = arith.constant 6 : index
    %c0_146 = arith.constant 0 : index
    %c0_147 = arith.constant 0 : index
    %225 = vector.load %arg3[%c6, %c0_146, %c0_147] : memref<8x32x8xf32, #tpu.memory_space<vmem>>, vector<1x32x8xf32>
    %226 = vector.shape_cast %225 : vector<1x32x8xf32> to vector<32x8xf32>
    %cst_148 = arith.constant dense<0.000000e+00> : vector<32x8xf32>
    %227 = tpu.matmul %155, %226, %cst_148 {dimension_numbers = #tpu.dot_dimension_numbers<[1], [0], [0], [1], [0, 0, 1, 1], [], []>} : vector<32x32xf32>, vector<32x8xf32>, vector<32x8xf32> -> vector<32x8xf32>
    %c6_149 = arith.constant 6 : index
    %c0_150 = arith.constant 0 : index
    %c0_151 = arith.constant 0 : index
    %228 = vector.load %arg4[%c6_149, %c0_150, %c0_151] : memref<8x32x8xf32, #tpu.memory_space<vmem>>, vector<1x32x8xf32>
    %229 = vector.shape_cast %228 : vector<1x32x8xf32> to vector<32x8xf32>
    %cst_152 = arith.constant dense<0.000000e+00> : vector<32x8xf32>
    %230 = tpu.matmul %155, %229, %cst_152 {dimension_numbers = #tpu.dot_dimension_numbers<[1], [0], [0], [1], [0, 0, 1, 1], [], []>} : vector<32x32xf32>, vector<32x8xf32>, vector<32x8xf32> -> vector<32x8xf32>
    %c6_153 = arith.constant 6 : index
    %c0_154 = arith.constant 0 : index
    %c0_155 = arith.constant 0 : index
    %231 = vector.load %arg5[%c6_153, %c0_154, %c0_155] : memref<8x32x8xf32, #tpu.memory_space<vmem>>, vector<1x32x8xf32>
    %232 = vector.shape_cast %231 : vector<1x32x8xf32> to vector<32x8xf32>
    %cst_156 = arith.constant dense<0.000000e+00> : vector<32x8xf32>
    %233 = tpu.matmul %155, %232, %cst_156 {dimension_numbers = #tpu.dot_dimension_numbers<[1], [0], [0], [1], [0, 0, 1, 1], [], []>} : vector<32x32xf32>, vector<32x8xf32>, vector<32x8xf32> -> vector<32x8xf32>
    %234 = vector.shape_cast %227 : vector<32x8xf32> to vector<2x16x8xf32>
    %235 = vector.shape_cast %230 : vector<32x8xf32> to vector<2x16x8xf32>
    %236 = vector.shape_cast %233 : vector<32x8xf32> to vector<2x16x8xf32>
    "tpu.trace_start"() <{level = 10 : i32, message = "bqd,bkd->bqk"}> : () -> ()
    %cst_157 = arith.constant dense<0.000000e+00> : vector<2x16x16xf32>
    %237 = tpu.matmul %234, %235, %cst_157 {dimension_numbers = #tpu.dot_dimension_numbers<[2], [2], [1], [1], [0, 0, 0, 1, 1, 1], [0], [0]>} : vector<2x16x8xf32>, vector<2x16x8xf32>, vector<2x16x16xf32> -> vector<2x16x16xf32>
    "tpu.trace_stop"() : () -> ()
    %cst_158 = arith.constant 0.353553385 : f32
    %238 = vector.broadcast %cst_158 : f32 to vector<2x16x16xf32>
    %239 = arith.mulf %237, %238 : vector<2x16x16xf32>
    %cst_159 = arith.constant -1.000000e+30 : f32
    %240 = vector.shape_cast %15 : vector<1x1x16xi1> to vector<1x1x16xi1>
    %241 = vector.broadcast %240 : vector<1x1x16xi1> to vector<2x16x16xi1>
    %242 = vector.broadcast %cst_159 : f32 to vector<2x16x16xf32>
    %243 = arith.select %241, %239, %242 : vector<2x16x16xi1>, vector<2x16x16xf32>
    %cst_160 = arith.constant dense<0xFF800000> : vector<2x16xf32>
    %244 = vector.multi_reduction <maximumf>, %243, %cst_160 [2] : vector<2x16x16xf32> to vector<2x16xf32>
    %245 = vector.shape_cast %244 : vector<2x16xf32> to vector<2x16x1xf32>
    %246 = vector.broadcast %245 : vector<2x16x1xf32> to vector<2x16x16xf32>
    %247 = arith.subf %243, %246 : vector<2x16x16xf32>
    %248 = math.exp %247 : vector<2x16x16xf32>
    %cst_161 = arith.constant dense<0.000000e+00> : vector<2x16xf32>
    %249 = vector.multi_reduction <add>, %248, %cst_161 [2] : vector<2x16x16xf32> to vector<2x16xf32>
    %250 = vector.shape_cast %249 : vector<2x16xf32> to vector<2x16x1xf32>
    %251 = tpu.reciprocal %250 {approx = true} : vector<2x16x1xf32> -> vector<2x16x1xf32>
    %252 = vector.broadcast %251 : vector<2x16x1xf32> to vector<2x16x16xf32>
    %253 = arith.mulf %248, %252 : vector<2x16x16xf32>
    "tpu.trace_start"() <{level = 10 : i32, message = "bqk,bkd->bqd"}> : () -> ()
    %cst_162 = arith.constant dense<0.000000e+00> : vector<2x16x8xf32>
    %254 = tpu.matmul %253, %236, %cst_162 {dimension_numbers = #tpu.dot_dimension_numbers<[2], [1], [1], [2], [0, 0, 0, 1, 1, 2], [0], [0]>} : vector<2x16x16xf32>, vector<2x16x8xf32>, vector<2x16x8xf32> -> vector<2x16x8xf32>
    "tpu.trace_stop"() : () -> ()
    %255 = vector.shape_cast %254 : vector<2x16x8xf32> to vector<32x8xf32>
    %c6_163 = arith.constant 6 : index
    %c0_164 = arith.constant 0 : index
    %c0_165 = arith.constant 0 : index
    %256 = vector.load %arg6[%c6_163, %c0_164, %c0_165] : memref<8x8x32xf32, #tpu.memory_space<vmem>>, vector<1x8x32xf32>
    %257 = vector.shape_cast %256 : vector<1x8x32xf32> to vector<8x32xf32>
    %cst_166 = arith.constant dense<0.000000e+00> : vector<32x32xf32>
    %258 = tpu.matmul %255, %257, %cst_166 {dimension_numbers = #tpu.dot_dimension_numbers<[1], [0], [0], [1], [0, 0, 1, 1], [], []>} : vector<32x8xf32>, vector<8x32xf32>, vector<32x32xf32> -> vector<32x32xf32>
    %259 = arith.addf %224, %258 : vector<32x32xf32>
    %c7 = arith.constant 7 : index
    %c0_167 = arith.constant 0 : index
    %c0_168 = arith.constant 0 : index
    %260 = vector.load %arg3[%c7, %c0_167, %c0_168] : memref<8x32x8xf32, #tpu.memory_space<vmem>>, vector<1x32x8xf32>
    %261 = vector.shape_cast %260 : vector<1x32x8xf32> to vector<32x8xf32>
    %cst_169 = arith.constant dense<0.000000e+00> : vector<32x8xf32>
    %262 = tpu.matmul %155, %261, %cst_169 {dimension_numbers = #tpu.dot_dimension_numbers<[1], [0], [0], [1], [0, 0, 1, 1], [], []>} : vector<32x32xf32>, vector<32x8xf32>, vector<32x8xf32> -> vector<32x8xf32>
    %c7_170 = arith.constant 7 : index
    %c0_171 = arith.constant 0 : index
    %c0_172 = arith.constant 0 : index
    %263 = vector.load %arg4[%c7_170, %c0_171, %c0_172] : memref<8x32x8xf32, #tpu.memory_space<vmem>>, vector<1x32x8xf32>
    %264 = vector.shape_cast %263 : vector<1x32x8xf32> to vector<32x8xf32>
    %cst_173 = arith.constant dense<0.000000e+00> : vector<32x8xf32>
    %265 = tpu.matmul %155, %264, %cst_173 {dimension_numbers = #tpu.dot_dimension_numbers<[1], [0], [0], [1], [0, 0, 1, 1], [], []>} : vector<32x32xf32>, vector<32x8xf32>, vector<32x8xf32> -> vector<32x8xf32>
    %c7_174 = arith.constant 7 : index
    %c0_175 = arith.constant 0 : index
    %c0_176 = arith.constant 0 : index
    %266 = vector.load %arg5[%c7_174, %c0_175, %c0_176] : memref<8x32x8xf32, #tpu.memory_space<vmem>>, vector<1x32x8xf32>
    %267 = vector.shape_cast %266 : vector<1x32x8xf32> to vector<32x8xf32>
    %cst_177 = arith.constant dense<0.000000e+00> : vector<32x8xf32>
    %268 = tpu.matmul %155, %267, %cst_177 {dimension_numbers = #tpu.dot_dimension_numbers<[1], [0], [0], [1], [0, 0, 1, 1], [], []>} : vector<32x32xf32>, vector<32x8xf32>, vector<32x8xf32> -> vector<32x8xf32>
    %269 = vector.shape_cast %262 : vector<32x8xf32> to vector<2x16x8xf32>
    %270 = vector.shape_cast %265 : vector<32x8xf32> to vector<2x16x8xf32>
    %271 = vector.shape_cast %268 : vector<32x8xf32> to vector<2x16x8xf32>
    "tpu.trace_start"() <{level = 10 : i32, message = "bqd,bkd->bqk"}> : () -> ()
    %cst_178 = arith.constant dense<0.000000e+00> : vector<2x16x16xf32>
    %272 = tpu.matmul %269, %270, %cst_178 {dimension_numbers = #tpu.dot_dimension_numbers<[2], [2], [1], [1], [0, 0, 0, 1, 1, 1], [0], [0]>} : vector<2x16x8xf32>, vector<2x16x8xf32>, vector<2x16x16xf32> -> vector<2x16x16xf32>
    "tpu.trace_stop"() : () -> ()
    %cst_179 = arith.constant 0.353553385 : f32
    %273 = vector.broadcast %cst_179 : f32 to vector<2x16x16xf32>
    %274 = arith.mulf %272, %273 : vector<2x16x16xf32>
    %cst_180 = arith.constant -1.000000e+30 : f32
    %275 = vector.shape_cast %15 : vector<1x1x16xi1> to vector<1x1x16xi1>
    %276 = vector.broadcast %275 : vector<1x1x16xi1> to vector<2x16x16xi1>
    %277 = vector.broadcast %cst_180 : f32 to vector<2x16x16xf32>
    %278 = arith.select %276, %274, %277 : vector<2x16x16xi1>, vector<2x16x16xf32>
    %cst_181 = arith.constant dense<0xFF800000> : vector<2x16xf32>
    %279 = vector.multi_reduction <maximumf>, %278, %cst_181 [2] : vector<2x16x16xf32> to vector<2x16xf32>
    %280 = vector.shape_cast %279 : vector<2x16xf32> to vector<2x16x1xf32>
    %281 = vector.broadcast %280 : vector<2x16x1xf32> to vector<2x16x16xf32>
    %282 = arith.subf %278, %281 : vector<2x16x16xf32>
    %283 = math.exp %282 : vector<2x16x16xf32>
    %cst_182 = arith.constant dense<0.000000e+00> : vector<2x16xf32>
    %284 = vector.multi_reduction <add>, %283, %cst_182 [2] : vector<2x16x16xf32> to vector<2x16xf32>
    %285 = vector.shape_cast %284 : vector<2x16xf32> to vector<2x16x1xf32>
    %286 = tpu.reciprocal %285 {approx = true} : vector<2x16x1xf32> -> vector<2x16x1xf32>
    %287 = vector.broadcast %286 : vector<2x16x1xf32> to vector<2x16x16xf32>
    %288 = arith.mulf %283, %287 : vector<2x16x16xf32>
    "tpu.trace_start"() <{level = 10 : i32, message = "bqk,bkd->bqd"}> : () -> ()
    %cst_183 = arith.constant dense<0.000000e+00> : vector<2x16x8xf32>
    %289 = tpu.matmul %288, %271, %cst_183 {dimension_numbers = #tpu.dot_dimension_numbers<[2], [1], [1], [2], [0, 0, 0, 1, 1, 2], [0], [0]>} : vector<2x16x16xf32>, vector<2x16x8xf32>, vector<2x16x8xf32> -> vector<2x16x8xf32>
    "tpu.trace_stop"() : () -> ()
    %290 = vector.shape_cast %289 : vector<2x16x8xf32> to vector<32x8xf32>
    %c7_184 = arith.constant 7 : index
    %c0_185 = arith.constant 0 : index
    %c0_186 = arith.constant 0 : index
    %291 = vector.load %arg6[%c7_184, %c0_185, %c0_186] : memref<8x8x32xf32, #tpu.memory_space<vmem>>, vector<1x8x32xf32>
    %292 = vector.shape_cast %291 : vector<1x8x32xf32> to vector<8x32xf32>
    %cst_187 = arith.constant dense<0.000000e+00> : vector<32x32xf32>
    %293 = tpu.matmul %290, %292, %cst_187 {dimension_numbers = #tpu.dot_dimension_numbers<[1], [0], [0], [1], [0, 0, 1, 1], [], []>} : vector<32x8xf32>, vector<8x32xf32>, vector<32x32xf32> -> vector<32x32xf32>
    %294 = arith.addf %259, %293 : vector<32x32xf32>
    %295 = arith.addf %155, %294 : vector<32x32xf32>
    %296 = vector.shape_cast %295 : vector<32x32xf32> to vector<2x16x32xf32>
    %297 = vector.extract_strided_slice %296 {offsets = [0, 0, 0], sizes = [2, 8, 32], strides = [1, 1, 1]} : vector<2x16x32xf32> to vector<2x8x32xf32>
    %298 = vector.extract_strided_slice %296 {offsets = [0, 8, 0], sizes = [2, 1, 32], strides = [1, 1, 1]} : vector<2x16x32xf32> to vector<2x1x32xf32>
    %299 = vector.shape_cast %298 : vector<2x1x32xf32> to vector<2x32xf32>
    %300 = vector.extract_strided_slice %296 {offsets = [0, 9, 0], sizes = [2, 1, 32], strides = [1, 1, 1]} : vector<2x16x32xf32> to vector<2x1x32xf32>
    %301 = vector.shape_cast %300 : vector<2x1x32xf32> to vector<2x32xf32>
    %c0_188 = arith.constant 0 : index
    %c0_189 = arith.constant 0 : index
    %c0_190 = arith.constant 0 : index
    %302 = vector.load %arg7[%c0_188, %c0_189, %c0_190] : memref<2x32x64xf32, #tpu.memory_space<vmem>>, vector<1x32x64xf32>
    %303 = vector.shape_cast %302 : vector<1x32x64xf32> to vector<32x64xf32>
    %cst_191 = arith.constant dense<0.000000e+00> : vector<2x64xf32>
    %304 = tpu.matmul %299, %303, %cst_191 {dimension_numbers = #tpu.dot_dimension_numbers<[1], [0], [0], [1], [0, 0, 1, 1], [], []>} : vector<2x32xf32>, vector<32x64xf32>, vector<2x64xf32> -> vector<2x64xf32>
    %c1_192 = arith.constant 1 : index
    %c0_193 = arith.constant 0 : index
    %c0_194 = arith.constant 0 : index
    %305 = vector.load %arg7[%c1_192, %c0_193, %c0_194] : memref<2x32x64xf32, #tpu.memory_space<vmem>>, vector<1x32x64xf32>
    %306 = vector.shape_cast %305 : vector<1x32x64xf32> to vector<32x64xf32>
    %cst_195 = arith.constant dense<0.000000e+00> : vector<2x64xf32>
    %307 = tpu.matmul %301, %306, %cst_195 {dimension_numbers = #tpu.dot_dimension_numbers<[1], [0], [0], [1], [0, 0, 1, 1], [], []>} : vector<2x32xf32>, vector<32x64xf32>, vector<2x64xf32> -> vector<2x64xf32>
    %308 = arith.addf %304, %307 : vector<2x64xf32>
    %c0_196 = arith.constant 0 : index
    %c0_197 = arith.constant 0 : index
    %309 = vector.load %arg9[%c0_196, %c0_197] : memref<1x64xf32, #tpu.memory_space<vmem>>, vector<1x64xf32>
    %310 = vector.broadcast %309 : vector<1x64xf32> to vector<2x64xf32>
    %311 = arith.addf %308, %310 : vector<2x64xf32>
    %312 = vector.shape_cast %297 : vector<2x8x32xf32> to vector<16x32xf32>
    %c0_198 = arith.constant 0 : index
    %c0_199 = arith.constant 0 : index
    %313 = vector.load %arg8[%c0_198, %c0_199] : memref<32x64xf32, #tpu.memory_space<vmem>>, vector<32x64xf32>
    %cst_200 = arith.constant dense<0.000000e+00> : vector<16x64xf32>
    %314 = tpu.matmul %312, %313, %cst_200 {dimension_numbers = #tpu.dot_dimension_numbers<[1], [0], [0], [1], [0, 0, 1, 1], [], []>} : vector<16x32xf32>, vector<32x64xf32>, vector<16x64xf32> -> vector<16x64xf32>
    %315 = vector.shape_cast %314 : vector<16x64xf32> to vector<2x8x64xf32>
    %316 = vector.shape_cast %311 : vector<2x64xf32> to vector<2x1x64xf32>
    %317 = vector.broadcast %316 : vector<2x1x64xf32> to vector<2x8x64xf32>
    %318 = arith.addf %315, %317 : vector<2x8x64xf32>
    %cst_201 = arith.constant 0.000000e+00 : f32
    %319 = vector.broadcast %cst_201 : f32 to vector<2x8x64xf32>
    %320 = arith.maximumf %318, %319 : vector<2x8x64xf32>
    %321 = vector.shape_cast %320 : vector<2x8x64xf32> to vector<16x64xf32>
    %c0_202 = arith.constant 0 : index
    %c0_203 = arith.constant 0 : index
    %322 = vector.load %arg10[%c0_202, %c0_203] : memref<64x128xf32, #tpu.memory_space<vmem>>, vector<64x128xf32>
    %cst_204 = arith.constant dense<0.000000e+00> : vector<16x128xf32>
    %323 = tpu.matmul %321, %322, %cst_204 {dimension_numbers = #tpu.dot_dimension_numbers<[1], [0], [0], [1], [0, 0, 1, 1], [], []>} : vector<16x64xf32>, vector<64x128xf32>, vector<16x128xf32> -> vector<16x128xf32>
    %324 = vector.shape_cast %323 : vector<16x128xf32> to vector<2x8x128xf32>
    %c0_205 = arith.constant 0 : index
    %c0_206 = arith.constant 0 : index
    %325 = vector.load %arg11[%c0_205, %c0_206] : memref<1x128xf32, #tpu.memory_space<vmem>>, vector<1x128xf32>
    %326 = vector.shape_cast %325 : vector<1x128xf32> to vector<1x1x128xf32>
    %327 = vector.broadcast %326 : vector<1x1x128xf32> to vector<2x8x128xf32>
    %328 = arith.addf %324, %327 : vector<2x8x128xf32>
    %c0_207 = arith.constant 0 : index
    %c0_208 = arith.constant 0 : index
    %c0_209 = arith.constant 0 : index
    %329 = vector.load %arg12[%c0_207, %c0_208, %c0_209] : memref<2x8x128xf32, #tpu.memory_space<vmem>>, vector<2x8x128xf32>
    tpu.vector_store %arg12[%c0_207, %c0_208, %c0_209], %328 {strides = array<i32>} : memref<2x8x128xf32, #tpu.memory_space<vmem>>, vector<2x8x128xf32>,
    return
  }
  func.func @transform_0(%arg0: i32) -> (i32, i32, i32) {
    %c0_i32 = arith.constant 0 : i32
    %c0_i32_0 = arith.constant 0 : i32
    %c0_i32_1 = arith.constant 0 : i32
    return %arg0, %c0_i32, %c0_i32_0 : i32, i32, i32
  }
  func.func @transform_1(%arg0: i32) -> (i32, i32, i32) {
    %c0_i32 = arith.constant 0 : i32
    %c0_i32_0 = arith.constant 0 : i32
    %c0_i32_1 = arith.constant 0 : i32
    return %arg0, %c0_i32, %c0_i32_0 : i32, i32, i32
  }
  func.func @transform_2(%arg0: i32) -> (i32, i32, i32) {
    %c0_i32 = arith.constant 0 : i32
    %c0_i32_0 = arith.constant 0 : i32
    %c0_i32_1 = arith.constant 0 : i32
    %c0_i32_2 = arith.constant 0 : i32
    return %c0_i32, %c0_i32_0, %c0_i32_1 : i32, i32, i32
  }
  func.func @transform_3(%arg0: i32) -> (i32, i32, i32) {
    %c0_i32 = arith.constant 0 : i32
    %c0_i32_0 = arith.constant 0 : i32
    %c0_i32_1 = arith.constant 0 : i32
    %c0_i32_2 = arith.constant 0 : i32
    return %c0_i32, %c0_i32_0, %c0_i32_1 : i32, i32, i32
  }
  func.func @transform_4(%arg0: i32) -> (i32, i32, i32) {
    %c0_i32 = arith.constant 0 : i32
    %c0_i32_0 = arith.constant 0 : i32
    %c0_i32_1 = arith.constant 0 : i32
    %c0_i32_2 = arith.constant 0 : i32
    return %c0_i32, %c0_i32_0, %c0_i32_1 : i32, i32, i32
  }
  func.func @transform_5(%arg0: i32) -> (i32, i32, i32) {
    %c0_i32 = arith.constant 0 : i32
    %c0_i32_0 = arith.constant 0 : i32
    %c0_i32_1 = arith.constant 0 : i32
    %c0_i32_2 = arith.constant 0 : i32
    return %c0_i32, %c0_i32_0, %c0_i32_1 : i32, i32, i32
  }
  func.func @transform_6(%arg0: i32) -> (i32, i32, i32) {
    %c0_i32 = arith.constant 0 : i32
    %c0_i32_0 = arith.constant 0 : i32
    %c0_i32_1 = arith.constant 0 : i32
    %c0_i32_2 = arith.constant 0 : i32
    return %c0_i32, %c0_i32_0, %c0_i32_1 : i32, i32, i32
  }
  func.func @transform_7(%arg0: i32) -> (i32, i32) {
    %c0_i32 = arith.constant 0 : i32
    %c0_i32_0 = arith.constant 0 : i32
    %c0_i32_1 = arith.constant 0 : i32
    return %c0_i32, %c0_i32_0 : i32, i32
  }
  func.func @transform_8(%arg0: i32) -> (i32, i32) {
    %c0_i32 = arith.constant 0 : i32
    %c0_i32_0 = arith.constant 0 : i32
    %c0_i32_1 = arith.constant 0 : i32
    return %c0_i32, %c0_i32_0 : i32, i32
  }
  func.func @transform_9(%arg0: i32) -> (i32, i32) {
    %c0_i32 = arith.constant 0 : i32
    %c0_i32_0 = arith.constant 0 : i32
    %c0_i32_1 = arith.constant 0 : i32
    return %c0_i32, %c0_i32_0 : i32, i32
  }
  func.func @transform_10(%arg0: i32) -> (i32, i32) {
    %c0_i32 = arith.constant 0 : i32
    %c0_i32_0 = arith.constant 0 : i32
    %c0_i32_1 = arith.constant 0 : i32
    return %c0_i32, %c0_i32_0 : i32, i32
  }
  func.func @transform_11(%arg0: i32) -> (i32, i32, i32) {
    %c0_i32 = arith.constant 0 : i32
    %c0_i32_0 = arith.constant 0 : i32
    %c0_i32_1 = arith.constant 0 : i32
    return %arg0, %c0_i32, %c0_i32_0 : i32, i32, i32
  }
}

</mosaic_0001>

<bundles_post_ra>
// kernel: tpu_custom_call.1
= control target key start
LH: loop header
LB: loop body
LE: loop exit
PB: predicated region body
PF: predicated region fallthrough
CT: control target
= control target key end

     0   :  { %vm41_vm0 = vcmask 261120   ;;  %vm61_vm1 = vcmask 253952   ;;  %vm68_vm2 = vcmask 259072   ;;  %v8138_v8 = vmov 0.0   ;;  %s9290_s0 = inlined_call_operand.vmem [shape: f32[2,1,32], index: 0, kind: input, shape index: {}]   ;;  %s9291_s1 = inlined_call_operand.vmem [shape: f32[2,8,32], index: 1, kind: input, shape index: {}]   ;;  %s9292_s2 = inlined_call_operand.vmem [shape: f32[8,32,8], index: 2, kind: input, shape index: {}]   ;;  %s9293_s3 = inlined_call_operand.vmem [shape: f32[8,32,8], index: 3, kind: input, shape index: {}]   ;;  %s9294_s4 = inlined_call_operand.vmem [shape: f32[8,32,8], index: 4, kind: input, shape index: {}]   ;;  %s9295_s5 = inlined_call_operand.vmem [shape: f32[8,8,32], index: 5, kind: input, shape index: {}]   ;;  %s9296_s6 = inlined_call_operand.vmem [shape: f32[2,32,64], index: 6, kind: input, shape index: {}]   ;;  %s9297_s7 = inlined_call_operand.vmem [shape: f32[32,64], index: 7, kind: input, shape index: {}]   ;;  %s9298_s8 = inlined_call_operand.vmem [shape: f32[1,64], index: 8, kind: input, shape index: {}]   ;;  %s9299_s9 = inlined_call_operand.vmem [shape: f32[64,128], index: 9, kind: input, shape index: {}]   ;;  %s9300_s10 = inlined_call_operand.vmem [shape: f32[1,128], index: 10, kind: input, shape index: {}]   ;;  %s9301_s11 = inlined_call_operand.hbm [shape: f32[2,8,128], index: 11, kind: output, shape index: {}]  }
   0x1   :  { %v182_v0 = vld [vmem:[%s9293_s3 + $0x18] sm:$0xff]  ;;  %v181_v1 = vld [vmem:[%s9293_s3 + $0x10] sm:$0xff]  ;;  %v180_v3 = vld [vmem:[%s9293_s3 + $0x8] sm:$0xff]  ;;  %69 = vst.msk [vmem:[#allocation2 + $0xa] sm:$0x3f] %vm68_vm2, %v8138_v8 }
   0x2   :  { %v81_v2 = vld [vmem:[%s9292_s2 + $0x18] sm:$0xff]  ;;  %7316 = vmatprep.subr.mxu1 %v182_v0  ;;  %v80_v4 = vld [vmem:[%s9292_s2 + $0x10] sm:$0xff]  ;;  %v79_v5 = vld [vmem:[%s9292_s2 + $0x8] sm:$0xff]  ;;  %70 = vst.msk [vmem:[#allocation2 + $0x1a] sm:$0x3f] %vm68_vm2, %v8138_v8 }
   0x3   :  { %7302 = vmatprep.subr.mxu0 %v81_v2  ;;  %7317 = vmatpush3.msra.mxu1 %v182_v0  ;;  %v39_v6 = vld [vmem:[%s9291_s1] sm:$0xff]  ;;  %v40_v10 = vld [vmem:[%s9291_s1 + $0x8] sm:$0xff] }
   0x4   :  { %7303 = vmatpush3.msra.mxu0 %v81_v2  ;;  %v64_v7 = vld [vmem:[%s9290_s0] sm:$0x1]  ;;  %7318 = vmatprep.subr.mxu1 %v181_v1  ;;  %42 = vst.msk [vmem:[#allocation2] sm:$0xff] %vm41_vm0, %v39_v6  ;;  %v44_v9 = vsel %vm41_vm0, %v39_v6, 0.0  ;;  %v65_v11 = vld [vmem:[%s9290_s0 + $0x1] sm:$0x1] }
   0x5   :  { %7304 = vmatprep.subr.mxu0 %v80_v4  ;;  %66 = vst.msk [vmem:[#allocation2 + $0x9] sm:$0x1] %vm61_vm1, %v64_v7  ;;  %7319 = vmatpush3.msra.mxu1 %v181_v1  ;;  %v179_v12 = vld [vmem:[%s9293_s3] sm:$0xff]  ;;  %v45_v13 = vrot.slane %v44_v9, 4  ;;  %v51_v15 = vsel %vm41_vm0, %v40_v10, 0.0 }
   0x6   :  { %7305 = vmatpush3.msra.mxu0 %v80_v4  ;;  %v78_v14 = vld [vmem:[%s9292_s2] sm:$0xff]  ;;  %43 = vst.msk [vmem:[#allocation2 + $0x10] sm:$0xff] %vm41_vm0, %v40_v10  ;;  %7320 = vmatprep.subr.mxu1 %v180_v3  ;;  %v52_v16 = vrot.slane %v51_v15, 4 }
   0x7   :  { %67 = vst.msk [vmem:[#allocation2 + $0x19] sm:$0x1] %vm61_vm1, %v65_v11  ;;  %7306 = vmatprep.subr.mxu0 %v79_v5 }
   0x8   :  { %16 = vsyncpa [#allocation4], 0  ;;  %7321 = vmatpush3.msra.mxu1 %v180_v3  ;;  %v46_v17 = vadd.f32 %v45_v13, %v44_v9  ;;  %7307 = vmatpush3.msra.mxu0 %v79_v5  ;;  %v271_v18 = vld [vmem:[%s9294_s4 + $0x18] sm:$0xff]  ;;  %v53_v19 = vadd.f32 %v52_v16, %v51_v15  ;;  %v270_v33 = vld [vmem:[%s9294_s4 + $0x10] sm:$0xff]  ;;  %vm357_vm3 = vcmask 64512   ;;  %v75_v49 = vlaneseq  ;;  %s8141_s13 = smov [#allocation3]  }
   0x9   :  { %7322 = vmatprep.subr.mxu1 %v179_v12  ;;  %7308 = vmatprep.subr.mxu0 %v78_v14  ;;  %v269_v35 = vld [vmem:[%s9294_s4 + $0x8] sm:$0xff]  ;;  %v268_v36 = vld [vmem:[%s9294_s4] sm:$0xff]  ;;  %vm542_vm5 = vcmask 130048   ;;  %vm8139_vm6 = vmmov 0   ;;  %vm6194_vm7 = vcmask 1041409   ;;  %vm6480_vm8 = vcmask 523264  }
   0xa   :  { %7323 = vmatpush3.msra.mxu1 %v179_v12  ;;  %v47_v20 = vrot.slane %v46_v17, 2  ;;  %7309 = vmatpush3.msra.mxu0 %v78_v14  ;;  %v54_v21 = vrot.slane %v53_v19, 2  ;;  %v8307_v51 = vand.u32 127, %v75_v49  ;;  %s6578_s14 = sshll.u32 %s8141_s13, 4  ;;  %s6579_s14 = int_to_ptr.vmem [resolvable:$true] %s6578_s14 }
   0xb   :  { %7330 = vmatprep.subr.mxu0 %v271_v18  ;;  %v8251_v22 = vld [vmem:[#allocation2] sm:$0xff]  ;;  %s8116_s15 = scalar_lea.vmem %s6579_s14, 256  ;;  %p8121_p1 = scmp.lt.s32.totalorder %s6579_s14, %s6579_s14 }
   0xc   :  { %v48_v23 = vadd.f32 %v47_v20, %v46_v17  ;;  %7324 = vmatprep.mubr.msk.f32.mxu1 %vm41_vm0, %v8251_v22  ;;  %7310 = vmatprep.mubr.msk.f32.mxu0 %vm41_vm0, %v8251_v22  ;;  %v55_v24 = vadd.f32 %v54_v21, %v53_v19  ;;  %vm77_vm4 = vcmp.lt.s32.totalorder %v8307_v51, 10  ;;  %p8117_p0 = scmp.ne.s32.totalorder %s6579_s14, %s8116_s15  ;;  %p8122_p2 = scmp.lt.s32.totalorder %s8116_s15, %s8116_s15 }
   0xd   :  { %v8259_v31 = vld [vmem:[#allocation2 + $0x10] sm:$0xff] }
   0xe   :  { %v49_v25 = vrot.slane %v48_v23, 1  ;;  %v56_v26 = vrot.slane %v55_v24, 1  ;;  %p8123_p3 = por %p8122_p2, %p8121_p1 }
  0x10   :  { %v50_v27 = vadd.f32 %v49_v25, %v48_v23  ;;  %v57_v28 = vadd.f32 %v56_v26, %v55_v24  ;;  %v6624_v25 = vld [vmem:[%s9293_s3 + $0x38] sm:$0xff]  ;;  %p8124_p4 = pnand %p8123_p3, %p8117_p0 }
  0x11   :  { %v6616_v26 = vld [vmem:[%s9292_s2 + $0x38] sm:$0xff] }
  0x12   :  { %v59_v29 = vmul.f32 0.125, %v50_v27  ;;  %v60_v30 = vmul.f32 0.125, %v57_v28 }
  0x14   :  { %62 = vst.msk [vmem:[#allocation2 + $0x8] sm:$0x1] %vm61_vm1, %v59_v29  ;;  %63 = vst.msk [vmem:[#allocation2 + $0x18] sm:$0x1] %vm61_vm1, %v60_v30 }
  0x1b   :  { %v8261_v32 = vld [vmem:[#allocation2 + $0x8] sm:$0xff]  ;;  %v8272_v34 = vld [vmem:[#allocation2 + $0x18] sm:$0xff] }
  0x1c   :  { %7325 = vmatmul.mubr.msk.f32.vlgmr.msra.gmra.mxu1 %vm41_vm0, %v8261_v32  ;;  %7311 = vmatmul.mubr.msk.f32.vlgmr.msra.gmra.mxu0 %vm41_vm0, %v8261_v32 }
  0x1d   :  { %7327 = vmatprep.mubr.msk.f32.mxu1 %vm41_vm0, %v8259_v31  ;;  %7313 = vmatprep.mubr.msk.f32.mxu0 %vm41_vm0, %v8259_v31 }
  0x1e   :  { %7331 = vmatpush3.msra.mxu0 %v271_v18 }
  0x1f   :  { %7332 = vmatprep.subr.mxu0 %v270_v33 }
  0x20   :  { %7328 = vmatmul.mubr.msk.f32.gmra.mxu1 %vm41_vm0, %v8272_v34  ;;  %7314 = vmatmul.mubr.msk.f32.gmra.mxu0 %vm41_vm0, %v8272_v34 }
  0x21   :  { %7333 = vmatpush3.msra.mxu0 %v270_v33  ;;  %7338 = vmatprep.mubr.msk.f32.mxu0 %vm41_vm0, %v8251_v22 }
  0x22   :  { %7334 = vmatprep.subr.mxu0 %v269_v35 }
  0x23   :  { %7335 = vmatpush3.msra.mxu0 %v269_v35 }
  0x24   :  { %7336 = vmatprep.subr.mxu0 %v268_v36 }
  0x25   :  { %7337 = vmatpush3.msra.mxu0 %v268_v36 }
  0x26   :  { %7339 = vmatmul.mubr.msk.f32.vlgmr.msra.gmra.mxu0 %vm41_vm0, %v8261_v32 }
  0x27   :  { %7341 = vmatprep.mubr.msk.f32.mxu0 %vm41_vm0, %v8259_v31 }
  0x2a   :  { %7342 = vmatmul.mubr.msk.f32.gmra.mxu0 %vm41_vm0, %v8272_v34 }
  0xdc   :  { %v7326_v37 = vpop.f32.mrf.mxu1  ;;  %v7312_v38 = vpop.f32.mrf.mxu0 }
  0xdd   :  { %7344 = vmatprep.subr.msk.mxu1 %vm357_vm3, %v7326_v37 }
  0xde   :  { %v249_v39 = vpop.f32.mrf.mxu1  ;;  %7345 = vmatpush3.xpose.msk.msra.mxu1 %vm357_vm3, %v7326_v37  ;;  %v160_v40 = vpop.f32.mrf.mxu0 }
  0xdf   :  { %7346 = vmatprep.subr.msk.mxu1 %vm357_vm3, %v249_v39  ;;  %7348 = vmatprep.mubr.msk.f32.mxu1 %vm357_vm3, %v160_v40  ;;  %v6623_v40 = vld [vmem:[%s9293_s3 + $0x30] sm:$0xff] }
  0xe0   :  { %v7329_v41 = vpop.f32.mrf.mxu1  ;;  %v7315_v42 = vpop.f32.mrf.mxu0 }
  0xe1   :  { %7351 = vmatprep.subr.msk.mxu0 %vm357_vm3, %v7329_v41 }
  0xe2   :  { %v259_v43 = vpop.f32.mrf.mxu1  ;;  %7347 = vmatpush3.xpose.msk.msra.mxu1 %vm357_vm3, %v249_v39  ;;  %7352 = vmatpush3.xpose.msk.msra.mxu0 %vm357_vm3, %v7329_v41  ;;  %v170_v44 = vpop.f32.mrf.mxu0 }
  0xe3   :  { %7353 = vmatprep.subr.msk.mxu0 %vm357_vm3, %v259_v43  ;;  %7355 = vmatprep.mubr.msk.f32.mxu0 %vm357_vm3, %v170_v44  ;;  %v6615_v44 = vld [vmem:[%s9292_s2 + $0x30] sm:$0xff] }
  0xe5   :  { %7349 = vmatmul.mubr.msk.f32.vlgmr.msra.gmra.mxu1 %vm357_vm3, %v7312_v38 }
  0xe6   :  { %7354 = vmatpush3.xpose.msk.msra.mxu0 %vm357_vm3, %v259_v43  ;;  %v7340_v45 = vpop.f32.mrf.mxu0 }
  0xe7   :  { %7358 = vmatprep.subr.mxu0 %v7340_v45 }
  0xe8   :  { %v338_v46 = vpop.f32.mrf.mxu0 }
  0xe9   :  { %7356 = vmatmul.mubr.msk.f32.vlgmr.msra.gmra.mxu0 %vm357_vm3, %v7315_v42  ;;  %v6622_v42 = vld [vmem:[%s9293_s3 + $0x28] sm:$0xff] }
  0xea   :  { %7359 = vmatpush3.msra.mxu0 %v7340_v45  ;;  %v7343_v47 = vpop.f32.mrf.mxu0  ;;  %v6621_v45 = vld [vmem:[%s9293_s3 + $0x20] sm:$0xff] }
  0xeb   :  { %7360 = vmatprep.subr.mxu0 %v338_v46  ;;  %7365 = vmatprep.subr.mxu1 %v7343_v47 }
  0xec   :  { %7361 = vmatpush3.msra.mxu0 %v338_v46  ;;  %v348_v48 = vpop.f32.mrf.mxu0  ;;  %7366 = vmatpush3.msra.mxu1 %v7343_v47  ;;  %v6614_v46 = vld [vmem:[%s9292_s2 + $0x28] sm:$0xff]  ;;  %v6613_v47 = vld [vmem:[%s9292_s2 + $0x20] sm:$0xff] }
  0xed   :  { %7367 = vmatprep.subr.mxu1 %v348_v48  ;;  %7372 = vmatprep.subr.mxu0 %v6616_v26 }
  0xee   :  { %7368 = vmatpush3.msra.mxu1 %v348_v48  ;;  %v6632_v48 = vld [vmem:[%s9294_s4 + $0x38] sm:$0xff] }
  0xef   :  { %7386 = vmatprep.subr.mxu1 %v6624_v25 }
 0x1a5   :  { %v7350_v50 = vpop.f32.mrf.mxu1 }
 0x1a6   :  { %v533_v53 = vmul.f32 0.35355338, %v7350_v50  ;;  %v6631_v50 = vld [vmem:[%s9294_s4 + $0x30] sm:$0xff] }
 0x1a7   :  { %v436_v52 = vpop.f32.mrf.mxu1 }
 0x1a8   :  { %v532_v54 = vmul.f32 0.35355338, %v436_v52  ;;  %v539_v61 = vsel %vm77_vm4, %v533_v53, -1e+30  ;;  %v6630_v52 = vld [vmem:[%s9294_s4 + $0x28] sm:$0xff]  ;;  %v6629_v53 = vld [vmem:[%s9294_s4 + $0x20] sm:$0xff] }
 0x1a9   :  { %v7357_v55 = vpop.f32.mrf.mxu0  ;;  %v546_v63 = vsel %vm542_vm5, %v539_v61, -inf }
 0x1aa   :  { %v538_v56 = vsel %vm77_vm4, %v532_v54, -1e+30  ;;  %v535_v59 = vmul.f32 0.35355338, %v7357_v55 }
 0x1ab   :  { %v523_v57 = vpop.f32.mrf.mxu0  ;;  %v543_v58 = vsel %vm542_vm5, %v538_v56, -inf }
 0x1ac   :  { %v534_v60 = vmul.f32 0.35355338, %v523_v57  ;;  %544 = vmax.xlane.f32.xlu1 %v543_v58  ;;  %v541_v1 = vsel %vm77_vm4, %v535_v59, -1e+30 }
 0x1ad   :  { %v552_v2 = vsel %vm542_vm5, %v541_v1, -inf }
 0x1ae   :  { %v540_v62 = vsel %vm77_vm4, %v534_v60, -1e+30 }
 0x1af   :  { %v549_v0 = vsel %vm542_vm5, %v540_v62, -inf }
 0x1b0   :  { %547 = vmax.xlane.f32.xlu1 %v546_v63  ;;  %550 = vmax.xlane.f32.xlu0 %v549_v0 }
 0x1b4   :  { %553 = vmax.xlane.f32.xlu0 %v552_v2 }
 0x235   :  { %v545_v3 = vpop.xlane.xlu1 %544 }
 0x236   :  { %v555_v4 = vsub.f32 %v538_v56, %v545_v3 }
 0x238   :  { %v559_v11 = vmul.f32 1.442695, %v555_v4 }
 0x239   :  { %v548_v5 = vpop.xlane.xlu1 %547  ;;  %v551_v6 = vpop.xlane.xlu0 %550 }
 0x23a   :  { %v557_v7 = vsub.f32 %v540_v62, %v551_v6  ;;  %v556_v9 = vsub.f32 %v539_v61, %v548_v5 }
 0x23c   :  { %v563_v10 = vmul.f32 1.442695, %v557_v7  ;;  %v561_v14 = vmul.f32 1.442695, %v556_v9 }
 0x23d   :  { %v554_v12 = vpop.xlane.xlu0 %553 }
 0x23e   :  { %v558_v13 = vsub.f32 %v541_v1, %v554_v12  ;;  %7984 = vpow2.f32 %v563_v10 }
 0x23f   :  { %7986 = vpow2.f32 %v559_v11 }
 0x240   :  { %v565_v15 = vmul.f32 1.442695, %v558_v13 }
 0x242   :  { %7988 = vpow2.f32 %v565_v15 }
 0x243   :  { %7990 = vpow2.f32 %v561_v14 }
 0x24b   :  { %v7985_v16 = vpop.eup %7984 }
 0x24c   :  { %v573_v17 = vsel %vm542_vm5, %v7985_v16, 0.0  ;;  %v7987_v18 = vpop.eup %7986 }
 0x24d   :  { %574 = vadd.xlane.f32.xlu0 %v573_v17  ;;  %v567_v23 = vsel %vm542_vm5, %v7987_v18, 0.0 }
 0x24f   :  { %v7989_v19 = vpop.eup %7988 }
 0x250   :  { %v576_v20 = vsel %vm542_vm5, %v7989_v19, 0.0  ;;  %v7991_v21 = vpop.eup %7990 }
 0x251   :  { %577 = vadd.xlane.f32.xlu1 %v576_v20  ;;  %568 = vadd.xlane.f32.xlu0 %v567_v23  ;;  %v570_v24 = vsel %vm542_vm5, %v7991_v21, 0.0 }
 0x255   :  { %571 = vadd.xlane.f32.xlu1 %v570_v24 }
 0x2d6   :  { %v575_v27 = vpop.xlane.xlu0 %574 }
 0x2d7   :  { %7992 = vrcp.f32 %v575_v27 }
 0x2da   :  { %v578_v28 = vpop.xlane.xlu1 %577  ;;  %v569_v29 = vpop.xlane.xlu0 %568 }
 0x2db   :  { %7994 = vrcp.f32 %v578_v28 }
 0x2dc   :  { %7996 = vrcp.f32 %v569_v29 }
 0x2de   :  { %v572_v30 = vpop.xlane.xlu1 %571 }
 0x2df   :  { %7998 = vrcp.f32 %v572_v30 }
 0x2e4   :  { %v7993_v33 = vpop.eup %7992 }
 0x2e5   :  { %v585_v35 = vmul.f32 %v7993_v33, %v7985_v16 }
 0x2e7   :  { %7369 = vmatprep.mubr.msk.f32.mxu1 %vm542_vm5, %v585_v35 }
 0x2e8   :  { %v7995_v36 = vpop.eup %7994 }
 0x2e9   :  { %v7997_v37 = vpop.eup %7996  ;;  %v586_v38 = vmul.f32 %v7995_v36, %v7989_v19 }
 0x2ea   :  { %v583_v39 = vmul.f32 %v7997_v37, %v7987_v18 }
 0x2eb   :  { %7370 = vmatmul.mubr.msk.f32.vlgmr.msra.gmra.mxu1 %vm542_vm5, %v586_v38 }
 0x2ec   :  { %v7999_v41 = vpop.eup %7998  ;;  %7362 = vmatprep.mubr.msk.f32.mxu0 %vm542_vm5, %v583_v39  ;;  %7387 = vmatpush3.msra.mxu1 %v6624_v25 }
 0x2ed   :  { %7388 = vmatprep.subr.mxu1 %v6623_v40  ;;  %v584_v43 = vmul.f32 %v7999_v41, %v7991_v21  ;;  %7394 = vmatprep.mubr.msk.f32.mxu1 %vm41_vm0, %v8251_v22 }
 0x2ee   :  { %7389 = vmatpush3.msra.mxu1 %v6623_v40 }
 0x2ef   :  { %7390 = vmatprep.subr.mxu1 %v6622_v42  ;;  %7363 = vmatmul.mubr.msk.f32.vlgmr.msra.gmra.mxu0 %vm542_vm5, %v584_v43 }
 0x2f0   :  { %7373 = vmatpush3.msra.mxu0 %v6616_v26  ;;  %7391 = vmatpush3.msra.mxu1 %v6622_v42 }
 0x2f1   :  { %7374 = vmatprep.subr.mxu0 %v6615_v44  ;;  %7392 = vmatprep.subr.mxu1 %v6621_v45 }
 0x2f2   :  { %7375 = vmatpush3.msra.mxu0 %v6615_v44  ;;  %7393 = vmatpush3.msra.mxu1 %v6621_v45 }
 0x2f3   :  { %7376 = vmatprep.subr.mxu0 %v6614_v46  ;;  %7395 = vmatmul.mubr.msk.f32.vlgmr.msra.gmra.mxu1 %vm41_vm0, %v8261_v32 }
 0x2f4   :  { %7377 = vmatpush3.msra.mxu0 %v6614_v46  ;;  %7380 = vmatprep.mubr.msk.f32.mxu0 %vm41_vm0, %v8251_v22 }
 0x2f5   :  { %7378 = vmatprep.subr.mxu0 %v6613_v47  ;;  %7397 = vmatprep.mubr.msk.f32.mxu1 %vm41_vm0, %v8259_v31 }
 0x2f6   :  { %7379 = vmatpush3.msra.mxu0 %v6613_v47 }
 0x2f7   :  { %7381 = vmatmul.mubr.msk.f32.vlgmr.msra.gmra.mxu0 %vm41_vm0, %v8261_v32  ;;  %7398 = vmatmul.mubr.msk.f32.gmra.mxu1 %vm41_vm0, %v8272_v34 }
 0x2f8   :  { %7383 = vmatprep.mubr.msk.f32.mxu0 %vm41_vm0, %v8259_v31  ;;  %7400 = vmatprep.subr.mxu0 %v6632_v48 }
 0x2f9   :  { %7401 = vmatpush3.msra.mxu0 %v6632_v48 }
 0x2fa   :  { %7402 = vmatprep.subr.mxu0 %v6631_v50 }
 0x2fb   :  { %7384 = vmatmul.mubr.msk.f32.gmra.mxu0 %vm41_vm0, %v8272_v34 }
 0x2fc   :  { %7408 = vmatprep.mubr.msk.f32.mxu0 %vm41_vm0, %v8251_v22  ;;  %7403 = vmatpush3.msra.mxu0 %v6631_v50 }
 0x2fd   :  { %7404 = vmatprep.subr.mxu0 %v6630_v52 }
 0x2fe   :  { %7405 = vmatpush3.msra.mxu0 %v6630_v52 }
 0x2ff   :  { %7406 = vmatprep.subr.mxu0 %v6629_v53 }
 0x300   :  { %7407 = vmatpush3.msra.mxu0 %v6629_v53 }
 0x301   :  { %7409 = vmatmul.mubr.msk.f32.vlgmr.msra.gmra.mxu0 %vm41_vm0, %v8261_v32 }
 0x302   :  { %7411 = vmatprep.mubr.msk.f32.mxu0 %vm41_vm0, %v8259_v31 }
 0x305   :  { %7412 = vmatmul.mubr.msk.f32.gmra.mxu0 %vm41_vm0, %v8272_v34 }
 0x3ab   :  { %v8390_v54 = vpop.f32.mrf.mxu1 }
 0x3ad   :  { %v8392_v55 = vpop.f32.mrf.mxu1 }
 0x3af   :  { %v8394_v56 = vpop.f32.mrf.mxu0 }
 0x3b1   :  { %v8397_v58 = vpop.f32.mrf.mxu0 }
 0x3b3   :  { %v7396_v57 = vpop.f32.mrf.mxu1 }
 0x3b4   :  { %7414 = vmatprep.subr.msk.mxu1 %vm357_vm3, %v7396_v57 }
 0x3b5   :  { %v911_v59 = vpop.f32.mrf.mxu1  ;;  %7415 = vmatpush3.xpose.msk.msra.mxu1 %vm357_vm3, %v7396_v57 }
 0x3b6   :  { %7416 = vmatprep.subr.msk.mxu1 %vm357_vm3, %v911_v59 }
 0x3b7   :  { %v7382_v60 = vpop.f32.mrf.mxu0  ;;  %v7399_v61 = vpop.f32.mrf.mxu1 }
 0x3b8   :  { %7421 = vmatprep.subr.msk.mxu0 %vm357_vm3, %v7399_v61 }
 0x3b9   :  { %v821_v62 = vpop.f32.mrf.mxu0  ;;  %v921_v63 = vpop.f32.mrf.mxu1  ;;  %7417 = vmatpush3.xpose.msk.msra.mxu1 %vm357_vm3, %v911_v59  ;;  %7422 = vmatpush3.xpose.msk.msra.mxu0 %vm357_vm3, %v7399_v61 }
 0x3ba   :  { %7418 = vmatprep.mubr.msk.f32.mxu1 %vm357_vm3, %v821_v62  ;;  %7423 = vmatprep.subr.msk.mxu0 %vm357_vm3, %v921_v63 }
 0x3bb   :  { %v7385_v0 = vpop.f32.mrf.mxu0 }
 0x3bc   :  { %7419 = vmatmul.mubr.msk.f32.vlgmr.msra.gmra.mxu1 %vm357_vm3, %v7382_v60 }
 0x3bd   :  { %v831_v1 = vpop.f32.mrf.mxu0  ;;  %7424 = vmatpush3.xpose.msk.msra.mxu0 %vm357_vm3, %v921_v63 }
 0x3be   :  { %7425 = vmatprep.mubr.msk.f32.mxu0 %vm357_vm3, %v831_v1 }
 0x3c0   :  { %7426 = vmatmul.mubr.msk.f32.vlgmr.msra.gmra.mxu0 %vm357_vm3, %v7385_v0  ;;  %v749_v0 = vld [vmem:[%s9295_s5] sm:$0xff] }
 0x3c1   :  { %v7410_v2 = vpop.f32.mrf.mxu0 }
 0x3c2   :  { %7428 = vmatprep.subr.mxu1 %v7410_v2 }
 0x3c3   :  { %v1001_v3 = vpop.f32.mrf.mxu0  ;;  %7429 = vmatpush3.msra.mxu1 %v7410_v2  ;;  %v6669_v2 = vld [vmem:[%s9293_s3 + $0x58] sm:$0xff] }
 0x3c4   :  { %7430 = vmatprep.subr.mxu1 %v1001_v3 }
 0x3c5   :  { %7431 = vmatpush3.msra.mxu1 %v1001_v3  ;;  %v8410_v4 = vpop.f32.mrf.mxu0  ;;  %v6668_v3 = vld [vmem:[%s9293_s3 + $0x50] sm:$0xff] }
 0x3c6   :  { %7435 = vmatprep.subr.mxu1 %v8410_v4 }
 0x3c7   :  { %v8413_v7 = vpop.f32.mrf.mxu0 }
 0x47c   :  { %v7420_v5 = vpop.f32.mrf.mxu1 }
 0x47d   :  { %v1195_v6 = vmul.f32 0.35355338, %v7420_v5 }
 0x47e   :  { %v1098_v9 = vpop.f32.mrf.mxu1 }
 0x47f   :  { %v1194_v10 = vmul.f32 0.35355338, %v1098_v9  ;;  %v1199_v11 = vsel %vm77_vm4, %v1195_v6, -1e+30  ;;  %v6660_v6 = vld [vmem:[%s9292_s2 + $0x50] sm:$0xff]  ;;  %v6659_v9 = vld [vmem:[%s9292_s2 + $0x48] sm:$0xff] }
 0x480   :  { %v7427_v12 = vpop.f32.mrf.mxu0  ;;  %v1205_v13 = vsel %vm542_vm5, %v1199_v11, -inf }
 0x481   :  { %v1197_v14 = vmul.f32 0.35355338, %v7427_v12  ;;  %1206 = vmax.xlane.f32.xlu1 %v1205_v13  ;;  %v1198_v15 = vsel %vm77_vm4, %v1194_v10, -1e+30  ;;  %v6677_v12 = vld [vmem:[%s9294_s4 + $0x58] sm:$0xff]  ;;  %v6676_v13 = vld [vmem:[%s9294_s4 + $0x50] sm:$0xff] }
 0x482   :  { %v1185_v16 = vpop.f32.mrf.mxu0  ;;  %v1202_v17 = vsel %vm542_vm5, %v1198_v15, -inf }
 0x483   :  { %v1196_v18 = vmul.f32 0.35355338, %v1185_v16  ;;  %1203 = vmax.xlane.f32.xlu0 %v1202_v17  ;;  %v1201_v19 = vsel %vm77_vm4, %v1197_v14, -1e+30  ;;  %v6675_v14 = vld [vmem:[%s9294_s4 + $0x48] sm:$0xff] }
 0x484   :  { %v1211_v20 = vsel %vm542_vm5, %v1201_v19, -inf }
 0x485   :  { %1212 = vmax.xlane.f32.xlu1 %v1211_v20  ;;  %v1200_v21 = vsel %vm77_vm4, %v1196_v18, -1e+30 }
 0x486   :  { %v1208_v23 = vsel %vm542_vm5, %v1200_v21, -inf }
 0x487   :  { %1209 = vmax.xlane.f32.xlu0 %v1208_v23 }
 0x50a   :  { %v1207_v24 = vpop.xlane.xlu1 %1206 }
 0x50b   :  { %v1215_v25 = vsub.f32 %v1199_v11, %v1207_v24  ;;  %v6658_v11 = vld [vmem:[%s9292_s2 + $0x40] sm:$0xff] }
 0x50c   :  { %v1204_v26 = vpop.xlane.xlu0 %1203 }
 0x50d   :  { %v1220_v27 = vmul.f32 1.442695, %v1215_v25  ;;  %v1214_v28 = vsub.f32 %v1198_v15, %v1204_v26 }
 0x50e   :  { %v1213_v29 = vpop.xlane.xlu1 %1212 }
 0x50f   :  { %8000 = vpow2.f32 %v1220_v27  ;;  %v1218_v30 = vmul.f32 1.442695, %v1214_v28  ;;  %v1217_v33 = vsub.f32 %v1201_v19, %v1213_v29 }
 0x510   :  { %v1210_v35 = vpop.xlane.xlu0 %1209 }
 0x511   :  { %8002 = vpow2.f32 %v1218_v30  ;;  %v1224_v36 = vmul.f32 1.442695, %v1217_v33  ;;  %v1216_v37 = vsub.f32 %v1200_v21, %v1210_v35  ;;  %v6674_v21 = vld [vmem:[%s9294_s4 + $0x40] sm:$0xff] }
 0x513   :  { %8004 = vpow2.f32 %v1224_v36  ;;  %v1222_v38 = vmul.f32 1.442695, %v1216_v37 }
 0x515   :  { %8006 = vpow2.f32 %v1222_v38 }
 0x51c   :  { %v8001_v39 = vpop.eup %8000 }
 0x51d   :  { %v1229_v40 = vsel %vm542_vm5, %v8001_v39, 0.0 }
 0x51e   :  { %v8003_v41 = vpop.eup %8002  ;;  %1230 = vadd.xlane.f32.xlu1 %v1229_v40 }
 0x51f   :  { %v1226_v42 = vsel %vm542_vm5, %v8003_v41, 0.0 }
 0x520   :  { %v8005_v43 = vpop.eup %8004  ;;  %1227 = vadd.xlane.f32.xlu0 %v1226_v42 }
 0x521   :  { %v1235_v44 = vsel %vm542_vm5, %v8005_v43, 0.0 }
 0x522   :  { %v8007_v45 = vpop.eup %8006  ;;  %1236 = vadd.xlane.f32.xlu1 %v1235_v44 }
 0x523   :  { %v1232_v46 = vsel %vm542_vm5, %v8007_v45, 0.0 }
 0x524   :  { %1233 = vadd.xlane.f32.xlu0 %v1232_v46 }
 0x5a7   :  { %v1231_v47 = vpop.xlane.xlu1 %1230 }
 0x5a8   :  { %8008 = vrcp.f32 %v1231_v47 }
 0x5a9   :  { %v1228_v48 = vpop.xlane.xlu0 %1227 }
 0x5aa   :  { %8010 = vrcp.f32 %v1228_v48 }
 0x5ab   :  { %v1237_v50 = vpop.xlane.xlu1 %1236 }
 0x5ac   :  { %8012 = vrcp.f32 %v1237_v50 }
 0x5ad   :  { %v1234_v52 = vpop.xlane.xlu0 %1233 }
 0x5ae   :  { %8014 = vrcp.f32 %v1234_v52 }
 0x5b5   :  { %v8009_v53 = vpop.eup %8008 }
 0x5b6   :  { %v1243_v60 = vmul.f32 %v8009_v53, %v8001_v39 }
 0x5b7   :  { %v8011_v57 = vpop.eup %8010 }
 0x5b8   :  { %v1242_v59 = vmul.f32 %v8011_v57, %v8003_v41 }
 0x5b9   :  { %v8013_v61 = vpop.eup %8012 }
 0x5ba   :  { %7432 = vmatprep.mubr.msk.f32.mxu1 %vm542_vm5, %v1242_v59  ;;  %v1245_v1 = vmul.f32 %v8013_v61, %v8005_v43 }
 0x5bb   :  { %v8015_v62 = vpop.eup %8014  ;;  %7433 = vmatmul.mubr.msk.f32.vlgmr.msra.gmra.mxu1 %vm542_vm5, %v1243_v60 }
 0x5bc   :  { %7436 = vmatpush3.msra.mxu1 %v8410_v4  ;;  %v1244_v63 = vmul.f32 %v8015_v62, %v8007_v45  ;;  %v6667_v4 = vld [vmem:[%s9293_s3 + $0x48] sm:$0xff] }
 0x5bd   :  { %7437 = vmatprep.subr.mxu1 %v8413_v7 }
 0x5be   :  { %7438 = vmatpush3.msra.mxu1 %v8413_v7  ;;  %7439 = vmatprep.mubr.msk.f32.mxu1 %vm542_vm5, %v1244_v63 }
 0x5bf   :  { %7440 = vmatmul.mubr.msk.f32.vlgmr.msra.gmra.mxu1 %vm542_vm5, %v1245_v1  ;;  %7450 = vmatprep.subr.mxu1 %v749_v0 }
 0x5c0   :  { %7452 = vmatprep.mubr.msk.f32.mxu1 %vm357_vm3, %v8397_v58  ;;  %7451 = vmatpush3.msra.mxu1 %v749_v0 }
 0x5c1   :  { %7472 = vmatprep.subr.mxu1 %v6669_v2 }
 0x5c3   :  { %7453 = vmatmul.mubr.msk.f32.vlgmr.msra.gmra.mxu1 %vm357_vm3, %v8394_v56  ;;  %v6649_v56 = vld [vmem:[%s9295_s5 + $0x8] sm:$0xff] }
 0x5c4   :  { %7455 = vmatprep.mubr.msk.f32.mxu1 %vm357_vm3, %v8392_v55  ;;  %7473 = vmatpush3.msra.mxu1 %v6669_v2  ;;  %v6666_v55 = vld [vmem:[%s9293_s3 + $0x40] sm:$0xff] }
 0x5c5   :  { %7474 = vmatprep.subr.mxu1 %v6668_v3  ;;  %7442 = vmatprep.subr.mxu0 %v6649_v56 }
 0x5c6   :  { %7475 = vmatpush3.msra.mxu1 %v6668_v3  ;;  %7443 = vmatpush3.msra.mxu0 %v6649_v56 }
 0x5c7   :  { %7456 = vmatmul.mubr.msk.f32.gmra.mxu1 %vm357_vm3, %v8390_v54  ;;  %7476 = vmatprep.subr.mxu1 %v6667_v4  ;;  %v6661_v54 = vld [vmem:[%s9292_s2 + $0x58] sm:$0xff] }
 0x5c8   :  { %7477 = vmatpush3.msra.mxu1 %v6667_v4  ;;  %7480 = vmatprep.mubr.msk.f32.mxu1 %vm41_vm0, %v8251_v22 }
 0x5c9   :  { %7478 = vmatprep.subr.mxu1 %v6666_v55  ;;  %7458 = vmatprep.subr.mxu0 %v6661_v54 }
 0x5ca   :  { %7479 = vmatpush3.msra.mxu1 %v6666_v55 }
 0x5cb   :  { %7481 = vmatmul.mubr.msk.f32.vlgmr.msra.gmra.mxu1 %vm41_vm0, %v8261_v32 }
 0x5cc   :  { %7483 = vmatprep.mubr.msk.f32.mxu1 %vm41_vm0, %v8259_v31 }
 0x5cf   :  { %7484 = vmatmul.mubr.msk.f32.gmra.mxu1 %vm41_vm0, %v8272_v34 }
 0x67b   :  { %v7434_v58 = vpop.f32.mrf.mxu1 }
 0x67d   :  { %v1318_v5 = vpop.f32.mrf.mxu1 }
 0x67e   :  { %7444 = vmatprep.mubr.msk.f32.mxu0 %vm357_vm3, %v1318_v5 }
 0x67f   :  { %v7441_v7 = vpop.f32.mrf.mxu1  ;;  %7445 = vmatmul.mubr.msk.f32.vlgmr.msra.gmra.mxu0 %vm357_vm3, %v7434_v58 }
 0x680   :  { %7459 = vmatpush3.msra.mxu0 %v6661_v54 }
 0x681   :  { %v1399_v10 = vpop.f32.mrf.mxu1  ;;  %7460 = vmatprep.subr.mxu0 %v6660_v6 }
 0x682   :  { %7447 = vmatprep.mubr.msk.f32.mxu0 %vm357_vm3, %v1399_v10  ;;  %7461 = vmatpush3.msra.mxu0 %v6660_v6 }
 0x683   :  { %7448 = vmatmul.mubr.msk.f32.gmra.mxu0 %vm357_vm3, %v7441_v7  ;;  %7462 = vmatprep.subr.mxu0 %v6659_v9  ;;  %v8507_v15 = vpop.f32.mrf.mxu1 }
 0x684   :  { %7463 = vmatpush3.msra.mxu0 %v6659_v9  ;;  %7466 = vmatprep.mubr.msk.f32.mxu0 %vm41_vm0, %v8251_v22 }
 0x685   :  { %7464 = vmatprep.subr.mxu0 %v6658_v11  ;;  %v8509_v16 = vpop.f32.mrf.mxu1 }
 0x686   :  { %7465 = vmatpush3.msra.mxu0 %v6658_v11 }
 0x687   :  { %7467 = vmatmul.mubr.msk.f32.vlgmr.msra.gmra.mxu0 %vm41_vm0, %v8261_v32  ;;  %7486 = vmatprep.subr.mxu0 %v6677_v12  ;;  %v8511_v17 = vpop.f32.mrf.mxu1 }
 0x688   :  { %7469 = vmatprep.mubr.msk.f32.mxu0 %vm41_vm0, %v8259_v31  ;;  %7487 = vmatpush3.msra.mxu0 %v6677_v12 }
 0x689   :  { %7488 = vmatprep.subr.mxu0 %v6676_v13  ;;  %v8513_v18 = vpop.f32.mrf.mxu1 }
 0x68a   :  { %7489 = vmatpush3.msra.mxu0 %v6676_v13 }
 0x68b   :  { %7470 = vmatmul.mubr.msk.f32.gmra.mxu0 %vm41_vm0, %v8272_v34  ;;  %7490 = vmatprep.subr.mxu0 %v6675_v14  ;;  %v7482_v19 = vpop.f32.mrf.mxu1 }
 0x68c   :  { %7491 = vmatpush3.msra.mxu0 %v6675_v14  ;;  %7494 = vmatprep.mubr.msk.f32.mxu0 %vm41_vm0, %v8251_v22 }
 0x68d   :  { %7500 = vmatprep.subr.msk.mxu1 %vm357_vm3, %v7482_v19  ;;  %v1765_v20 = vpop.f32.mrf.mxu1  ;;  %7492 = vmatprep.subr.mxu0 %v6674_v21 }
 0x68e   :  { %7501 = vmatpush3.xpose.msk.msra.mxu1 %vm357_vm3, %v7482_v19  ;;  %7493 = vmatpush3.msra.mxu0 %v6674_v21 }
 0x68f   :  { %7502 = vmatprep.subr.msk.mxu1 %vm357_vm3, %v1765_v20  ;;  %v7485_v23 = vpop.f32.mrf.mxu1  ;;  %7495 = vmatmul.mubr.msk.f32.vlgmr.msra.gmra.mxu0 %vm41_vm0, %v8261_v32 }
 0x690   :  { %7507 = vmatprep.subr.msk.mxu0 %vm357_vm3, %v7485_v23  ;;  %7497 = vmatprep.mubr.msk.f32.mxu0 %vm41_vm0, %v8259_v31 }
 0x691   :  { %7508 = vmatpush3.xpose.msk.msra.mxu0 %vm357_vm3, %v7485_v23  ;;  %v1775_v24 = vpop.f32.mrf.mxu1 }
 0x692   :  { %7503 = vmatpush3.xpose.msk.msra.mxu1 %vm357_vm3, %v1765_v20  ;;  %7509 = vmatprep.subr.msk.mxu0 %vm357_vm3, %v1775_v24 }
 0x693   :  { %7498 = vmatmul.mubr.msk.f32.gmra.mxu0 %vm41_vm0, %v8272_v34 }
 0x695   :  { %7510 = vmatpush3.xpose.msk.msra.mxu0 %vm357_vm3, %v1775_v24 }
 0x73f   :  { %v8532_v25 = vpop.f32.mrf.mxu0 }
 0x741   :  { %v8534_v26 = vpop.f32.mrf.mxu0 }
 0x743   :  { %v8536_v27 = vpop.f32.mrf.mxu0 }
 0x745   :  { %v8538_v28 = vpop.f32.mrf.mxu0 }
 0x747   :  { %v7468_v29 = vpop.f32.mrf.mxu0 }
 0x749   :  { %v1675_v30 = vpop.f32.mrf.mxu0 }
 0x74a   :  { %7504 = vmatprep.mubr.msk.f32.mxu1 %vm357_vm3, %v1675_v30 }
 0x74b   :  { %v7471_v33 = vpop.f32.mrf.mxu0  ;;  %7505 = vmatmul.mubr.msk.f32.vlgmr.msra.gmra.mxu1 %vm357_vm3, %v7468_v29 }
 0x74d   :  { %v1685_v35 = vpop.f32.mrf.mxu0 }
 0x74e   :  { %7511 = vmatprep.mubr.msk.f32.mxu0 %vm357_vm3, %v1685_v35 }
 0x74f   :  { %7512 = vmatmul.mubr.msk.f32.vlgmr.msra.gmra.mxu0 %vm357_vm3, %v7471_v33  ;;  %v7496_v36 = vpop.f32.mrf.mxu0 }
 0x750   :  { %7514 = vmatprep.subr.mxu1 %v7496_v36 }
 0x751   :  { %v1855_v37 = vpop.f32.mrf.mxu0  ;;  %7515 = vmatpush3.msra.mxu1 %v7496_v36 }
 0x752   :  { %7516 = vmatprep.subr.mxu1 %v1855_v37 }
 0x753   :  { %7517 = vmatpush3.msra.mxu1 %v1855_v37  ;;  %v8544_v38 = vpop.f32.mrf.mxu0 }
 0x754   :  { %7521 = vmatprep.subr.mxu1 %v8544_v38 }
 0x755   :  { %v8547_v41 = vpop.f32.mrf.mxu0 }
 0x80b   :  { %v7506_v39 = vpop.f32.mrf.mxu1 }
 0x80c   :  { %v2049_v40 = vmul.f32 0.35355338, %v7506_v39 }
 0x80d   :  { %v1952_v42 = vpop.f32.mrf.mxu1 }
 0x80e   :  { %v2048_v43 = vmul.f32 0.35355338, %v1952_v42  ;;  %v2053_v44 = vsel %vm77_vm4, %v2049_v40, -1e+30  ;;  %v6694_v40 = vld [vmem:[%s9295_s5 + $0x10] sm:$0xff] }
 0x80f   :  { %v7513_v45 = vpop.f32.mrf.mxu0  ;;  %v2059_v46 = vsel %vm542_vm5, %v2053_v44, -inf  ;;  %7528 = vmatprep.subr.mxu0 %v6694_v40  ;;  %v6701_v42 = vld [vmem:[%s9292_s2 + $0x70] sm:$0xff] }
 0x810   :  { %v2051_v47 = vmul.f32 0.35355338, %v7513_v45  ;;  %2060 = vmax.xlane.f32.xlu1 %v2059_v46  ;;  %v2052_v48 = vsel %vm77_vm4, %v2048_v43, -1e+30  ;;  %7529 = vmatpush3.msra.mxu0 %v6694_v40  ;;  %v6700_v43 = vld [vmem:[%s9292_s2 + $0x68] sm:$0xff] }
 0x811   :  { %v2039_v50 = vpop.f32.mrf.mxu0  ;;  %v2056_v52 = vsel %vm542_vm5, %v2052_v48, -inf }
 0x812   :  { %v2050_v53 = vmul.f32 0.35355338, %v2039_v50  ;;  %2057 = vmax.xlane.f32.xlu0 %v2056_v52  ;;  %v2055_v57 = vsel %vm77_vm4, %v2051_v47, -1e+30  ;;  %v6709_v47 = vld [vmem:[%s9293_s3 + $0x70] sm:$0xff]  ;;  %v6708_v50 = vld [vmem:[%s9293_s3 + $0x68] sm:$0xff] }
 0x813   :  { %v2065_v59 = vsel %vm542_vm5, %v2055_v57, -inf }
 0x814   :  { %2066 = vmax.xlane.f32.xlu1 %v2065_v59  ;;  %v2054_v60 = vsel %vm77_vm4, %v2050_v53, -1e+30  ;;  %v6707_v53 = vld [vmem:[%s9293_s3 + $0x60] sm:$0xff]  ;;  %v6716_v59 = vld [vmem:[%s9294_s4 + $0x68] sm:$0xff] }
 0x815   :  { %v2062_v61 = vsel %vm542_vm5, %v2054_v60, -inf }
 0x816   :  { %2063 = vmax.xlane.f32.xlu0 %v2062_v61  ;;  %v8635_v61 = vld [vmem:[#allocation2 + $0x10] sm:$0xff] }
 0x899   :  { %v2061_v62 = vpop.xlane.xlu1 %2060 }
 0x89a   :  { %v2069_v63 = vsub.f32 %v2053_v44, %v2061_v62  ;;  %v6699_v44 = vld [vmem:[%s9292_s2 + $0x60] sm:$0xff] }
 0x89b   :  { %v2058_v0 = vpop.xlane.xlu0 %2057 }
 0x89c   :  { %v2074_v1 = vmul.f32 1.442695, %v2069_v63  ;;  %v2068_v2 = vsub.f32 %v2052_v48, %v2058_v0 }
 0x89d   :  { %v2067_v3 = vpop.xlane.xlu1 %2066 }
 0x89e   :  { %8016 = vpow2.f32 %v2074_v1  ;;  %v2072_v4 = vmul.f32 1.442695, %v2068_v2  ;;  %v2071_v56 = vsub.f32 %v2055_v57, %v2067_v3  ;;  %v6718_v57 = vld [vmem:[%s9294_s4 + $0x78] sm:$0xff]  ;;  %v1591_v1 = vadd.f32 %v8507_v15, %v8532_v25 }
 0x89f   :  { %v2064_v55 = vpop.xlane.xlu0 %2063  ;;  %v1586_v2 = vadd.f32 %v8509_v16, %v8534_v26 }
 0x8a0   :  { %8018 = vpow2.f32 %v2072_v4  ;;  %v2078_v54 = vmul.f32 1.442695, %v2071_v56  ;;  %v2070_v58 = vsub.f32 %v2054_v60, %v2064_v55  ;;  %v1601_v56 = vadd.f32 %v8511_v17, %v8536_v27 }
 0x8a2   :  { %8020 = vpow2.f32 %v2078_v54  ;;  %v2076_v5 = vmul.f32 1.442695, %v2070_v58  ;;  %v1596_v54 = vadd.f32 %v8513_v18, %v8538_v28 }
 0x8a4   :  { %8022 = vpow2.f32 %v2076_v5 }
 0x8ab   :  { %v8017_v6 = vpop.eup %8016 }
 0x8ac   :  { %v2083_v7 = vsel %vm542_vm5, %v8017_v6, 0.0 }
 0x8ad   :  { %v8019_v9 = vpop.eup %8018  ;;  %2084 = vadd.xlane.f32.xlu1 %v2083_v7 }
 0x8ae   :  { %v2080_v10 = vsel %vm542_vm5, %v8019_v9, 0.0 }
 0x8af   :  { %v8021_v11 = vpop.eup %8020  ;;  %2081 = vadd.xlane.f32.xlu0 %v2080_v10 }
 0x8b0   :  { %v2089_v12 = vsel %vm542_vm5, %v8021_v11, 0.0 }
 0x8b1   :  { %v8023_v13 = vpop.eup %8022  ;;  %2090 = vadd.xlane.f32.xlu1 %v2089_v12 }
 0x8b2   :  { %v2086_v14 = vsel %vm542_vm5, %v8023_v13, 0.0 }
 0x8b3   :  { %2087 = vadd.xlane.f32.xlu0 %v2086_v14 }
 0x936   :  { %v2085_v19 = vpop.xlane.xlu1 %2084 }
 0x937   :  { %8024 = vrcp.f32 %v2085_v19 }
 0x938   :  { %v2082_v20 = vpop.xlane.xlu0 %2081 }
 0x939   :  { %8026 = vrcp.f32 %v2082_v20 }
 0x93a   :  { %v2091_v21 = vpop.xlane.xlu1 %2090 }
 0x93b   :  { %8028 = vrcp.f32 %v2091_v21 }
 0x93c   :  { %v2088_v23 = vpop.xlane.xlu0 %2087 }
 0x93d   :  { %8030 = vrcp.f32 %v2088_v23 }
 0x944   :  { %v8025_v24 = vpop.eup %8024 }
 0x945   :  { %v2097_v33 = vmul.f32 %v8025_v24, %v8017_v6 }
 0x946   :  { %v8027_v29 = vpop.eup %8026 }
 0x947   :  { %v2096_v30 = vmul.f32 %v8027_v29, %v8019_v9 }
 0x948   :  { %v8029_v35 = vpop.eup %8028 }
 0x949   :  { %7518 = vmatprep.mubr.msk.f32.mxu1 %vm542_vm5, %v2096_v30  ;;  %v2099_v39 = vmul.f32 %v8029_v35, %v8021_v11 }
 0x94a   :  { %v8031_v36 = vpop.eup %8030  ;;  %7519 = vmatmul.mubr.msk.f32.vlgmr.msra.gmra.mxu1 %vm542_vm5, %v2097_v33 }
 0x94b   :  { %7522 = vmatpush3.msra.mxu1 %v8544_v38  ;;  %v2098_v37 = vmul.f32 %v8031_v36, %v8023_v13  ;;  %v6710_v38 = vld [vmem:[%s9293_s3 + $0x78] sm:$0xff] }
 0x94c   :  { %7523 = vmatprep.subr.mxu1 %v8547_v41  ;;  %7550 = vmatprep.subr.mxu0 %v6710_v38 }
 0x94d   :  { %7524 = vmatpush3.msra.mxu1 %v8547_v41  ;;  %7525 = vmatprep.mubr.msk.f32.mxu1 %vm542_vm5, %v2098_v37  ;;  %v6702_v41 = vld [vmem:[%s9292_s2 + $0x78] sm:$0xff] }
 0x94e   :  { %7526 = vmatmul.mubr.msk.f32.vlgmr.msra.gmra.mxu1 %vm542_vm5, %v2099_v39  ;;  %7536 = vmatprep.subr.mxu1 %v6702_v41 }
 0x94f   :  { %7544 = vmatprep.mubr.msk.f32.mxu1 %vm41_vm0, %v8251_v22  ;;  %7537 = vmatpush3.msra.mxu1 %v6702_v41 }
 0x950   :  { %7538 = vmatprep.subr.mxu1 %v6701_v42 }
 0x951   :  { %7539 = vmatpush3.msra.mxu1 %v6701_v42 }
 0x952   :  { %7540 = vmatprep.subr.mxu1 %v6700_v43 }
 0x953   :  { %7541 = vmatpush3.msra.mxu1 %v6700_v43 }
 0x954   :  { %7542 = vmatprep.subr.mxu1 %v6699_v44 }
 0x955   :  { %7543 = vmatpush3.msra.mxu1 %v6699_v44 }
 0x956   :  { %7545 = vmatmul.mubr.msk.f32.vlgmr.msra.gmra.mxu1 %vm41_vm0, %v8261_v32  ;;  %7564 = vmatprep.subr.mxu1 %v6718_v57 }
 0x957   :  { %7547 = vmatprep.mubr.msk.f32.mxu1 %vm41_vm0, %v8259_v31  ;;  %7565 = vmatpush3.msra.mxu1 %v6718_v57 }
 0x95a   :  { %7548 = vmatmul.mubr.msk.f32.gmra.mxu1 %vm41_vm0, %v8272_v34 }
 0x95b   :  { %7572 = vmatprep.mubr.msk.f32.mxu1 %vm41_vm0, %v8251_v22 }
 0xa0a   :  { %v7520_v45 = vpop.f32.mrf.mxu1 }
 0xa0c   :  { %v2172_v46 = vpop.f32.mrf.mxu1 }
 0xa0d   :  { %7530 = vmatprep.mubr.msk.f32.mxu0 %vm357_vm3, %v2172_v46 }
 0xa0e   :  { %v7527_v48 = vpop.f32.mrf.mxu1  ;;  %7531 = vmatmul.mubr.msk.f32.vlgmr.msra.gmra.mxu0 %vm357_vm3, %v7520_v45 }
 0xa0f   :  { %7551 = vmatpush3.msra.mxu0 %v6710_v38 }
 0xa10   :  { %v2253_v52 = vpop.f32.mrf.mxu1  ;;  %7552 = vmatprep.subr.mxu0 %v6709_v47 }
 0xa11   :  { %7533 = vmatprep.mubr.msk.f32.mxu0 %vm357_vm3, %v2253_v52  ;;  %7553 = vmatpush3.msra.mxu0 %v6709_v47 }
 0xa12   :  { %7534 = vmatmul.mubr.msk.f32.gmra.mxu0 %vm357_vm3, %v7527_v48  ;;  %7554 = vmatprep.subr.mxu0 %v6708_v50 }
 0xa13   :  { %7555 = vmatpush3.msra.mxu0 %v6708_v50  ;;  %7558 = vmatprep.mubr.msk.f32.mxu0 %vm41_vm0, %v8251_v22  ;;  %v6717_v22 = vld [vmem:[%s9294_s4 + $0x70] sm:$0xff] }
 0xa14   :  { %7556 = vmatprep.subr.mxu0 %v6707_v53  ;;  %7566 = vmatprep.subr.mxu1 %v6717_v22 }
 0xa15   :  { %7557 = vmatpush3.msra.mxu0 %v6707_v53  ;;  %7567 = vmatpush3.msra.mxu1 %v6717_v22 }
 0xa16   :  { %7559 = vmatmul.mubr.msk.f32.vlgmr.msra.gmra.mxu0 %vm41_vm0, %v8261_v32  ;;  %7568 = vmatprep.subr.mxu1 %v6716_v59  ;;  %v7546_v60 = vpop.f32.mrf.mxu1 }
 0xa17   :  { %7561 = vmatprep.mubr.msk.f32.mxu0 %vm41_vm0, %v8259_v31  ;;  %7569 = vmatpush3.msra.mxu1 %v6716_v59  ;;  %v6715_v31 = vld [vmem:[%s9294_s4 + $0x60] sm:$0xff] }
 0xa18   :  { %7570 = vmatprep.subr.mxu1 %v6715_v31  ;;  %v2436_v62 = vpop.f32.mrf.mxu1 }
 0xa19   :  { %7571 = vmatpush3.msra.mxu1 %v6715_v31 }
 0xa1a   :  { %7562 = vmatmul.mubr.msk.f32.gmra.mxu0 %vm41_vm0, %v8272_v34  ;;  %7573 = vmatmul.mubr.msk.f32.vlgmr.msra.gmra.mxu1 %vm41_vm0, %v8261_v32  ;;  %v7549_v63 = vpop.f32.mrf.mxu1 }
 0xa1b   :  { %7575 = vmatprep.mubr.msk.f32.mxu1 %vm41_vm0, %v8635_v61  ;;  %7582 = vmatprep.mubr.msk.f32.mxu0 %vm357_vm3, %v2436_v62 }
 0xa1c   :  { %v2446_v0 = vpop.f32.mrf.mxu1 }
 0xa1e   :  { %7576 = vmatmul.mubr.msk.f32.gmra.mxu1 %vm41_vm0, %v8272_v34 }
 0xa1f   :  { %7589 = vmatprep.mubr.msk.f32.mxu1 %vm357_vm3, %v2446_v0 }
 0xace   :  { %v7532_v32 = vpop.f32.mrf.mxu0 }
 0xacf   :  { %v8647_v3 = vadd.f32 %v7532_v32, %v1591_v1 }
 0xad0   :  { %v2342_v4 = vpop.f32.mrf.mxu0 }
 0xad1   :  { %v8651_v55 = vadd.f32 %v2342_v4, %v1586_v2 }
 0xad2   :  { %v7535_v34 = vpop.f32.mrf.mxu0 }
 0xad3   :  { %v8655_v58 = vadd.f32 %v7535_v34, %v1601_v56 }
 0xad4   :  { %v2352_v5 = vpop.f32.mrf.mxu0 }
 0xad5   :  { %v8657_v15 = vadd.f32 %v2352_v5, %v1596_v54 }
 0xad6   :  { %v7560_v25 = vpop.f32.mrf.mxu0 }
 0xad7   :  { %7578 = vmatprep.subr.msk.mxu0 %vm357_vm3, %v7560_v25 }
 0xad8   :  { %v2526_v16 = vpop.f32.mrf.mxu0  ;;  %7579 = vmatpush3.xpose.msk.msra.mxu0 %vm357_vm3, %v7560_v25  ;;  %v6735_v25 = vld [vmem:[%s9295_s5 + $0x18] sm:$0xff] }
 0xad9   :  { %7580 = vmatprep.subr.msk.mxu0 %vm357_vm3, %v2526_v16 }
 0xada   :  { %v7563_v17 = vpop.f32.mrf.mxu0  ;;  %v7574_v18 = vpop.f32.mrf.mxu1 }
 0xadb   :  { %7585 = vmatprep.subr.msk.mxu1 %vm357_vm3, %v7563_v17 }
 0xadc   :  { %v2536_v26 = vpop.f32.mrf.mxu0  ;;  %7581 = vmatpush3.xpose.msk.msra.mxu0 %vm357_vm3, %v2526_v16  ;;  %7586 = vmatpush3.xpose.msk.msra.mxu1 %vm357_vm3, %v7563_v17  ;;  %v2616_v27 = vpop.f32.mrf.mxu1 }
 0xadd   :  { %7587 = vmatprep.subr.msk.mxu1 %vm357_vm3, %v2536_v26  ;;  %7592 = vmatprep.subr.mxu0 %v7574_v18 }
 0xade   :  { %v8669_v28 = vpop.f32.mrf.mxu1 }
 0xadf   :  { %7583 = vmatmul.mubr.msk.f32.vlgmr.msra.gmra.mxu0 %vm357_vm3, %v7546_v60 }
 0xae0   :  { %7588 = vmatpush3.xpose.msk.msra.mxu1 %vm357_vm3, %v2536_v26  ;;  %7593 = vmatpush3.msra.mxu0 %v7574_v18  ;;  %v8672_v9 = vpop.f32.mrf.mxu1 }
 0xae1   :  { %7594 = vmatprep.subr.mxu0 %v2616_v27  ;;  %7606 = vmatprep.subr.mxu1 %v6735_v25 }
 0xae2   :  { %7595 = vmatpush3.msra.mxu0 %v2616_v27  ;;  %v6743_v27 = vld [vmem:[%s9292_s2 + $0x98] sm:$0xff] }
 0xae3   :  { %7590 = vmatmul.mubr.msk.f32.vlgmr.msra.gmra.mxu1 %vm357_vm3, %v7549_v63  ;;  %7599 = vmatprep.subr.mxu0 %v8669_v28 }
 0xae4   :  { %7607 = vmatpush3.msra.mxu1 %v6735_v25 }
 0xb9f   :  { %v7584_v6 = vpop.f32.mrf.mxu0 }
 0xba0   :  { %v2810_v7 = vmul.f32 0.35355338, %v7584_v6  ;;  %v6742_v6 = vld [vmem:[%s9292_s2 + $0x90] sm:$0xff] }
 0xba1   :  { %v2713_v10 = vpop.f32.mrf.mxu0 }
 0xba2   :  { %v2809_v11 = vmul.f32 0.35355338, %v2713_v10  ;;  %v2814_v12 = vsel %vm77_vm4, %v2810_v7, -1e+30  ;;  %v6750_v7 = vld [vmem:[%s9293_s3 + $0x90] sm:$0xff]  ;;  %v6749_v10 = vld [vmem:[%s9293_s3 + $0x88] sm:$0xff] }
 0xba3   :  { %v7591_v13 = vpop.f32.mrf.mxu1  ;;  %v2820_v14 = vsel %vm542_vm5, %v2814_v12, -inf }
 0xba4   :  { %v2812_v19 = vmul.f32 0.35355338, %v7591_v13  ;;  %2821 = vmax.xlane.f32.xlu1 %v2820_v14  ;;  %v2813_v20 = vsel %vm77_vm4, %v2809_v11, -1e+30  ;;  %v6740_v11 = vld [vmem:[%s9292_s2 + $0x80] sm:$0xff]  ;;  %v6759_v13 = vld [vmem:[%s9294_s4 + $0x98] sm:$0xff] }
 0xba5   :  { %v2800_v21 = vpop.f32.mrf.mxu1  ;;  %v2817_v23 = vsel %vm542_vm5, %v2813_v20, -inf }
 0xba6   :  { %v2811_v24 = vmul.f32 0.35355338, %v2800_v21  ;;  %2818 = vmax.xlane.f32.xlu0 %v2817_v23  ;;  %v2816_v29 = vsel %vm77_vm4, %v2812_v19, -1e+30 }
 0xba7   :  { %v2826_v30 = vsel %vm542_vm5, %v2816_v29, -inf }
 0xba8   :  { %2827 = vmax.xlane.f32.xlu1 %v2826_v30  ;;  %v2815_v33 = vsel %vm77_vm4, %v2811_v24, -1e+30  ;;  %v8113_v24 = vld [vmem:[#allocation2] sm:$0xff]  ;;  %v8114_v30 = vld [vmem:[#allocation2 + $0x8] sm:$0xff] }
 0xba9   :  { %v2823_v35 = vsel %vm542_vm5, %v2815_v33, -inf }
 0xbaa   :  { %2824 = vmax.xlane.f32.xlu0 %v2823_v35 }
 0xc2d   :  { %v2822_v36 = vpop.xlane.xlu1 %2821 }
 0xc2e   :  { %v2830_v37 = vsub.f32 %v2814_v12, %v2822_v36  ;;  %v6748_v12 = vld [vmem:[%s9293_s3 + $0x80] sm:$0xff] }
 0xc2f   :  { %v2819_v39 = vpop.xlane.xlu0 %2818 }
 0xc30   :  { %v2835_v40 = vmul.f32 1.442695, %v2830_v37  ;;  %v2829_v38 = vsub.f32 %v2813_v20, %v2819_v39  ;;  %v6757_v39 = vld [vmem:[%s9294_s4 + $0x88] sm:$0xff] }
 0xc31   :  { %v2828_v41 = vpop.xlane.xlu1 %2827 }
 0xc32   :  { %8032 = vpow2.f32 %v2835_v40  ;;  %v2833_v42 = vmul.f32 1.442695, %v2829_v38  ;;  %v2832_v43 = vsub.f32 %v2816_v29, %v2828_v41 }
 0xc33   :  { %v2825_v44 = vpop.xlane.xlu0 %2824 }
 0xc34   :  { %8034 = vpow2.f32 %v2833_v42  ;;  %v2839_v45 = vmul.f32 1.442695, %v2832_v43  ;;  %v2831_v46 = vsub.f32 %v2815_v33, %v2825_v44 }
 0xc36   :  { %8036 = vpow2.f32 %v2839_v45  ;;  %v2837_v47 = vmul.f32 1.442695, %v2831_v46 }
 0xc38   :  { %8038 = vpow2.f32 %v2837_v47  ;;  %v6780_v47 = vld [vmem:[%s9292_s2 + $0xb8] sm:$0xff] }
 0xc3f   :  { %v8033_v48 = vpop.eup %8032 }
 0xc40   :  { %v2844_v50 = vsel %vm542_vm5, %v8033_v48, 0.0 }
 0xc41   :  { %v8035_v52 = vpop.eup %8034  ;;  %2845 = vadd.xlane.f32.xlu1 %v2844_v50 }
 0xc42   :  { %v2841_v53 = vsel %vm542_vm5, %v8035_v52, 0.0 }
 0xc43   :  { %v8037_v57 = vpop.eup %8036  ;;  %2842 = vadd.xlane.f32.xlu0 %v2841_v53 }
 0xc44   :  { %v2850_v22 = vsel %vm542_vm5, %v8037_v57, 0.0 }
 0xc45   :  { %v8039_v59 = vpop.eup %8038  ;;  %2851 = vadd.xlane.f32.xlu1 %v2850_v22  ;;  %v6777_v22 = vld [vmem:[%s9292_s2 + $0xa0] sm:$0xff] }
 0xc46   :  { %v2847_v31 = vsel %vm542_vm5, %v8039_v59, 0.0 }
 0xc47   :  { %2848 = vadd.xlane.f32.xlu0 %v2847_v31  ;;  %v6795_v31 = vld [vmem:[%s9294_s4 + $0xb0] sm:$0xff] }
 0xcca   :  { %v2846_v60 = vpop.xlane.xlu1 %2845 }
 0xccb   :  { %8040 = vrcp.f32 %v2846_v60  ;;  %v6794_v60 = vld [vmem:[%s9294_s4 + $0xa8] sm:$0xff] }
 0xccc   :  { %v2843_v62 = vpop.xlane.xlu0 %2842 }
 0xccd   :  { %8042 = vrcp.f32 %v2843_v62  ;;  %v6793_v62 = vld [vmem:[%s9294_s4 + $0xa0] sm:$0xff] }
 0xcce   :  { %v2852_v63 = vpop.xlane.xlu1 %2851 }
 0xccf   :  { %8044 = vrcp.f32 %v2852_v63 }
 0xcd0   :  { %v2849_v0 = vpop.xlane.xlu0 %2848 }
 0xcd1   :  { %8046 = vrcp.f32 %v2849_v0 }
 0xcd8   :  { %v8041_v1 = vpop.eup %8040 }
 0xcd9   :  { %v2858_v4 = vmul.f32 %v8041_v1, %v8033_v48 }
 0xcda   :  { %v8043_v32 = vpop.eup %8042 }
 0xcdb   :  { %v2857_v2 = vmul.f32 %v8043_v32, %v8035_v52  ;;  %v6779_v52 = vld [vmem:[%s9292_s2 + $0xb0] sm:$0xff] }
 0xcdc   :  { %v8045_v56 = vpop.eup %8044 }
 0xcdd   :  { %7596 = vmatprep.mubr.msk.f32.mxu0 %vm542_vm5, %v2857_v2  ;;  %v2860_v5 = vmul.f32 %v8045_v56, %v8037_v57  ;;  %v6778_v57 = vld [vmem:[%s9292_s2 + $0xa8] sm:$0xff] }
 0xcde   :  { %v8047_v34 = vpop.eup %8046  ;;  %7597 = vmatmul.mubr.msk.f32.vlgmr.msra.gmra.mxu0 %vm542_vm5, %v2858_v4 }
 0xcdf   :  { %7600 = vmatpush3.msra.mxu0 %v8669_v28  ;;  %v2859_v54 = vmul.f32 %v8047_v34, %v8039_v59  ;;  %v6751_v28 = vld [vmem:[%s9293_s3 + $0x98] sm:$0xff] }
 0xce0   :  { %7601 = vmatprep.subr.mxu0 %v8672_v9  ;;  %7628 = vmatprep.subr.mxu1 %v6751_v28  ;;  %v6796_v59 = vld [vmem:[%s9294_s4 + $0xb8] sm:$0xff] }
 0xce1   :  { %7602 = vmatpush3.msra.mxu0 %v8672_v9  ;;  %7603 = vmatprep.mubr.msk.f32.mxu0 %vm542_vm5, %v2859_v54  ;;  %v6741_v9 = vld [vmem:[%s9292_s2 + $0x88] sm:$0xff] }
 0xce2   :  { %7604 = vmatmul.mubr.msk.f32.vlgmr.msra.gmra.mxu0 %vm542_vm5, %v2860_v5  ;;  %7614 = vmatprep.subr.mxu0 %v6743_v27 }
 0xce3   :  { %7615 = vmatpush3.msra.mxu0 %v6743_v27 }
 0xce4   :  { %7616 = vmatprep.subr.mxu0 %v6742_v6 }
 0xce5   :  { %7617 = vmatpush3.msra.mxu0 %v6742_v6 }
 0xce6   :  { %7618 = vmatprep.subr.mxu0 %v6741_v9 }
 0xce7   :  { %7619 = vmatpush3.msra.mxu0 %v6741_v9 }
 0xce8   :  { %7620 = vmatprep.subr.mxu0 %v6740_v11 }
 0xce9   :  { %7621 = vmatpush3.msra.mxu0 %v6740_v11 }
 0xcea   :  { %7642 = vmatprep.subr.mxu0 %v6759_v13 }
 0xd9e   :  { %v7598_v16 = vpop.f32.mrf.mxu0 }
 0xda0   :  { %v2933_v17 = vpop.f32.mrf.mxu0 }
 0xda1   :  { %7608 = vmatprep.mubr.msk.f32.mxu1 %vm357_vm3, %v2933_v17 }
 0xda2   :  { %v7605_v26 = vpop.f32.mrf.mxu0  ;;  %7609 = vmatmul.mubr.msk.f32.vlgmr.msra.gmra.mxu1 %vm357_vm3, %v7598_v16 }
 0xda3   :  { %7629 = vmatpush3.msra.mxu1 %v6751_v28 }
 0xda4   :  { %v3014_v18 = vpop.f32.mrf.mxu0  ;;  %7630 = vmatprep.subr.mxu1 %v6750_v7 }
 0xda5   :  { %7611 = vmatprep.mubr.msk.f32.mxu1 %vm357_vm3, %v3014_v18  ;;  %7631 = vmatpush3.msra.mxu1 %v6750_v7 }
 0xda6   :  { %7612 = vmatmul.mubr.msk.f32.gmra.mxu1 %vm357_vm3, %v7605_v26  ;;  %7632 = vmatprep.subr.mxu1 %v6749_v10 }
 0xda7   :  { %7633 = vmatpush3.msra.mxu1 %v6749_v10 }
 0xda8   :  { %7634 = vmatprep.subr.mxu1 %v6748_v12 }
 0xda9   :  { %7635 = vmatpush3.msra.mxu1 %v6748_v12 }
 0xe62   :  { %v7610_v14 = vpop.f32.mrf.mxu1 }
 0xe63   :  { %v3123_v19 = vadd.f32 %v7610_v14, %v8647_v3  ;;  %v6758_v3 = vld [vmem:[%s9294_s4 + $0x90] sm:$0xff] }
 0xe64   :  { %v3103_v20 = vpop.f32.mrf.mxu1 }
 0xe65   :  { %v3122_v21 = vadd.f32 %v3103_v20, %v8651_v55  ;;  %v8735_v33 = vadd.f32 %v8114_v30, %v3123_v19 }
 0xe66   :  { %v7613_v23 = vpop.f32.mrf.mxu1 }
 0xe67   :  { %v8733_v29 = vadd.f32 %v8113_v24, %v3122_v21  ;;  %v3125_v35 = vadd.f32 %v7613_v23, %v8655_v58  ;;  %v8115_v58 = vld [vmem:[#allocation2 + $0x18] sm:$0xff] }
 0xe68   :  { %v3113_v36 = vpop.f32.mrf.mxu1 }
 0xe69   :  { %v3124_v37 = vadd.f32 %v3113_v36, %v8657_v15  ;;  %7622 = vmatprep.mubr.msk.f32.mxu0 %vm41_vm0, %v8733_v29  ;;  %7636 = vmatprep.mubr.msk.f32.mxu1 %vm41_vm0, %v8733_v29  ;;  %v8753_v15 = vadd.f32 %v8115_v58, %v3125_v35 }
 0xe6a   :  { %7623 = vmatmul.mubr.msk.f32.vlgmr.msra.gmra.mxu0 %vm41_vm0, %v8735_v33  ;;  %7637 = vmatmul.mubr.msk.f32.vlgmr.msra.gmra.mxu1 %vm41_vm0, %v8735_v33 }
 0xe6b   :  { %v8751_v55 = vadd.f32 %v8635_v61, %v3124_v37  ;;  %7643 = vmatpush3.msra.mxu0 %v6759_v13  ;;  %v6756_v61 = vld [vmem:[%s9294_s4 + $0x80] sm:$0xff] }
 0xe6c   :  { %7644 = vmatprep.subr.mxu0 %v6758_v3 }
 0xe6d   :  { %7625 = vmatprep.mubr.msk.f32.mxu0 %vm41_vm0, %v8751_v55  ;;  %7639 = vmatprep.mubr.msk.f32.mxu1 %vm41_vm0, %v8751_v55 }
 0xe6e   :  { %7645 = vmatpush3.msra.mxu0 %v6758_v3  ;;  %7640 = vmatmul.mubr.msk.f32.gmra.mxu1 %vm41_vm0, %v8753_v15 }
 0xe6f   :  { %7626 = vmatmul.mubr.msk.f32.gmra.mxu0 %vm41_vm0, %v8753_v15  ;;  %7646 = vmatprep.subr.mxu0 %v6757_v39 }
 0xe70   :  { %7647 = vmatpush3.msra.mxu0 %v6757_v39  ;;  %7650 = vmatprep.mubr.msk.f32.mxu0 %vm41_vm0, %v8733_v29 }
 0xe71   :  { %7648 = vmatprep.subr.mxu0 %v6756_v61 }
 0xe72   :  { %7649 = vmatpush3.msra.mxu0 %v6756_v61 }
 0xe73   :  { %7651 = vmatmul.mubr.msk.f32.vlgmr.msra.gmra.mxu0 %vm41_vm0, %v8735_v33 }
 0xe74   :  { %7653 = vmatprep.mubr.msk.f32.mxu0 %vm41_vm0, %v8751_v55 }
 0xe77   :  { %7654 = vmatmul.mubr.msk.f32.gmra.mxu0 %vm41_vm0, %v8753_v15 }
 0xf2a   :  { %v7624_v40 = vpop.f32.mrf.mxu0  ;;  %v7638_v38 = vpop.f32.mrf.mxu1 }
 0xf2b   :  { %7656 = vmatprep.subr.msk.mxu1 %vm357_vm3, %v7638_v38 }
 0xf2c   :  { %v3213_v41 = vpop.f32.mrf.mxu0  ;;  %v3303_v42 = vpop.f32.mrf.mxu1  ;;  %7657 = vmatpush3.xpose.msk.msra.mxu1 %vm357_vm3, %v7638_v38 }
 0xf2d   :  { %7658 = vmatprep.subr.msk.mxu1 %vm357_vm3, %v3303_v42  ;;  %7660 = vmatprep.mubr.msk.f32.mxu1 %vm357_vm3, %v3213_v41 }
 0xf2e   :  { %v7641_v43 = vpop.f32.mrf.mxu1 }
 0xf2f   :  { %v7627_v44 = vpop.f32.mrf.mxu0  ;;  %7663 = vmatprep.subr.msk.mxu0 %vm357_vm3, %v7641_v43 }
 0xf30   :  { %v3313_v45 = vpop.f32.mrf.mxu1  ;;  %7659 = vmatpush3.xpose.msk.msra.mxu1 %vm357_vm3, %v3303_v42  ;;  %7664 = vmatpush3.xpose.msk.msra.mxu0 %vm357_vm3, %v7641_v43 }
 0xf31   :  { %v3223_v46 = vpop.f32.mrf.mxu0  ;;  %7665 = vmatprep.subr.msk.mxu0 %vm357_vm3, %v3313_v45 }
 0xf32   :  { %7667 = vmatprep.mubr.msk.f32.mxu0 %vm357_vm3, %v3223_v46 }
 0xf33   :  { %v7652_v48 = vpop.f32.mrf.mxu0  ;;  %7661 = vmatmul.mubr.msk.f32.vlgmr.msra.gmra.mxu1 %vm357_vm3, %v7624_v40 }
 0xf34   :  { %7670 = vmatprep.subr.mxu1 %v7652_v48  ;;  %7666 = vmatpush3.xpose.msk.msra.mxu0 %vm357_vm3, %v3313_v45 }
 0xf35   :  { %v3393_v50 = vpop.f32.mrf.mxu0  ;;  %7671 = vmatpush3.msra.mxu1 %v7652_v48  ;;  %7684 = vmatprep.subr.mxu0 %v6780_v47 }
 0xf36   :  { %7672 = vmatprep.subr.mxu1 %v3393_v50 }
 0xf37   :  { %v8794_v53 = vpop.f32.mrf.mxu0  ;;  %7673 = vmatpush3.msra.mxu1 %v3393_v50  ;;  %7668 = vmatmul.mubr.msk.f32.vlgmr.msra.gmra.mxu0 %vm357_vm3, %v7627_v44 }
 0xf38   :  { %7677 = vmatprep.subr.mxu1 %v8794_v53  ;;  %7685 = vmatpush3.msra.mxu0 %v6780_v47 }
 0xf39   :  { %7692 = vmatprep.mubr.msk.f32.mxu0 %vm41_vm0, %v8733_v29  ;;  %7686 = vmatprep.subr.mxu0 %v6779_v52  ;;  %v8832_v1 = vpop.f32.mrf.mxu0 }
 0xf3a   :  { %7687 = vmatpush3.msra.mxu0 %v6779_v52 }
 0xf3b   :  { %7688 = vmatprep.subr.mxu0 %v6778_v57 }
 0xf3c   :  { %7689 = vmatpush3.msra.mxu0 %v6778_v57 }
 0xf3d   :  { %7690 = vmatprep.subr.mxu0 %v6777_v22 }
 0xf3e   :  { %7691 = vmatpush3.msra.mxu0 %v6777_v22 }
 0xf3f   :  { %7693 = vmatmul.mubr.msk.f32.vlgmr.msra.gmra.mxu0 %vm41_vm0, %v8735_v33  ;;  %7712 = vmatprep.subr.mxu0 %v6796_v59 }
 0xf40   :  { %7695 = vmatprep.mubr.msk.f32.mxu0 %vm41_vm0, %v8751_v55  ;;  %7713 = vmatpush3.msra.mxu0 %v6796_v59  ;;  %v6788_v59 = vld [vmem:[%s9293_s3 + $0xb8] sm:$0xff] }
 0xf41   :  { %7714 = vmatprep.subr.mxu0 %v6795_v31 }
 0xf42   :  { %7715 = vmatpush3.msra.mxu0 %v6795_v31 }
 0xf43   :  { %7696 = vmatmul.mubr.msk.f32.gmra.mxu0 %vm41_vm0, %v8753_v15  ;;  %7716 = vmatprep.subr.mxu0 %v6794_v60 }
 0xf44   :  { %7717 = vmatpush3.msra.mxu0 %v6794_v60  ;;  %7720 = vmatprep.mubr.msk.f32.mxu0 %vm41_vm0, %v8733_v29  ;;  %v6787_v60 = vld [vmem:[%s9293_s3 + $0xb0] sm:$0xff] }
 0xf45   :  { %7718 = vmatprep.subr.mxu0 %v6793_v62 }
 0xf46   :  { %7719 = vmatpush3.msra.mxu0 %v6793_v62  ;;  %v6785_v62 = vld [vmem:[%s9293_s3 + $0xa0] sm:$0xff] }
 0xf47   :  { %7721 = vmatmul.mubr.msk.f32.vlgmr.msra.gmra.mxu0 %vm41_vm0, %v8735_v33 }
 0xf48   :  { %7723 = vmatprep.mubr.msk.f32.mxu0 %vm41_vm0, %v8751_v55 }
 0xf4b   :  { %7724 = vmatmul.mubr.msk.f32.gmra.mxu0 %vm41_vm0, %v8753_v15 }
 0xff3   :  { %v7662_v63 = vpop.f32.mrf.mxu1 }
 0xff4   :  { %v3587_v0 = vmul.f32 0.35355338, %v7662_v63 }
 0xff5   :  { %v3490_v32 = vpop.f32.mrf.mxu1 }
 0xff6   :  { %v3586_v2 = vmul.f32 0.35355338, %v3490_v32  ;;  %v3591_v4 = vsel %vm77_vm4, %v3587_v0, -1e+30 }
 0xff7   :  { %v7669_v56 = vpop.f32.mrf.mxu0  ;;  %v3597_v34 = vsel %vm542_vm5, %v3591_v4, -inf }
 0xff8   :  { %v3589_v54 = vmul.f32 0.35355338, %v7669_v56  ;;  %3598 = vmax.xlane.f32.xlu1 %v3597_v34  ;;  %v3590_v5 = vsel %vm77_vm4, %v3586_v2, -1e+30 }
 0xff9   :  { %v3577_v25 = vpop.f32.mrf.mxu0  ;;  %v3594_v16 = vsel %vm542_vm5, %v3590_v5, -inf }
 0xffa   :  { %v3588_v17 = vmul.f32 0.35355338, %v3577_v25  ;;  %3595 = vmax.xlane.f32.xlu0 %v3594_v16  ;;  %v3593_v26 = vsel %vm77_vm4, %v3589_v54, -1e+30 }
 0xffb   :  { %v3603_v18 = vsel %vm542_vm5, %v3593_v26, -inf }
 0xffc   :  { %3604 = vmax.xlane.f32.xlu1 %v3603_v18  ;;  %v3592_v27 = vsel %vm77_vm4, %v3588_v17, -1e+30 }
 0xffd   :  { %v3600_v28 = vsel %vm542_vm5, %v3592_v27, -inf }
 0xffe   :  { %3601 = vmax.xlane.f32.xlu0 %v3600_v28 }
 0xfff   :  { %v8846_v6 = vpop.f32.mrf.mxu0 }
0x1001   :  { %v8848_v7 = vpop.f32.mrf.mxu0 }
0x1003   :  { %v8850_v9 = vpop.f32.mrf.mxu0 }
0x1005   :  { %v3883_v10 = vpop.f32.mrf.mxu0 }
0x1006   :  { %7737 = vmatprep.mubr.msk.f32.mxu0 %vm357_vm3, %v3883_v10 }
0x1007   :  { %v7722_v56 = vpop.f32.mrf.mxu0 }
0x1081   :  { %v3599_v11 = vpop.xlane.xlu1 %3598 }
0x1082   :  { %v3607_v12 = vsub.f32 %v3591_v4, %v3599_v11 }
0x1083   :  { %v3596_v13 = vpop.xlane.xlu0 %3595 }
0x1084   :  { %v3612_v14 = vmul.f32 1.442695, %v3607_v12  ;;  %v3606_v19 = vsub.f32 %v3590_v5, %v3596_v13  ;;  %v4053_v5 = vpop.f32.mrf.mxu0 }
0x1085   :  { %v3605_v20 = vpop.xlane.xlu1 %3604 }
0x1086   :  { %8048 = vpow2.f32 %v3612_v14  ;;  %v3610_v21 = vmul.f32 1.442695, %v3606_v19  ;;  %v3609_v23 = vsub.f32 %v3593_v26, %v3605_v20  ;;  %v8904_v25 = vpop.f32.mrf.mxu0 }
0x1087   :  { %v3602_v24 = vpop.xlane.xlu0 %3601 }
0x1088   :  { %8050 = vpow2.f32 %v3610_v21  ;;  %v3616_v30 = vmul.f32 1.442695, %v3609_v23  ;;  %v3608_v35 = vsub.f32 %v3592_v27, %v3602_v24  ;;  %v8909_v26 = vpop.f32.mrf.mxu0 }
0x108a   :  { %8052 = vpow2.f32 %v3616_v30  ;;  %v3614_v36 = vmul.f32 1.442695, %v3608_v35 }
0x108c   :  { %8054 = vpow2.f32 %v3614_v36 }
0x1093   :  { %v8049_v37 = vpop.eup %8048 }
0x1094   :  { %v3621_v3 = vsel %vm542_vm5, %v8049_v37, 0.0 }
0x1095   :  { %v8051_v58 = vpop.eup %8050  ;;  %3622 = vadd.xlane.f32.xlu1 %v3621_v3 }
0x1096   :  { %v3618_v39 = vsel %vm542_vm5, %v8051_v58, 0.0 }
0x1097   :  { %v8053_v61 = vpop.eup %8052  ;;  %3619 = vadd.xlane.f32.xlu0 %v3618_v39 }
0x1098   :  { %v3627_v40 = vsel %vm542_vm5, %v8053_v61, 0.0 }
0x1099   :  { %v8055_v38 = vpop.eup %8054  ;;  %3628 = vadd.xlane.f32.xlu1 %v3627_v40 }
0x109a   :  { %v3624_v41 = vsel %vm542_vm5, %v8055_v38, 0.0 }
0x109b   :  { %3625 = vadd.xlane.f32.xlu0 %v3624_v41 }
0x111e   :  { %v3623_v42 = vpop.xlane.xlu1 %3622 }
0x111f   :  { %8056 = vrcp.f32 %v3623_v42 }
0x1120   :  { %v3620_v43 = vpop.xlane.xlu0 %3619 }
0x1121   :  { %8058 = vrcp.f32 %v3620_v43 }
0x1122   :  { %v3629_v44 = vpop.xlane.xlu1 %3628 }
0x1123   :  { %8060 = vrcp.f32 %v3629_v44 }
0x1124   :  { %v3626_v45 = vpop.xlane.xlu0 %3625 }
0x1125   :  { %8062 = vrcp.f32 %v3626_v45 }
0x112c   :  { %v8057_v46 = vpop.eup %8056 }
0x112d   :  { %v3635_v50 = vmul.f32 %v8057_v46, %v8049_v37 }
0x112e   :  { %v8059_v47 = vpop.eup %8058 }
0x112f   :  { %v3634_v48 = vmul.f32 %v8059_v47, %v8051_v58 }
0x1130   :  { %v8061_v52 = vpop.eup %8060 }
0x1131   :  { %7674 = vmatprep.mubr.msk.f32.mxu1 %vm542_vm5, %v3634_v48  ;;  %v3637_v31 = vmul.f32 %v8061_v52, %v8053_v61 }
0x1132   :  { %v8063_v57 = vpop.eup %8062  ;;  %7675 = vmatmul.mubr.msk.f32.vlgmr.msra.gmra.mxu1 %vm542_vm5, %v3635_v50 }
0x1133   :  { %7678 = vmatpush3.msra.mxu1 %v8794_v53  ;;  %v3636_v22 = vmul.f32 %v8063_v57, %v8055_v38  ;;  %v6786_v53 = vld [vmem:[%s9293_s3 + $0xa8] sm:$0xff] }
0x1134   :  { %7679 = vmatprep.subr.mxu1 %v8832_v1 }
0x1135   :  { %7680 = vmatpush3.msra.mxu1 %v8832_v1  ;;  %7681 = vmatprep.mubr.msk.f32.mxu1 %vm542_vm5, %v3636_v22 }
0x1136   :  { %7698 = vmatprep.subr.mxu1 %v6788_v59  ;;  %7682 = vmatmul.mubr.msk.f32.vlgmr.msra.gmra.mxu1 %vm542_vm5, %v3637_v31 }
0x1137   :  { %7699 = vmatpush3.msra.mxu1 %v6788_v59  ;;  %7706 = vmatprep.mubr.msk.f32.mxu1 %vm41_vm0, %v8733_v29 }
0x1138   :  { %7700 = vmatprep.subr.mxu1 %v6787_v60 }
0x1139   :  { %7701 = vmatpush3.msra.mxu1 %v6787_v60 }
0x113a   :  { %7702 = vmatprep.subr.mxu1 %v6786_v53 }
0x113b   :  { %7703 = vmatpush3.msra.mxu1 %v6786_v53 }
0x113c   :  { %7704 = vmatprep.subr.mxu1 %v6785_v62 }
0x113d   :  { %7705 = vmatpush3.msra.mxu1 %v6785_v62 }
0x113e   :  { %7707 = vmatmul.mubr.msk.f32.vlgmr.msra.gmra.mxu1 %vm41_vm0, %v8735_v33 }
0x113f   :  { %7709 = vmatprep.mubr.msk.f32.mxu1 %vm41_vm0, %v8751_v55 }
0x1142   :  { %7710 = vmatmul.mubr.msk.f32.gmra.mxu1 %vm41_vm0, %v8753_v15 }
0x1143   :  { %7730 = vmatprep.mubr.msk.f32.mxu1 %vm357_vm3, %v8848_v7 }
0x11f2   :  { %v8886_v63 = vpop.f32.mrf.mxu1 }
0x11f4   :  { %v8888_v0 = vpop.f32.mrf.mxu1 }
0x11f6   :  { %v8890_v1 = vpop.f32.mrf.mxu1 }
0x11f8   :  { %v8892_v32 = vpop.f32.mrf.mxu1 }
0x11fe   :  { %v7708_v2 = vpop.f32.mrf.mxu1 }
0x11ff   :  { %7726 = vmatprep.subr.msk.mxu1 %vm357_vm3, %v7708_v2 }
0x1200   :  { %v3963_v4 = vpop.f32.mrf.mxu1  ;;  %7727 = vmatpush3.xpose.msk.msra.mxu1 %vm357_vm3, %v7708_v2 }
0x1201   :  { %7728 = vmatprep.subr.msk.mxu1 %vm357_vm3, %v3963_v4 }
0x1202   :  { %v7711_v34 = vpop.f32.mrf.mxu1 }
0x1203   :  { %7733 = vmatprep.subr.msk.mxu0 %vm357_vm3, %v7711_v34 }
0x1204   :  { %v3973_v54 = vpop.f32.mrf.mxu1  ;;  %7729 = vmatpush3.xpose.msk.msra.mxu1 %vm357_vm3, %v3963_v4  ;;  %7734 = vmatpush3.xpose.msk.msra.mxu0 %vm357_vm3, %v7711_v34 }
0x1205   :  { %7735 = vmatprep.subr.msk.mxu0 %vm357_vm3, %v3973_v54  ;;  %7740 = vmatprep.subr.mxu1 %v7722_v56 }
0x1207   :  { %7731 = vmatmul.mubr.msk.f32.vlgmr.msra.gmra.mxu1 %vm357_vm3, %v8846_v6 }
0x1208   :  { %7736 = vmatpush3.xpose.msk.msra.mxu0 %vm357_vm3, %v3973_v54  ;;  %7741 = vmatpush3.msra.mxu1 %v7722_v56  ;;  %v6776_v56 = vld [vmem:[%s9295_s5 + $0x20] sm:$0xff]  ;;  %v6833_v54 = vld [vmem:[%s9293_s3 + $0xd8] sm:$0xff] }
0x1209   :  { %7742 = vmatprep.subr.mxu1 %v4053_v5 }
0x120a   :  { %7743 = vmatpush3.msra.mxu1 %v4053_v5  ;;  %v6832_v5 = vld [vmem:[%s9293_s3 + $0xd0] sm:$0xff] }
0x120b   :  { %7738 = vmatmul.mubr.msk.f32.vlgmr.msra.gmra.mxu0 %vm357_vm3, %v8850_v9  ;;  %7747 = vmatprep.subr.mxu1 %v8904_v25 }
0x12c7   :  { %v7732_v16 = vpop.f32.mrf.mxu1 }
0x12c8   :  { %v4247_v17 = vmul.f32 0.35355338, %v7732_v16 }
0x12c9   :  { %v4150_v18 = vpop.f32.mrf.mxu1 }
0x12ca   :  { %v4246_v27 = vmul.f32 0.35355338, %v4150_v18  ;;  %v4251_v28 = vsel %vm77_vm4, %v4247_v17, -1e+30  ;;  %v6824_v17 = vld [vmem:[%s9292_s2 + $0xd0] sm:$0xff]  ;;  %v6823_v18 = vld [vmem:[%s9292_s2 + $0xc8] sm:$0xff] }
0x12cb   :  { %v7739_v6 = vpop.f32.mrf.mxu0  ;;  %v4257_v7 = vsel %vm542_vm5, %v4251_v28, -inf }
0x12cc   :  { %v4249_v10 = vmul.f32 0.35355338, %v7739_v6  ;;  %4258 = vmax.xlane.f32.xlu1 %v4257_v7  ;;  %v4250_v11 = vsel %vm77_vm4, %v4246_v27, -1e+30  ;;  %v6841_v7 = vld [vmem:[%s9294_s4 + $0xd8] sm:$0xff] }
0x12cd   :  { %v4237_v9 = vpop.f32.mrf.mxu0  ;;  %v4254_v12 = vsel %vm542_vm5, %v4250_v11, -inf }
0x12ce   :  { %v4248_v13 = vmul.f32 0.35355338, %v4237_v9  ;;  %4255 = vmax.xlane.f32.xlu0 %v4254_v12  ;;  %v4253_v14 = vsel %vm77_vm4, %v4249_v10, -1e+30  ;;  %v6839_v12 = vld [vmem:[%s9294_s4 + $0xc8] sm:$0xff] }
0x12cf   :  { %v4263_v19 = vsel %vm542_vm5, %v4253_v14, -inf }
0x12d0   :  { %4264 = vmax.xlane.f32.xlu1 %v4263_v19  ;;  %v4252_v20 = vsel %vm77_vm4, %v4248_v13, -1e+30 }
0x12d1   :  { %v4260_v21 = vsel %vm542_vm5, %v4252_v20, -inf }
0x12d2   :  { %4261 = vmax.xlane.f32.xlu0 %v4260_v21 }
0x1355   :  { %v4259_v23 = vpop.xlane.xlu1 %4258 }
0x1356   :  { %v4267_v24 = vsub.f32 %v4251_v28, %v4259_v23  ;;  %v6822_v28 = vld [vmem:[%s9292_s2 + $0xc0] sm:$0xff] }
0x1357   :  { %v4256_v30 = vpop.xlane.xlu0 %4255 }
0x1358   :  { %v4272_v35 = vmul.f32 1.442695, %v4267_v24  ;;  %v4266_v36 = vsub.f32 %v4250_v11, %v4256_v30  ;;  %v6840_v11 = vld [vmem:[%s9294_s4 + $0xd0] sm:$0xff] }
0x1359   :  { %v4265_v37 = vpop.xlane.xlu1 %4264 }
0x135a   :  { %8064 = vpow2.f32 %v4272_v35  ;;  %v4270_v3 = vmul.f32 1.442695, %v4266_v36  ;;  %v4269_v58 = vsub.f32 %v4253_v14, %v4265_v37  ;;  %v6838_v14 = vld [vmem:[%s9294_s4 + $0xc0] sm:$0xff] }
0x135b   :  { %v4262_v39 = vpop.xlane.xlu0 %4261 }
0x135c   :  { %8066 = vpow2.f32 %v4270_v3  ;;  %v4276_v61 = vmul.f32 1.442695, %v4269_v58  ;;  %v4268_v40 = vsub.f32 %v4252_v20, %v4262_v39 }
0x135e   :  { %8068 = vpow2.f32 %v4276_v61  ;;  %v4274_v38 = vmul.f32 1.442695, %v4268_v40 }
0x1360   :  { %8070 = vpow2.f32 %v4274_v38 }
0x1367   :  { %v8065_v41 = vpop.eup %8064 }
0x1368   :  { %v4281_v42 = vsel %vm542_vm5, %v8065_v41, 0.0 }
0x1369   :  { %v8067_v43 = vpop.eup %8066  ;;  %4282 = vadd.xlane.f32.xlu1 %v4281_v42 }
0x136a   :  { %v4278_v44 = vsel %vm542_vm5, %v8067_v43, 0.0 }
0x136b   :  { %v8069_v45 = vpop.eup %8068  ;;  %4279 = vadd.xlane.f32.xlu0 %v4278_v44 }
0x136c   :  { %v4287_v46 = vsel %vm542_vm5, %v8069_v45, 0.0 }
0x136d   :  { %v8071_v47 = vpop.eup %8070  ;;  %4288 = vadd.xlane.f32.xlu1 %v4287_v46 }
0x136e   :  { %v4284_v48 = vsel %vm542_vm5, %v8071_v47, 0.0 }
0x136f   :  { %4285 = vadd.xlane.f32.xlu0 %v4284_v48 }
0x13f2   :  { %v4283_v50 = vpop.xlane.xlu1 %4282 }
0x13f3   :  { %8072 = vrcp.f32 %v4283_v50 }
0x13f4   :  { %v4280_v52 = vpop.xlane.xlu0 %4279 }
0x13f5   :  { %8074 = vrcp.f32 %v4280_v52 }
0x13f6   :  { %v4289_v57 = vpop.xlane.xlu1 %4288 }
0x13f7   :  { %8076 = vrcp.f32 %v4289_v57 }
0x13f8   :  { %v4286_v22 = vpop.xlane.xlu0 %4285 }
0x13f9   :  { %8078 = vrcp.f32 %v4286_v22 }
0x1400   :  { %v8073_v59 = vpop.eup %8072 }
0x1401   :  { %v4295_v53 = vmul.f32 %v8073_v59, %v8065_v41 }
0x1402   :  { %v8075_v31 = vpop.eup %8074 }
0x1403   :  { %v4294_v60 = vmul.f32 %v8075_v31, %v8067_v43 }
0x1404   :  { %v8077_v62 = vpop.eup %8076 }
0x1405   :  { %7744 = vmatprep.mubr.msk.f32.mxu1 %vm542_vm5, %v4294_v60  ;;  %v4297_v34 = vmul.f32 %v8077_v62, %v8069_v45 }
0x1406   :  { %v8079_v2 = vpop.eup %8078  ;;  %7745 = vmatmul.mubr.msk.f32.vlgmr.msra.gmra.mxu1 %vm542_vm5, %v4295_v53 }
0x1407   :  { %7748 = vmatpush3.msra.mxu1 %v8904_v25  ;;  %v4296_v4 = vmul.f32 %v8079_v2, %v8071_v47  ;;  %v6831_v25 = vld [vmem:[%s9293_s3 + $0xc8] sm:$0xff] }
0x1408   :  { %7749 = vmatprep.subr.mxu1 %v8909_v26 }
0x1409   :  { %7750 = vmatpush3.msra.mxu1 %v8909_v26  ;;  %7751 = vmatprep.mubr.msk.f32.mxu1 %vm542_vm5, %v4296_v4 }
0x140a   :  { %7752 = vmatmul.mubr.msk.f32.vlgmr.msra.gmra.mxu1 %vm542_vm5, %v4297_v34  ;;  %7762 = vmatprep.subr.mxu1 %v6776_v56 }
0x140b   :  { %7764 = vmatprep.mubr.msk.f32.mxu1 %vm357_vm3, %v8888_v0  ;;  %7763 = vmatpush3.msra.mxu1 %v6776_v56  ;;  %v6830_v0 = vld [vmem:[%s9293_s3 + $0xc0] sm:$0xff] }
0x140c   :  { %7784 = vmatprep.subr.mxu1 %v6833_v54 }
0x140e   :  { %7765 = vmatmul.mubr.msk.f32.vlgmr.msra.gmra.mxu1 %vm357_vm3, %v8886_v63  ;;  %v6813_v63 = vld [vmem:[%s9295_s5 + $0x28] sm:$0xff] }
0x140f   :  { %7767 = vmatprep.mubr.msk.f32.mxu1 %vm357_vm3, %v8892_v32  ;;  %7785 = vmatpush3.msra.mxu1 %v6833_v54 }
0x1410   :  { %7786 = vmatprep.subr.mxu1 %v6832_v5  ;;  %7754 = vmatprep.subr.mxu0 %v6813_v63 }
0x1411   :  { %7787 = vmatpush3.msra.mxu1 %v6832_v5  ;;  %7755 = vmatpush3.msra.mxu0 %v6813_v63 }
0x1412   :  { %7768 = vmatmul.mubr.msk.f32.gmra.mxu1 %vm357_vm3, %v8890_v1  ;;  %7788 = vmatprep.subr.mxu1 %v6831_v25  ;;  %v6825_v1 = vld [vmem:[%s9292_s2 + $0xd8] sm:$0xff] }
0x1413   :  { %7789 = vmatpush3.msra.mxu1 %v6831_v25  ;;  %7792 = vmatprep.mubr.msk.f32.mxu1 %vm41_vm0, %v8733_v29 }
0x1414   :  { %7790 = vmatprep.subr.mxu1 %v6830_v0  ;;  %7770 = vmatprep.subr.mxu0 %v6825_v1 }
0x1415   :  { %7791 = vmatpush3.msra.mxu1 %v6830_v0 }
0x1416   :  { %7793 = vmatmul.mubr.msk.f32.vlgmr.msra.gmra.mxu1 %vm41_vm0, %v8735_v33 }
0x1417   :  { %7795 = vmatprep.mubr.msk.f32.mxu1 %vm41_vm0, %v8751_v55 }
0x141a   :  { %7796 = vmatmul.mubr.msk.f32.gmra.mxu1 %vm41_vm0, %v8753_v15 }
0x14c6   :  { %v7746_v32 = vpop.f32.mrf.mxu1 }
0x14c8   :  { %v4370_v16 = vpop.f32.mrf.mxu1 }
0x14c9   :  { %7756 = vmatprep.mubr.msk.f32.mxu0 %vm357_vm3, %v4370_v16 }
0x14ca   :  { %v7753_v26 = vpop.f32.mrf.mxu1  ;;  %7757 = vmatmul.mubr.msk.f32.vlgmr.msra.gmra.mxu0 %vm357_vm3, %v7746_v32 }
0x14cb   :  { %7771 = vmatpush3.msra.mxu0 %v6825_v1 }
0x14cc   :  { %v4451_v27 = vpop.f32.mrf.mxu1  ;;  %7772 = vmatprep.subr.mxu0 %v6824_v17 }
0x14cd   :  { %7759 = vmatprep.mubr.msk.f32.mxu0 %vm357_vm3, %v4451_v27  ;;  %7773 = vmatpush3.msra.mxu0 %v6824_v17 }
0x14ce   :  { %7760 = vmatmul.mubr.msk.f32.gmra.mxu0 %vm357_vm3, %v7753_v26  ;;  %v8984_v6 = vpop.f32.mrf.mxu1  ;;  %7774 = vmatprep.subr.mxu0 %v6823_v18 }
0x14cf   :  { %7775 = vmatpush3.msra.mxu0 %v6823_v18  ;;  %7778 = vmatprep.mubr.msk.f32.mxu0 %vm41_vm0, %v8733_v29 }
0x14d0   :  { %v8991_v10 = vpop.f32.mrf.mxu1  ;;  %7776 = vmatprep.subr.mxu0 %v6822_v28 }
0x14d1   :  { %7777 = vmatpush3.msra.mxu0 %v6822_v28 }
0x14d2   :  { %v8996_v9 = vpop.f32.mrf.mxu1  ;;  %7779 = vmatmul.mubr.msk.f32.vlgmr.msra.gmra.mxu0 %vm41_vm0, %v8735_v33  ;;  %7798 = vmatprep.subr.mxu0 %v6841_v7 }
0x14d3   :  { %7781 = vmatprep.mubr.msk.f32.mxu0 %vm41_vm0, %v8751_v55  ;;  %7799 = vmatpush3.msra.mxu0 %v6841_v7 }
0x14d4   :  { %v9005_v13 = vpop.f32.mrf.mxu1  ;;  %7800 = vmatprep.subr.mxu0 %v6840_v11 }
0x14d5   :  { %7801 = vmatpush3.msra.mxu0 %v6840_v11 }
0x14d6   :  { %7782 = vmatmul.mubr.msk.f32.gmra.mxu0 %vm41_vm0, %v8753_v15  ;;  %v7794_v19 = vpop.f32.mrf.mxu1  ;;  %7802 = vmatprep.subr.mxu0 %v6839_v12 }
0x14d7   :  { %7803 = vmatpush3.msra.mxu0 %v6839_v12  ;;  %7806 = vmatprep.mubr.msk.f32.mxu0 %vm41_vm0, %v8733_v29 }
0x14d8   :  { %7812 = vmatprep.subr.msk.mxu1 %vm357_vm3, %v7794_v19  ;;  %v4817_v20 = vpop.f32.mrf.mxu1  ;;  %7804 = vmatprep.subr.mxu0 %v6838_v14 }
0x14d9   :  { %7813 = vmatpush3.xpose.msk.msra.mxu1 %vm357_vm3, %v7794_v19  ;;  %7805 = vmatpush3.msra.mxu0 %v6838_v14 }
0x14da   :  { %7814 = vmatprep.subr.msk.mxu1 %vm357_vm3, %v4817_v20  ;;  %v7797_v21 = vpop.f32.mrf.mxu1  ;;  %7807 = vmatmul.mubr.msk.f32.vlgmr.msra.gmra.mxu0 %vm41_vm0, %v8735_v33 }
0x14db   :  { %7809 = vmatprep.mubr.msk.f32.mxu0 %vm41_vm0, %v8751_v55  ;;  %7819 = vmatprep.subr.msk.mxu0 %vm357_vm3, %v7797_v21 }
0x14dc   :  { %v4827_v23 = vpop.f32.mrf.mxu1  ;;  %7820 = vmatpush3.xpose.msk.msra.mxu0 %vm357_vm3, %v7797_v21 }
0x14dd   :  { %7815 = vmatpush3.xpose.msk.msra.mxu1 %vm357_vm3, %v4817_v20  ;;  %7821 = vmatprep.subr.msk.mxu0 %vm357_vm3, %v4827_v23 }
0x14de   :  { %7810 = vmatmul.mubr.msk.f32.gmra.mxu0 %vm41_vm0, %v8753_v15 }
0x14e0   :  { %7822 = vmatpush3.xpose.msk.msra.mxu0 %vm357_vm3, %v4827_v23 }
0x158a   :  { %v9028_v24 = vpop.f32.mrf.mxu0 }
0x158c   :  { %v9030_v30 = vpop.f32.mrf.mxu0 }
0x158e   :  { %v9032_v35 = vpop.f32.mrf.mxu0 }
0x1590   :  { %v9034_v36 = vpop.f32.mrf.mxu0 }
0x1592   :  { %v7780_v37 = vpop.f32.mrf.mxu0 }
0x1594   :  { %v4727_v3 = vpop.f32.mrf.mxu0 }
0x1595   :  { %7816 = vmatprep.mubr.msk.f32.mxu1 %vm357_vm3, %v4727_v3 }
0x1596   :  { %v7783_v58 = vpop.f32.mrf.mxu0  ;;  %7817 = vmatmul.mubr.msk.f32.vlgmr.msra.gmra.mxu1 %vm357_vm3, %v7780_v37 }
0x1598   :  { %v4737_v39 = vpop.f32.mrf.mxu0 }
0x1599   :  { %7823 = vmatprep.mubr.msk.f32.mxu0 %vm357_vm3, %v4737_v39 }
0x159a   :  { %v7808_v61 = vpop.f32.mrf.mxu0  ;;  %7824 = vmatmul.mubr.msk.f32.vlgmr.msra.gmra.mxu0 %vm357_vm3, %v7783_v58 }
0x159b   :  { %7826 = vmatprep.subr.mxu1 %v7808_v61 }
0x159c   :  { %v4907_v40 = vpop.f32.mrf.mxu0  ;;  %7827 = vmatpush3.msra.mxu1 %v7808_v61 }
0x159d   :  { %7828 = vmatprep.subr.mxu1 %v4907_v40 }
0x159e   :  { %v9040_v38 = vpop.f32.mrf.mxu0  ;;  %7829 = vmatpush3.msra.mxu1 %v4907_v40 }
0x159f   :  { %7833 = vmatprep.subr.mxu1 %v9040_v38 }
0x15a0   :  { %v9043_v43 = vpop.f32.mrf.mxu0 }
0x1656   :  { %v7818_v41 = vpop.f32.mrf.mxu1 }
0x1657   :  { %v5101_v42 = vmul.f32 0.35355338, %v7818_v41  ;;  %v6866_v41 = vld [vmem:[%s9292_s2 + $0xf8] sm:$0xff] }
0x1658   :  { %v5004_v44 = vpop.f32.mrf.mxu1 }
0x1659   :  { %v5100_v45 = vmul.f32 0.35355338, %v5004_v44  ;;  %v5105_v46 = vsel %vm77_vm4, %v5101_v42, -1e+30  ;;  %v6865_v44 = vld [vmem:[%s9292_s2 + $0xf0] sm:$0xff] }
0x165a   :  { %v7825_v47 = vpop.f32.mrf.mxu0  ;;  %v5111_v48 = vsel %vm542_vm5, %v5105_v46, -inf }
0x165b   :  { %v5103_v50 = vmul.f32 0.35355338, %v7825_v47  ;;  %5112 = vmax.xlane.f32.xlu1 %v5111_v48  ;;  %v5104_v52 = vsel %vm77_vm4, %v5100_v45, -1e+30  ;;  %v6882_v45 = vld [vmem:[%s9294_s4 + $0xf8] sm:$0xff]  ;;  %v6880_v47 = vld [vmem:[%s9294_s4 + $0xe8] sm:$0xff] }
0x165c   :  { %v5091_v57 = vpop.f32.mrf.mxu0  ;;  %v5108_v22 = vsel %vm542_vm5, %v5104_v52, -inf  ;;  %v6879_v48 = vld [vmem:[%s9294_s4 + $0xe0] sm:$0xff] }
0x165d   :  { %v5102_v59 = vmul.f32 0.35355338, %v5091_v57  ;;  %5109 = vmax.xlane.f32.xlu0 %v5108_v22  ;;  %v5107_v31 = vsel %vm77_vm4, %v5103_v50, -1e+30  ;;  %v6858_v50 = vld [vmem:[%s9295_s5 + $0x30] sm:$0xff] }
0x165e   :  { %v5117_v60 = vsel %vm542_vm5, %v5107_v31, -inf  ;;  %7840 = vmatprep.subr.mxu0 %v6858_v50 }
0x165f   :  { %5118 = vmax.xlane.f32.xlu1 %v5117_v60  ;;  %v5106_v53 = vsel %vm77_vm4, %v5102_v59, -1e+30  ;;  %7841 = vmatpush3.msra.mxu0 %v6858_v50  ;;  %v6873_v59 = vld [vmem:[%s9293_s3 + $0xf0] sm:$0xff]  ;;  %v6872_v60 = vld [vmem:[%s9293_s3 + $0xe8] sm:$0xff] }
0x1660   :  { %v5114_v62 = vsel %vm542_vm5, %v5106_v53, -inf }
0x1661   :  { %5115 = vmax.xlane.f32.xlu0 %v5114_v62  ;;  %v6871_v62 = vld [vmem:[%s9293_s3 + $0xe0] sm:$0xff] }
0x16e4   :  { %v5113_v2 = vpop.xlane.xlu1 %5112 }
0x16e5   :  { %v5121_v4 = vsub.f32 %v5105_v46, %v5113_v2  ;;  %v6881_v46 = vld [vmem:[%s9294_s4 + $0xf0] sm:$0xff] }
0x16e6   :  { %v5110_v56 = vpop.xlane.xlu0 %5109 }
0x16e7   :  { %v5126_v34 = vmul.f32 1.442695, %v5121_v4  ;;  %v5120_v54 = vsub.f32 %v5104_v52, %v5110_v56  ;;  %v6874_v52 = vld [vmem:[%s9293_s3 + $0xf8] sm:$0xff] }
0x16e8   :  { %v5119_v5 = vpop.xlane.xlu1 %5118  ;;  %7862 = vmatprep.subr.mxu0 %v6874_v52 }
0x16e9   :  { %8080 = vpow2.f32 %v5126_v34  ;;  %v5124_v25 = vmul.f32 1.442695, %v5120_v54  ;;  %v5123_v0 = vsub.f32 %v5107_v31, %v5119_v5  ;;  %v4643_v54 = vadd.f32 %v8984_v6, %v9028_v24 }
0x16ea   :  { %v5116_v63 = vpop.xlane.xlu0 %5115 }
0x16eb   :  { %8082 = vpow2.f32 %v5124_v25  ;;  %v5130_v1 = vmul.f32 1.442695, %v5123_v0  ;;  %v5122_v32 = vsub.f32 %v5106_v53, %v5116_v63  ;;  %v4638_v25 = vadd.f32 %v8991_v10, %v9030_v30 }
0x16ed   :  { %8084 = vpow2.f32 %v5130_v1  ;;  %v5128_v16 = vmul.f32 1.442695, %v5122_v32  ;;  %v4653_v1 = vadd.f32 %v8996_v9, %v9032_v35 }
0x16ef   :  { %8086 = vpow2.f32 %v5128_v16 }
0x16f6   :  { %v8081_v17 = vpop.eup %8080 }
0x16f7   :  { %v5135_v26 = vsel %vm542_vm5, %v8081_v17, 0.0 }
0x16f8   :  { %v8083_v18 = vpop.eup %8082  ;;  %5136 = vadd.xlane.f32.xlu1 %v5135_v26 }
0x16f9   :  { %v5132_v27 = vsel %vm542_vm5, %v8083_v18, 0.0 }
0x16fa   :  { %v8085_v28 = vpop.eup %8084  ;;  %5133 = vadd.xlane.f32.xlu0 %v5132_v27 }
0x16fb   :  { %v5141_v7 = vsel %vm542_vm5, %v8085_v28, 0.0 }
0x16fc   :  { %v8087_v11 = vpop.eup %8086  ;;  %5142 = vadd.xlane.f32.xlu1 %v5141_v7 }
0x16fd   :  { %v5138_v12 = vsel %vm542_vm5, %v8087_v11, 0.0 }
0x16fe   :  { %5139 = vadd.xlane.f32.xlu0 %v5138_v12 }
0x1781   :  { %v5137_v14 = vpop.xlane.xlu1 %5136 }
0x1782   :  { %8088 = vrcp.f32 %v5137_v14 }
0x1783   :  { %v5134_v19 = vpop.xlane.xlu0 %5133 }
0x1784   :  { %8090 = vrcp.f32 %v5134_v19 }
0x1785   :  { %v5143_v20 = vpop.xlane.xlu1 %5142 }
0x1786   :  { %8092 = vrcp.f32 %v5143_v20 }
0x1787   :  { %v5140_v21 = vpop.xlane.xlu0 %5139 }
0x1788   :  { %8094 = vrcp.f32 %v5140_v21 }
0x178f   :  { %v8089_v23 = vpop.eup %8088 }
0x1790   :  { %v5149_v58 = vmul.f32 %v8089_v23, %v8081_v17  ;;  %v4648_v17 = vadd.f32 %v9005_v13, %v9034_v36 }
0x1791   :  { %v8091_v37 = vpop.eup %8090 }
0x1792   :  { %v5148_v3 = vmul.f32 %v8091_v37, %v8083_v18 }
0x1793   :  { %v8093_v39 = vpop.eup %8092 }
0x1794   :  { %7830 = vmatprep.mubr.msk.f32.mxu1 %vm542_vm5, %v5148_v3  ;;  %v5151_v42 = vmul.f32 %v8093_v39, %v8085_v28 }
0x1795   :  { %v8095_v61 = vpop.eup %8094  ;;  %7831 = vmatmul.mubr.msk.f32.vlgmr.msra.gmra.mxu1 %vm542_vm5, %v5149_v58 }
0x1796   :  { %7834 = vmatpush3.msra.mxu1 %v9040_v38  ;;  %v5150_v40 = vmul.f32 %v8095_v61, %v8087_v11  ;;  %v6864_v38 = vld [vmem:[%s9292_s2 + $0xe8] sm:$0xff] }
0x1797   :  { %7835 = vmatprep.subr.mxu1 %v9043_v43 }
0x1798   :  { %7836 = vmatpush3.msra.mxu1 %v9043_v43  ;;  %7837 = vmatprep.mubr.msk.f32.mxu1 %vm542_vm5, %v5150_v40  ;;  %v6863_v43 = vld [vmem:[%s9292_s2 + $0xe0] sm:$0xff] }
0x1799   :  { %7848 = vmatprep.subr.mxu1 %v6866_v41  ;;  %7838 = vmatmul.mubr.msk.f32.vlgmr.msra.gmra.mxu1 %vm542_vm5, %v5151_v42 }
0x179a   :  { %7849 = vmatpush3.msra.mxu1 %v6866_v41  ;;  %7856 = vmatprep.mubr.msk.f32.mxu1 %vm41_vm0, %v8733_v29 }
0x179b   :  { %7850 = vmatprep.subr.mxu1 %v6865_v44 }
0x179c   :  { %7851 = vmatpush3.msra.mxu1 %v6865_v44 }
0x179d   :  { %7852 = vmatprep.subr.mxu1 %v6864_v38 }
0x179e   :  { %7853 = vmatpush3.msra.mxu1 %v6864_v38 }
0x179f   :  { %7854 = vmatprep.subr.mxu1 %v6863_v43 }
0x17a0   :  { %7855 = vmatpush3.msra.mxu1 %v6863_v43 }
0x17a1   :  { %7857 = vmatmul.mubr.msk.f32.vlgmr.msra.gmra.mxu1 %vm41_vm0, %v8735_v33  ;;  %7876 = vmatprep.subr.mxu1 %v6882_v45 }
0x17a2   :  { %7859 = vmatprep.mubr.msk.f32.mxu1 %vm41_vm0, %v8751_v55  ;;  %7877 = vmatpush3.msra.mxu1 %v6882_v45 }
0x17a3   :  { %7878 = vmatprep.subr.mxu1 %v6881_v46 }
0x17a4   :  { %7879 = vmatpush3.msra.mxu1 %v6881_v46 }
0x17a5   :  { %7860 = vmatmul.mubr.msk.f32.gmra.mxu1 %vm41_vm0, %v8753_v15  ;;  %7880 = vmatprep.subr.mxu1 %v6880_v47 }
0x17a6   :  { %7881 = vmatpush3.msra.mxu1 %v6880_v47  ;;  %7884 = vmatprep.mubr.msk.f32.mxu1 %vm41_vm0, %v8733_v29 }
0x17a7   :  { %7882 = vmatprep.subr.mxu1 %v6879_v48 }
0x17a8   :  { %7883 = vmatpush3.msra.mxu1 %v6879_v48 }
0x17a9   :  { %7885 = vmatmul.mubr.msk.f32.vlgmr.msra.gmra.mxu1 %vm41_vm0, %v8735_v33 }
0x17aa   :  { %7887 = vmatprep.mubr.msk.f32.mxu1 %vm41_vm0, %v8751_v55 }
0x17ad   :  { %7888 = vmatmul.mubr.msk.f32.gmra.mxu1 %vm41_vm0, %v8753_v15 }
0x1855   :  { %v7832_v57 = vpop.f32.mrf.mxu1 }
0x1857   :  { %v5224_v22 = vpop.f32.mrf.mxu1 }
0x1858   :  { %7842 = vmatprep.mubr.msk.f32.mxu0 %vm357_vm3, %v5224_v22 }
0x1859   :  { %v7839_v31 = vpop.f32.mrf.mxu1  ;;  %7843 = vmatmul.mubr.msk.f32.vlgmr.msra.gmra.mxu0 %vm357_vm3, %v7832_v57 }
0x185a   :  { %7863 = vmatpush3.msra.mxu0 %v6874_v52 }
0x185b   :  { %v5305_v53 = vpop.f32.mrf.mxu1  ;;  %7864 = vmatprep.subr.mxu0 %v6873_v59 }
0x185c   :  { %7845 = vmatprep.mubr.msk.f32.mxu0 %vm357_vm3, %v5305_v53  ;;  %7865 = vmatpush3.msra.mxu0 %v6873_v59 }
0x185d   :  { %7846 = vmatmul.mubr.msk.f32.gmra.mxu0 %vm357_vm3, %v7839_v31  ;;  %7866 = vmatprep.subr.mxu0 %v6872_v60 }
0x185e   :  { %7867 = vmatpush3.msra.mxu0 %v6872_v60  ;;  %7870 = vmatprep.mubr.msk.f32.mxu0 %vm41_vm0, %v8733_v29 }
0x185f   :  { %7868 = vmatprep.subr.mxu0 %v6871_v62 }
0x1860   :  { %7869 = vmatpush3.msra.mxu0 %v6871_v62 }
0x1861   :  { %v7858_v2 = vpop.f32.mrf.mxu1  ;;  %7871 = vmatmul.mubr.msk.f32.vlgmr.msra.gmra.mxu0 %vm41_vm0, %v8735_v33 }
0x1862   :  { %7873 = vmatprep.mubr.msk.f32.mxu0 %vm41_vm0, %v8751_v55 }
0x1863   :  { %v5488_v4 = vpop.f32.mrf.mxu1 }
0x1865   :  { %v7861_v56 = vpop.f32.mrf.mxu1  ;;  %7874 = vmatmul.mubr.msk.f32.gmra.mxu0 %vm41_vm0, %v8753_v15 }
0x1866   :  { %7894 = vmatprep.mubr.msk.f32.mxu0 %vm357_vm3, %v5488_v4 }
0x1867   :  { %v5498_v34 = vpop.f32.mrf.mxu1 }
0x1868   :  { %7901 = vmatprep.mubr.msk.f32.mxu1 %vm357_vm3, %v5498_v34 }
0x1869   :  { %v7886_v9 = vpop.f32.mrf.mxu1 }
0x186b   :  { %v5668_v13 = vpop.f32.mrf.mxu1 }
0x186d   :  { %v9162_v36 = vpop.f32.mrf.mxu1 }
0x186f   :  { %v9166_v7 = vpop.f32.mrf.mxu1 }
0x1919   :  { %v7844_v5 = vpop.f32.mrf.mxu0 }
0x191a   :  { %v9141_v0 = vadd.f32 %v7844_v5, %v4643_v54 }
0x191b   :  { %v5394_v63 = vpop.f32.mrf.mxu0 }
0x191c   :  { %v9145_v32 = vadd.f32 %v5394_v63, %v4638_v25 }
0x191d   :  { %v7847_v16 = vpop.f32.mrf.mxu0 }
0x191e   :  { %v9149_v26 = vadd.f32 %v7847_v16, %v4653_v1 }
0x191f   :  { %v5404_v18 = vpop.f32.mrf.mxu0 }
0x1920   :  { %v9151_v6 = vadd.f32 %v5404_v18, %v4648_v17 }
0x1921   :  { %v7872_v24 = vpop.f32.mrf.mxu0 }
0x1922   :  { %7890 = vmatprep.subr.msk.mxu0 %vm357_vm3, %v7872_v24 }
0x1923   :  { %v5578_v10 = vpop.f32.mrf.mxu0  ;;  %7891 = vmatpush3.xpose.msk.msra.mxu0 %vm357_vm3, %v7872_v24 }
0x1924   :  { %7892 = vmatprep.subr.msk.mxu0 %vm357_vm3, %v5578_v10 }
0x1925   :  { %v7875_v30 = vpop.f32.mrf.mxu0 }
0x1926   :  { %7897 = vmatprep.subr.msk.mxu1 %vm357_vm3, %v7875_v30 }
0x1927   :  { %v5588_v35 = vpop.f32.mrf.mxu0  ;;  %7893 = vmatpush3.xpose.msk.msra.mxu0 %vm357_vm3, %v5578_v10  ;;  %7898 = vmatpush3.xpose.msk.msra.mxu1 %vm357_vm3, %v7875_v30 }
0x1928   :  { %7899 = vmatprep.subr.msk.mxu1 %vm357_vm3, %v5588_v35  ;;  %7904 = vmatprep.subr.mxu0 %v7886_v9 }
0x192a   :  { %7895 = vmatmul.mubr.msk.f32.vlgmr.msra.gmra.mxu0 %vm357_vm3, %v7858_v2 }
0x192b   :  { %7900 = vmatpush3.xpose.msk.msra.mxu1 %vm357_vm3, %v5588_v35  ;;  %7905 = vmatpush3.msra.mxu0 %v7886_v9  ;;  %v6899_v9 = vld [vmem:[%s9295_s5 + $0x38] sm:$0xff] }
0x192c   :  { %7906 = vmatprep.subr.mxu0 %v5668_v13  ;;  %7918 = vmatprep.subr.mxu1 %v6899_v9 }
0x192d   :  { %7907 = vmatpush3.msra.mxu0 %v5668_v13 }
0x192e   :  { %7902 = vmatmul.mubr.msk.f32.vlgmr.msra.gmra.mxu1 %vm357_vm3, %v7861_v56  ;;  %7911 = vmatprep.subr.mxu0 %v9162_v36 }
0x192f   :  { %7919 = vmatpush3.msra.mxu1 %v6899_v9 }
0x1930   :  { %7937 = vmatprep.subr.mxu1 %v8138_v8 }
0x19ea   :  { %v7896_v27 = vpop.f32.mrf.mxu0 }
0x19eb   :  { %v5862_v28 = vmul.f32 0.35355338, %v7896_v27  ;;  %v6907_v27 = vld [vmem:[%s9296_s6 + $0x38] sm:$0xff] }
0x19ec   :  { %v5765_v11 = vpop.f32.mrf.mxu0 }
0x19ed   :  { %v5861_v12 = vmul.f32 0.35355338, %v5765_v11  ;;  %v5866_v14 = vsel %vm77_vm4, %v5862_v28, -1e+30  ;;  %v6906_v28 = vld [vmem:[%s9296_s6 + $0x30] sm:$0xff]  ;;  %v6905_v11 = vld [vmem:[%s9296_s6 + $0x28] sm:$0xff] }
0x19ee   :  { %v7903_v19 = vpop.f32.mrf.mxu1  ;;  %v5872_v20 = vsel %vm542_vm5, %v5866_v14, -inf }
0x19ef   :  { %v5864_v21 = vmul.f32 0.35355338, %v7903_v19  ;;  %5873 = vmax.xlane.f32.xlu1 %v5872_v20  ;;  %v5865_v23 = vsel %vm77_vm4, %v5861_v12, -1e+30  ;;  %v6184_v12 = vld [vmem:[%s9296_s6 + $0x10] sm:$0xff]  ;;  %v6183_v19 = vld [vmem:[%s9296_s6 + $0x8] sm:$0xff] }
0x19f0   :  { %v5852_v37 = vpop.f32.mrf.mxu1  ;;  %v5869_v3 = vsel %vm542_vm5, %v5865_v23, -inf  ;;  %v6353_v20 = vld [vmem:[%s9297_s7 + $0x18] sm:$0xff] }
0x19f1   :  { %v5863_v58 = vmul.f32 0.35355338, %v5852_v37  ;;  %5870 = vmax.xlane.f32.xlu0 %v5869_v3  ;;  %v5868_v39 = vsel %vm77_vm4, %v5864_v21, -1e+30  ;;  %v6182_v21 = vld [vmem:[%s9296_s6] sm:$0xff] }
0x19f2   :  { %v5878_v61 = vsel %vm542_vm5, %v5868_v39, -inf }
0x19f3   :  { %5879 = vmax.xlane.f32.xlu1 %v5878_v61  ;;  %v5867_v40 = vsel %vm77_vm4, %v5863_v58, -1e+30 }
0x19f4   :  { %v5875_v41 = vsel %vm542_vm5, %v5867_v40, -inf }
0x19f5   :  { %5876 = vmax.xlane.f32.xlu0 %v5875_v41 }
0x1a78   :  { %v5874_v42 = vpop.xlane.xlu1 %5873 }
0x1a79   :  { %v5882_v44 = vsub.f32 %v5866_v14, %v5874_v42  ;;  %v6904_v14 = vld [vmem:[%s9296_s6 + $0x20] sm:$0xff] }
0x1a7a   :  { %v5871_v38 = vpop.xlane.xlu0 %5870 }
0x1a7b   :  { %v5887_v43 = vmul.f32 1.442695, %v5882_v44  ;;  %v5881_v45 = vsub.f32 %v5865_v23, %v5871_v38 }
0x1a7c   :  { %v5880_v46 = vpop.xlane.xlu1 %5879 }
0x1a7d   :  { %8096 = vpow2.f32 %v5887_v43  ;;  %v5885_v47 = vmul.f32 1.442695, %v5881_v45  ;;  %v5884_v48 = vsub.f32 %v5868_v39, %v5880_v46  ;;  %v6478_v45 = vld [vmem:[%s9299_s9 + $0x30] sm:$0xff]  ;;  %v6476_v46 = vld [vmem:[%s9299_s9 + $0x20] sm:$0xff] }
0x1a7e   :  { %v5877_v50 = vpop.xlane.xlu0 %5876 }
0x1a7f   :  { %8098 = vpow2.f32 %v5885_v47  ;;  %v5891_v52 = vmul.f32 1.442695, %v5884_v48  ;;  %v5883_v57 = vsub.f32 %v5867_v40, %v5877_v50  ;;  %v6475_v47 = vld [vmem:[%s9299_s9 + $0x18] sm:$0xff]  ;;  %v6474_v48 = vld [vmem:[%s9299_s9 + $0x10] sm:$0xff]  ;;  %v6473_v50 = vld [vmem:[%s9299_s9 + $0x8] sm:$0xff] }
0x1a81   :  { %8100 = vpow2.f32 %v5891_v52  ;;  %v5889_v22 = vmul.f32 1.442695, %v5883_v57  ;;  %v6472_v52 = vld [vmem:[%s9299_s9] sm:$0xff]  ;;  %v8140_v57 = vmov 1966171168  }
0x1a83   :  { %8102 = vpow2.f32 %v5889_v22  ;;  %v6437_v22 = vunpack.c.l.s4 %v8140_v57 }
0x1a8a   :  { %v8097_v51 = vpop.eup %8096 }
0x1a8b   :  { %v5896_v59 = vsel %vm542_vm5, %v8097_v51, 0.0 }
0x1a8c   :  { %v8099_v31 = vpop.eup %8098  ;;  %5897 = vadd.xlane.f32.xlu1 %v5896_v59  ;;  %v6440_v59 = vshrl.u32 %v75_v49, 7 }
0x1a8d   :  { %v5893_v60 = vsel %vm542_vm5, %v8099_v31, 0.0 }
0x1a8e   :  { %v8101_v53 = vpop.eup %8100  ;;  %5894 = vadd.xlane.f32.xlu0 %v5893_v60 }
0x1a8f   :  { %v5902_v62 = vsel %vm542_vm5, %v8101_v53, 0.0 }
0x1a90   :  { %v8103_v2 = vpop.eup %8102  ;;  %5903 = vadd.xlane.f32.xlu1 %v5902_v62  ;;  %v6910_v62 = vld [vmem:[%s9298_s8] ss:$0 sm:$0xff] }
0x1a91   :  { %v5899_v4 = vsel %vm542_vm5, %v8103_v2, 0.0 }
0x1a92   :  { %5900 = vadd.xlane.f32.xlu0 %v5899_v4 }
0x1b15   :  { %v5898_v56 = vpop.xlane.xlu1 %5897 }
0x1b16   :  { %8104 = vrcp.f32 %v5898_v56 }
0x1b17   :  { %v5895_v34 = vpop.xlane.xlu0 %5894 }
0x1b18   :  { %8106 = vrcp.f32 %v5895_v34 }
0x1b19   :  { %v5904_v54 = vpop.xlane.xlu1 %5903 }
0x1b1a   :  { %8108 = vrcp.f32 %v5904_v54 }
0x1b1b   :  { %v5901_v5 = vpop.xlane.xlu0 %5900 }
0x1b1c   :  { %8110 = vrcp.f32 %v5901_v5  ;;  %v6460_v5 = vsub.s32 0, %v6440_v59 }
0x1b23   :  { %v8105_v25 = vpop.eup %8104 }
0x1b24   :  { %v5910_v16 = vmul.f32 %v8105_v25, %v8097_v51  ;;  %v6438_v51 = vunpack.c.0.s8 %v6437_v22 }
0x1b25   :  { %v8107_v63 = vpop.eup %8106 }
0x1b26   :  { %v5909_v1 = vmul.f32 %v8107_v63, %v8099_v31  ;;  %v6441_v4 = vsub.s32 %v6438_v51, %v6440_v59 }
0x1b27   :  { %v8109_v17 = vpop.eup %8108 }
0x1b28   :  { %7908 = vmatprep.mubr.msk.f32.mxu0 %vm542_vm5, %v5909_v1  ;;  %v5912_v10 = vmul.f32 %v8109_v17, %v8101_v53 }
0x1b29   :  { %v8111_v18 = vpop.eup %8110  ;;  %7909 = vmatmul.mubr.msk.f32.vlgmr.msra.gmra.mxu0 %vm542_vm5, %v5910_v16 }
0x1b2a   :  { %7912 = vmatpush3.msra.mxu0 %v9162_v36  ;;  %v5911_v24 = vmul.f32 %v8111_v18, %v8103_v2 }
0x1b2b   :  { %7913 = vmatprep.subr.mxu0 %v9166_v7 }
0x1b2c   :  { %7914 = vmatpush3.msra.mxu0 %v9166_v7  ;;  %7915 = vmatprep.mubr.msk.f32.mxu0 %vm542_vm5, %v5911_v24  ;;  %v6185_v7 = vld [vmem:[%s9296_s6 + $0x18] sm:$0xff] }
0x1b2d   :  { %7916 = vmatmul.mubr.msk.f32.vlgmr.msra.gmra.mxu0 %vm542_vm5, %v5912_v10  ;;  %7926 = vmatprep.subr.mxu0 %v8138_v8 }
0x1b2e   :  { %7927 = vmatpush3.msra.mxu0 %v6907_v27  ;;  %7934 = vmatprep.mubr.msk.f32.mxu0 %vm8139_vm6, %v8138_v8 }
0x1b2f   :  { %7928 = vmatprep.subr.mxu0 %v8138_v8 }
0x1b30   :  { %7929 = vmatpush3.msra.mxu0 %v6906_v28 }
0x1b31   :  { %7930 = vmatprep.subr.mxu0 %v8138_v8 }
0x1b32   :  { %7931 = vmatpush3.msra.mxu0 %v6905_v11 }
0x1b33   :  { %7932 = vmatprep.subr.mxu0 %v8138_v8 }
0x1b34   :  { %7933 = vmatpush3.msra.mxu0 %v6904_v14 }
0x1b35   :  { %7948 = vmatprep.subr.mxu0 %v6353_v20 }
0x1be9   :  { %v7910_v30 = vpop.f32.mrf.mxu0 }
0x1beb   :  { %v5985_v35 = vpop.f32.mrf.mxu0 }
0x1bec   :  { %7920 = vmatprep.mubr.msk.f32.mxu1 %vm357_vm3, %v5985_v35  ;;  %v6915_v35 = vld [vmem:[%s9300_s10] ss:$0 sm:$0xff] }
0x1bed   :  { %v7917_v13 = vpop.f32.mrf.mxu0  ;;  %7921 = vmatmul.mubr.msk.f32.vlgmr.msra.gmra.mxu1 %vm357_vm3, %v7910_v30 }
0x1bee   :  { %7938 = vmatpush3.msra.mxu1 %v6185_v7 }
0x1bef   :  { %v6066_v36 = vpop.f32.mrf.mxu0  ;;  %7939 = vmatprep.subr.mxu1 %v8138_v8 }
0x1bf0   :  { %7923 = vmatprep.mubr.msk.f32.mxu1 %vm357_vm3, %v6066_v36  ;;  %7940 = vmatpush3.msra.mxu1 %v6184_v12 }
0x1bf1   :  { %7924 = vmatmul.mubr.msk.f32.gmra.mxu1 %vm357_vm3, %v7917_v13  ;;  %7941 = vmatprep.subr.mxu1 %v8138_v8 }
0x1bf2   :  { %7942 = vmatpush3.msra.mxu1 %v6183_v19  ;;  %7945 = vmatprep.mubr.msk.f32.mxu1 %vm8139_vm6, %v8138_v8 }
0x1bf3   :  { %7943 = vmatprep.subr.mxu1 %v8138_v8 }
0x1bf4   :  { %7944 = vmatpush3.msra.mxu1 %v6182_v21 }
0x1cad   :  { %v7922_v23 = vpop.f32.mrf.mxu1 }
0x1cae   :  { %v6175_v37 = vadd.f32 %v7922_v23, %v9141_v0  ;;  %v6352_v0 = vld [vmem:[%s9297_s7 + $0x10] sm:$0xff] }
0x1caf   :  { %v6155_v3 = vpop.f32.mrf.mxu1 }
0x1cb0   :  { %v6179_v58 = vadd.f32 %v6175_v37, %v8735_v33  ;;  %v6174_v61 = vadd.f32 %v6155_v3, %v9145_v32  ;;  %v6351_v32 = vld [vmem:[%s9297_s7 + $0x8] sm:$0xff] }
0x1cb1   :  { %v7925_v39 = vpop.f32.mrf.mxu1 }
0x1cb2   :  { %v6177_v40 = vadd.f32 %v7925_v39, %v9149_v26  ;;  %v6193_v41 = vrot.slane %v6179_v58, 1  ;;  %v6178_v44 = vadd.f32 %v6174_v61, %v8733_v29  ;;  %v6350_v29 = vld [vmem:[%s9297_s7] sm:$0xff] }
0x1cb3   :  { %v6165_v43 = vpop.f32.mrf.mxu1 }
0x1cb4   :  { %v6181_v42 = vadd.f32 %v6177_v40, %v8753_v15  ;;  %v6176_v15 = vadd.f32 %v6165_v43, %v9151_v6  ;;  %v6479_v6 = vld [vmem:[%s9299_s9 + $0x38] sm:$0xff] }
0x1cb5   :  { %7959 = vmatprep.subr.mxu1 %v6479_v6 }
0x1cb6   :  { %v6268_v38 = vrot.slane %v6181_v42, 7  ;;  %v6195_v8 = vsel %vm6194_vm7, %v6181_v42, %v6193_v41  ;;  %v6180_v26 = vadd.f32 %v6176_v15, %v8751_v55  ;;  %v6477_v55 = vld [vmem:[%s9299_s9 + $0x28] sm:$0xff] }
0x1cb7   :  { %7935 = vmatmul.mubr.msk.f32.vlgmr.msra.gmra.mxu0 %vm41_vm0, %v6195_v8 }
0x1cb8   :  { %7949 = vmatpush3.msra.mxu0 %v6353_v20  ;;  %7956 = vmatprep.mubr.msk.f32.mxu0 %vm41_vm0, %v6178_v44  ;;  %v6269_v33 = vsel %vm6194_vm7, %v6268_v38, %v6179_v58 }
0x1cb9   :  { %7950 = vmatprep.subr.mxu0 %v6352_v0  ;;  %7946 = vmatmul.mubr.msk.f32.vlgmr.msra.gmra.mxu1 %vm41_vm0, %v6269_v33 }
0x1cba   :  { %7951 = vmatpush3.msra.mxu0 %v6352_v0  ;;  %7960 = vmatpush3.msra.mxu1 %v6479_v6 }
0x1cbb   :  { %7952 = vmatprep.subr.mxu0 %v6351_v32  ;;  %7961 = vmatprep.subr.mxu1 %v6478_v45 }
0x1cbc   :  { %7953 = vmatpush3.msra.mxu0 %v6351_v32  ;;  %7962 = vmatpush3.msra.mxu1 %v6478_v45 }
0x1cbd   :  { %7954 = vmatprep.subr.mxu0 %v6350_v29  ;;  %7963 = vmatprep.subr.mxu1 %v6477_v55 }
0x1cbe   :  { %7955 = vmatpush3.msra.mxu0 %v6350_v29  ;;  %7964 = vmatpush3.msra.mxu1 %v6477_v55 }
0x1cbf   :  { %7957 = vmatmul.mubr.msk.f32.vlgmr.msra.gmra.mxu0 %vm41_vm0, %v6180_v26  ;;  %7965 = vmatprep.subr.mxu1 %v6476_v46 }
0x1cc0   :  { %7966 = vmatpush3.msra.mxu1 %v6476_v46 }
0x1cc1   :  { %7967 = vmatprep.subr.mxu1 %v6475_v47 }
0x1cc2   :  { %7968 = vmatpush3.msra.mxu1 %v6475_v47 }
0x1cc3   :  { %7969 = vmatprep.subr.mxu1 %v6474_v48 }
0x1cc4   :  { %7970 = vmatpush3.msra.mxu1 %v6474_v48 }
0x1cc5   :  { %7971 = vmatprep.subr.mxu1 %v6473_v50 }
0x1cc6   :  { %7972 = vmatpush3.msra.mxu1 %v6473_v50 }
0x1cc7   :  { %7973 = vmatprep.subr.mxu1 %v6472_v52 }
0x1cc8   :  { %7974 = vmatpush3.msra.mxu1 %v6472_v52 }
0x1d77   :  { %v6264_v31 = vpop.f32.mrf.mxu0 }
0x1d79   :  { %v7936_v60 = vpop.f32.mrf.mxu0  ;;  %v6338_v53 = vpop.f32.mrf.mxu1 }
0x1d7a   :  { %v6339_v2 = vadd.f32 %v6338_v53, %v6264_v31 }
0x1d7b   :  { %v7947_v56 = vpop.f32.mrf.mxu1 }
0x1d7c   :  { %v6349_v34 = vadd.f32 %v6910_v62, %v6339_v2 }
0x1d7e   :  { %v6442_v54 = vrot.slane %v6349_v34, %v6441_v4 }
0x1d7f   :  { %v7958_v25 = vpop.f32.mrf.mxu0 }
0x1d80   :  { %v6443_v63 = vcombine.high %v6442_v54, %v6442_v54  ;;  %v6450_v1 = vrot.slane %v6442_v54, %v6441_v4 }
0x1d81   :  { %v6426_v18 = vpop.f32.mrf.mxu0 }
0x1d82   :  { %v6457_v16 = vrot.slane %v6443_v63, %v6441_v4  ;;  %v6461_v17 = vrot.slane %v6450_v1, %v6460_v5 }
0x1d84   :  { %v6465_v49 = vrot.slane %v6457_v16, %v6460_v5  ;;  %v6468_v24 = vadd.f32 %v6461_v17, %v6426_v18 }
0x1d86   :  { %v6469_v10 = vadd.f32 %v7958_v25, %v6465_v49  ;;  %v6470_v9 = vmax.f32 %v6468_v24, 0.0 }
0x1d88   :  { %v6471_v30 = vmax.f32 %v6469_v10, 0.0  ;;  %7975 = vmatprep.mubr.msk.f32.mxu1 %vm6480_vm8, %v6470_v9 }
0x1d8a   :  { %7976 = vmatmul.mubr.msk.f32.vlgmr.msra.gmra.mxu1 %vm6480_vm8, %v6471_v30 }
0x1e4a   :  { %v7977_v13 = vpop.f32.mrf.mxu1 }
0x1e4b   :  { %v6570_v36 = vadd.f32 %v7977_v13, %v6915_v35 }
0x1e4c   :  { %v6553_v27 = vpop.f32.mrf.mxu1 }
0x1e4d   :  { %6572 = vst [vmem:[#allocation3 + $0x8] sm:$0xff] %v6570_v36  ;;  %v6569_v28 = vadd.f32 %v6915_v35, %v6553_v27 }
0x1e4f   :  { %6571 = vst [vmem:[#allocation3] sm:$0xff] %v6569_v28 }
0x1e50   :  { %8127 = shalt.err (!%p8124_p4)
}
0x1e51   :  { %s8142_s6 = smov 128   ;;  %s8143_s16 = smov 8  }
0x1e52   :  { %6584 = dma.vmem_to_hbm [thread:$0]  %s6579_s14, 256, %s9301_s11, [#allocation4], %s8142_s6, %s8142_s6, %s8143_s16  }
0x1e53   :  { %8136 = dma.done.wait [#allocation4], 256  }
0x1e54   :  { %8137 = vsyncadd [#allocation4], 4294967040 }
0x1e55   :  { %6588 = vsyncpa [#allocation4], 1 }

</bundles_post_ra>
